<compile_context>
chip_gen: v7x
topology: tpu7x:2x2x1
jax: 0.10.0
libtpu: 0.0.40
codegen_flags: <defaults>
</compile_context>

<pallas_src>
import numpy as np

import jax
import jax.numpy as jnp
from jax.experimental import pallas as pl
from jax.experimental.pallas import tpu as pltpu


# ----------------------------------------------------------------------------
# small helpers
# ----------------------------------------------------------------------------
def _relu(x):
    return jnp.maximum(x, 0.0)


def _relu6(x):
    return jnp.minimum(jnp.maximum(x, 0.0), 6.0)


def _dot(a_bf16, b_bf16):
    # bf16 operands, f32 accumulation on the MXU.
    return jnp.dot(a_bf16, b_bf16, preferred_element_type=jnp.float32)


def _act_spec(shape):
    """Per-image activation BlockSpec: tile over the batch grid axis."""
    nd = len(shape)
    return pl.BlockSpec((1,) + tuple(shape[1:]),
                        lambda b: (b,) + (0,) * (nd - 1))


def _rep_spec(shape):
    """Replicated (weight / constant) BlockSpec: same full block every step."""
    nd = len(shape)
    return pl.BlockSpec(tuple(shape), lambda b: (0,) * nd)


_COMPILER_PARAMS = pltpu.CompilerParams(
    dimension_semantics=("parallel",),   # batch grid -> both TCs on v7x
    vmem_limit_bytes=32 * 1024 * 1024,   # explicit raise for v5e's 16 MiB default
)


# ----------------------------------------------------------------------------
# the fused forward kernel (activations are (C, M) f32, M = H*W lane-dense)
# ----------------------------------------------------------------------------
def _ir_body(x_f32, we_ref, be_ref, s_ref, wd_ref, bd_ref, wp_ref, bp_ref):
    """MobileNetV2 inverted residual: expand 1x1 -> dw 3x3 -> project 1x1.

    BN scales are pre-folded into we/wd/wp; biases remain.
    s_ref: (M, 9*Mo) bf16 concatenated 0/1 shift matrices (3x3 taps; padding
    and stride folded into the constant) -> a single MXU matmul gathers all
    9 taps, then a cheap 9-way weighted VPU reduce applies the per-channel
    depthwise weights.
    """
    mo = s_ref.shape[1] // 9
    # expand 1x1 conv (+ folded BN) + ReLU6
    e = _relu6(_dot(we_ref[...], x_f32.astype(jnp.bfloat16)) + be_ref[...])
    # depthwise 3x3: one long matmul (amortizes MXU push/drain over 9 taps)
    taps = _dot(e.astype(jnp.bfloat16), s_ref[...])            # (Cmid, 9*Mo)
    acc = taps[:, 0:mo] * wd_ref[0]
    for k in range(1, 9):
        acc = acc + taps[:, k * mo:(k + 1) * mo] * wd_ref[k]   # (Cmid, Mo)
    d = _relu6(acc + bd_ref[...])
    # project (linear) 1x1 conv (+ folded BN)
    return _dot(wp_ref[...], d.astype(jnp.bfloat16)) + bp_ref[...]


def _forward_kernel(patch_ref, ws_ref, bs_ref,
                    we1, be1, s1, wd1, bd1, wp1, bp1,
                    we2, be2, s2, wd2, bd2, wp2, bp2,
                    we3, be3, s3, wd3, bd3, wp3, bp3,
                    wn_ref, bb1_ref, bpo_ref, wf1_ref, wf2_ref, bf_ref,
                    wh_ref, bh_ref, u_ref, o_ref):
    # ---- stem 3x3/s2: single matmul over host-built (27, M0) patches -------
    f0 = _relu6(_dot(ws_ref[...], patch_ref[0]) + bs_ref[...])      # (8, M0)
    # ---- inverted-residual block 1 (stride 1, Cin == Cout -> residual) -----
    f1 = _ir_body(f0, we1, be1, s1, wd1, bd1, wp1, bp1) + f0        # (8, M0)
    # ---- inverted-residual block 2 (stride 2) ------------------------------
    f2 = _ir_body(f1, we2, be2, s2, wd2, bd2, wp2, bp2)             # (16, M2)
    # ---- inverted-residual block 3 (stride 2) -> output-stride-8 features --
    f3 = _ir_body(f2, we3, be3, s3, wd3, bd3, wp3, bp3)             # (32, M3)

    # ---- R-ASPP neck --------------------------------------------------------
    # branch1 and the pooled-branch 1x1 conv share one matmul (wn is the
    # row-concat of both weights); GAP commutes with the 1x1 conv so the
    # pooled branch is just a lane-reduce of the bottom rows.
    hid = wf1_ref.shape[0]
    z = _dot(wn_ref[...], f3.astype(jnp.bfloat16))                  # (2h, M3)
    b1 = _relu(z[:hid] + bb1_ref[...])                              # (h, M3)
    pooled = jnp.mean(z[hid:], axis=1, keepdims=True)               # (h, 1)
    pb = _relu(pooled + bpo_ref[...])                               # (h, 1)
    # fusion 1x1 over concat([b1, broadcast(pb)]):
    #   Wf1 @ b1 + (Wf2 @ pb folded into the bias) -- no spatial broadcast.
    extra = _dot(wf2_ref[...], pb.astype(jnp.bfloat16)) + bf_ref[...]
    fus = _relu(_dot(wf1_ref[...], b1.astype(jnp.bfloat16)) + extra)  # (h, M3)

    # ---- 1x1 head + x8 bilinear upsample (kept in f32 for precision) -------
    y = jnp.dot(wh_ref[...], fus, preferred_element_type=jnp.float32) + bh_ref[...]
    o_ref[0] = jnp.dot(y, u_ref[...], preferred_element_type=jnp.float32)


# ----------------------------------------------------------------------------
# host-side constants (numpy, static shapes only)
# ----------------------------------------------------------------------------
def _shift_matrices(h, w, stride):
    """(h*w, 9*ho*wo) concatenated 0/1 matrices for a 3x3 / pad=1 / stride=s
    tap gather: taps = x_flat @ S, tap k living in columns [k*Mo, (k+1)*Mo).
    Zero padding and stride live entirely in the constant (MXU side).
    Only valid at toy resolutions -- see the roll-based TODO above."""
    ho = (h - 1) // stride + 1
    wo = (w - 1) // stride + 1
    a = np.zeros((3, h, ho), np.float32)
    b = np.zeros((3, w, wo), np.float32)
    for k in range(3):
        for o in range(ho):
            i = stride * o + k - 1
            if 0 <= i < h:
                a[k, i, o] = 1.0
        for o in range(wo):
            j = stride * o + k - 1
            if 0 <= j < w:
                b[k, j, o] = 1.0
    s = np.concatenate(
        [np.kron(a[kh], b[kw]) for kh in range(3) for kw in range(3)], axis=1)
    return jnp.asarray(s, jnp.bfloat16), ho, wo


def _bilinear_axis(n_in, n_out):
    """1-D matrix of nn.Upsample(mode='bilinear', align_corners=True)."""
    if n_in == 1:
        return np.ones((n_out, 1), np.float32)
    src = np.arange(n_out, dtype=np.float64) * (n_in - 1) / (n_out - 1)
    i0 = np.clip(np.floor(src).astype(np.int64), 0, n_in - 1)
    i1 = np.minimum(i0 + 1, n_in - 1)
    w1 = (src - i0).astype(np.float32)
    m = np.zeros((n_out, n_in), np.float32)
    m[np.arange(n_out), i0] += 1.0 - w1
    m[np.arange(n_out), i1] += w1
    return m


def _upsample_matrix(h, w, scale):
    """(h*w, h*scale*w*scale) separable bilinear matrix, kept in f32."""
    ah = _bilinear_axis(h, h * scale)
    aw = _bilinear_axis(w, w * scale)
    u = np.kron(ah, aw).T
    return jnp.asarray(u, jnp.float32), h * scale, w * scale


def _stem_patches(x_nchw):
    """Host-side im2col for the 3x3/s2 stem only (Cin=3; a few tens of KB).
    Tap order: (kh, kw) outer, input channel inner (matches the stem weight).
    Note: a flattened PyTorch Conv2d weight is channel-outer/tap-inner; real
    pretrained weights would need a permutation before loading."""
    n, c, h, w = x_nchw.shape
    ho = (h - 1) // 2 + 1
    wo = (w - 1) // 2 + 1
    xp = jnp.pad(x_nchw, ((0, 0), (0, 0), (1, 1), (1, 1)))
    taps = [xp[:, :, kh:kh + 2 * (ho - 1) + 1:2, kw:kw + 2 * (wo - 1) + 1:2]
            for kh in range(3) for kw in range(3)]
    patches = jnp.concatenate(taps, axis=1).reshape(n, 9 * c, ho * wo)
    return patches.astype(jnp.bfloat16), ho, wo


def center_crop(y_nchw, th, tw):
    # TODO(synk): torchvision CenterCrop also zero-pads when target > tensor;
    # only the crop path is needed here (identity for the /8 -> x8 pipeline).
    _, _, h, w = y_nchw.shape
    if h == th and w == tw:
        return y_nchw
    top = int(round((h - th) / 2.0))
    left = int(round((w - tw) / 2.0))
    return y_nchw[:, :, top:top + th, left:left + tw]


# ----------------------------------------------------------------------------
# model
# ----------------------------------------------------------------------------
def mobilenet_v2_seg(x_nchw, params):
    n, _, in_h, in_w = x_nchw.shape
    x = x_nchw.astype(jnp.float32)

    # host-side prep: stem patches + per-block shift matrices + upsample matrix
    patches, h0, w0 = _stem_patches(x)
    s1m, _, _ = _shift_matrices(h0, w0, 1)
    s2m, h2, w2 = _shift_matrices(h0, w0, 2)
    s3m, h3, w3 = _shift_matrices(h2, w2, 2)
    u_mat, hup, wup = _upsample_matrix(h3, w3, 8)

    b1, b2, b3 = params["block1"], params["block2"], params["block3"]
    nk, hd = params["neck"], params["head"]
    out_ch = hd[0].shape[0]

    args = (patches,
            *params["stem"],
            *b1["expand"], s1m, *b1["dw"], *b1["project"],
            *b2["expand"], s2m, *b2["dw"], *b2["project"],
            *b3["expand"], s3m, *b3["dw"], *b3["project"],
            nk["branch"], nk["b_branch1"], nk["b_pool"],
            nk["wf1"], nk["wf2"], nk["b_fusion"],
            *hd, u_mat)

    out_shape = (n, out_ch, hup * wup)
    in_specs = [_act_spec(patches.shape)] + [_rep_spec(a.shape) for a in args[1:]]

    y = pl.pallas_call(
        _forward_kernel,
        out_shape=jax.ShapeDtypeStruct(out_shape, jnp.float32),
        grid=(n,),
        in_specs=in_specs,
        out_specs=_act_spec(out_shape),
        compiler_params=_COMPILER_PARAMS,
    )(*args)

    y = y.reshape(n, out_ch, hup, wup)
    return center_crop(y, in_h, in_w)


# ----------------------------------------------------------------------------
# deterministic parameter init (eval-mode BN scale folded INTO the weights)
# ----------------------------------------------------------------------------
def _fold_bn(key, cout):
    kg, kb, km, kv = jax.random.split(key, 4)
    gamma = 1.0 + 0.1 * jax.random.normal(kg, (cout,), jnp.float32)
    beta = 0.1 * jax.random.normal(kb, (cout,), jnp.float32)
    mean = 0.1 * jax.random.normal(km, (cout,), jnp.float32)
    var = 0.5 + jnp.abs(jax.random.normal(kv, (cout,), jnp.float32))
    scale = gamma / jnp.sqrt(var + 1e-5)
    bias = beta - mean * scale
    return scale.reshape(cout, 1), bias.reshape(cout, 1)


def _conv1x1_bn(key, cin, cout):
    kw_, kbn = jax.random.split(key)
    w = 0.1 * jax.random.normal(kw_, (cout, cin), jnp.float32)
    s, b = _fold_bn(kbn, cout)
    return ((w * s).astype(jnp.bfloat16), b)          # scale folded into w


def _dwconv_bn(key, c):
    kw_, kbn = jax.random.split(key)
    w = 0.1 * jax.random.normal(kw_, (9, c, 1), jnp.float32)   # (tap, C, 1)
    s, b = _fold_bn(kbn, c)
    return (w * s.reshape(1, c, 1), b)                 # f32 (used on the VPU)


def _stem_bn(key, cin, cout):
    # stem 3x3 weight stored as (cout, 9*cin), (kh, kw) outer / channel inner.
    kw_, kbn = jax.random.split(key)
    w = 0.1 * jax.random.normal(kw_, (cout, 9 * cin), jnp.float32)
    s, b = _fold_bn(kbn, cout)
    return ((w * s).astype(jnp.bfloat16), b)


def init_params(key):
    ks = jax.random.split(key, 16)
    p = {}
    p["stem"] = _stem_bn(ks[0], 3, 8)
    p["block1"] = {"expand": _conv1x1_bn(ks[1], 8, 16),
                   "dw": _dwconv_bn(ks[2], 16),
                   "project": _conv1x1_bn(ks[3], 16, 8)}
    p["block2"] = {"expand": _conv1x1_bn(ks[4], 8, 16),
                   "dw": _dwconv_bn(ks[5], 16),
                   "project": _conv1x1_bn(ks[6], 16, 16)}
    p["block3"] = {"expand": _conv1x1_bn(ks[7], 16, 32),
                   "dw": _dwconv_bn(ks[8], 32),
                   "project": _conv1x1_bn(ks[9], 32, 32)}

    feature_dim, reduction_ratio, output_size = 32, 8, 1
    hidden = feature_dim // reduction_ratio                        # 4
    # ASPP (no 3x3 branches): 1x1 branch + image-pooling branch + 1x1 fusion.
    w1, bb1 = _conv1x1_bn(ks[10], feature_dim, hidden)
    wpo, bpo = _conv1x1_bn(ks[11], feature_dim, hidden)
    wn = jnp.concatenate([w1, wpo], axis=0)                        # (2h, feat)
    kf1, kf2 = jax.random.split(ks[12])
    wf1 = 0.1 * jax.random.normal(kf1, (hidden, hidden), jnp.float32)
    wf2 = 0.1 * jax.random.normal(kf2, (hidden, hidden), jnp.float32)
    sf, bfu = _fold_bn(ks[15], hidden)
    p["neck"] = {"branch": wn, "b_branch1": bb1, "b_pool": bpo,
                 "wf1": (wf1 * sf).astype(jnp.bfloat16),
                 "wf2": (wf2 * sf).astype(jnp.bfloat16),
                 "b_fusion": bfu}

    # 1x1 head: plain conv with bias, kept in f32 (precision of final logits).
    head_w = 0.1 * jax.random.normal(ks[13], (output_size, hidden), jnp.float32)
    head_b = 0.1 * jax.random.normal(ks[14], (output_size, 1), jnp.float32)
    p["head"] = (head_w, head_b)
    return p


if __name__ == "__main__":
    key = jax.random.PRNGKey(0)
    kx, kp = jax.random.split(key)
    x = jax.random.normal(kx, (2, 3, 32, 32), jnp.float32)
    params = init_params(kp)
    out = jax.jit(mobilenet_v2_seg)(x, params)
    out = jax.block_until_ready(out)
    assert out.shape == (2, 1, 32, 32), out.shape
    assert out.dtype == jnp.float32
    print("KERNEL_OK")
</pallas_src>

<mosaic_0001>
module attributes {stable_mosaic.version = 11 : i64} {
  func.func @_forward_kernel(%arg0: i32, %arg1: memref<1x27x256xbf16, #tpu.memory_space<vmem>>, %arg2: memref<8x27xbf16, #tpu.memory_space<vmem>>, %arg3: memref<8x1xf32, #tpu.memory_space<vmem>>, %arg4: memref<16x8xbf16, #tpu.memory_space<vmem>>, %arg5: memref<16x1xf32, #tpu.memory_space<vmem>>, %arg6: memref<256x2304xbf16, #tpu.memory_space<vmem>>, %arg7: memref<9x16x1xf32, #tpu.memory_space<vmem>>, %arg8: memref<16x1xf32, #tpu.memory_space<vmem>>, %arg9: memref<8x16xbf16, #tpu.memory_space<vmem>>, %arg10: memref<8x1xf32, #tpu.memory_space<vmem>>, %arg11: memref<16x8xbf16, #tpu.memory_space<vmem>>, %arg12: memref<16x1xf32, #tpu.memory_space<vmem>>, %arg13: memref<256x576xbf16, #tpu.memory_space<vmem>>, %arg14: memref<9x16x1xf32, #tpu.memory_space<vmem>>, %arg15: memref<16x1xf32, #tpu.memory_space<vmem>>, %arg16: memref<16x16xbf16, #tpu.memory_space<vmem>>, %arg17: memref<16x1xf32, #tpu.memory_space<vmem>>, %arg18: memref<32x16xbf16, #tpu.memory_space<vmem>>, %arg19: memref<32x1xf32, #tpu.memory_space<vmem>>, %arg20: memref<64x144xbf16, #tpu.memory_space<vmem>>, %arg21: memref<9x32x1xf32, #tpu.memory_space<vmem>>, %arg22: memref<32x1xf32, #tpu.memory_space<vmem>>, %arg23: memref<32x32xbf16, #tpu.memory_space<vmem>>, %arg24: memref<32x1xf32, #tpu.memory_space<vmem>>, %arg25: memref<8x32xbf16, #tpu.memory_space<vmem>>, %arg26: memref<4x1xf32, #tpu.memory_space<vmem>>, %arg27: memref<4x1xf32, #tpu.memory_space<vmem>>, %arg28: memref<4x4xbf16, #tpu.memory_space<vmem>>, %arg29: memref<4x4xbf16, #tpu.memory_space<vmem>>, %arg30: memref<4x1xf32, #tpu.memory_space<vmem>>, %arg31: memref<1x4xf32, #tpu.memory_space<vmem>>, %arg32: memref<1x1xf32, #tpu.memory_space<vmem>>, %arg33: memref<16x1024xf32, #tpu.memory_space<vmem>>, %arg34: memref<1x1x1024xf32, #tpu.memory_space<vmem>>) attributes {dimension_semantics = [#tpu.dimension_semantics<parallel>], iteration_bounds = array<i64: 2>, scalar_prefetch = 0 : i64, scratch_operands = 0 : i64, tpu.core_type = #tpu.core_type<tc>, window_params = [{transform_indices = @transform_0, window_bounds = array<i64: 1, 27, 256>}, {pipeline_mode = #tpu.pipeline_mode<synchronous>, transform_indices = @transform_1, window_bounds = array<i64: 8, 27>}, {pipeline_mode = #tpu.pipeline_mode<synchronous>, transform_indices = @transform_2, window_bounds = array<i64: 8, 1>}, {pipeline_mode = #tpu.pipeline_mode<synchronous>, transform_indices = @transform_3, window_bounds = array<i64: 16, 8>}, {pipeline_mode = #tpu.pipeline_mode<synchronous>, transform_indices = @transform_4, window_bounds = array<i64: 16, 1>}, {pipeline_mode = #tpu.pipeline_mode<synchronous>, transform_indices = @transform_5, window_bounds = array<i64: 256, 2304>}, {pipeline_mode = #tpu.pipeline_mode<synchronous>, transform_indices = @transform_6, window_bounds = array<i64: 9, 16, 1>}, {pipeline_mode = #tpu.pipeline_mode<synchronous>, transform_indices = @transform_7, window_bounds = array<i64: 16, 1>}, {pipeline_mode = #tpu.pipeline_mode<synchronous>, transform_indices = @transform_8, window_bounds = array<i64: 8, 16>}, {pipeline_mode = #tpu.pipeline_mode<synchronous>, transform_indices = @transform_9, window_bounds = array<i64: 8, 1>}, {pipeline_mode = #tpu.pipeline_mode<synchronous>, transform_indices = @transform_10, window_bounds = array<i64: 16, 8>}, {pipeline_mode = #tpu.pipeline_mode<synchronous>, transform_indices = @transform_11, window_bounds = array<i64: 16, 1>}, {pipeline_mode = #tpu.pipeline_mode<synchronous>, transform_indices = @transform_12, window_bounds = array<i64: 256, 576>}, {pipeline_mode = #tpu.pipeline_mode<synchronous>, transform_indices = @transform_13, window_bounds = array<i64: 9, 16, 1>}, {pipeline_mode = #tpu.pipeline_mode<synchronous>, transform_indices = @transform_14, window_bounds = array<i64: 16, 1>}, {pipeline_mode = #tpu.pipeline_mode<synchronous>, transform_indices = @transform_15, window_bounds = array<i64: 16, 16>}, {pipeline_mode = #tpu.pipeline_mode<synchronous>, transform_indices = @transform_16, window_bounds = array<i64: 16, 1>}, {pipeline_mode = #tpu.pipeline_mode<synchronous>, transform_indices = @transform_17, window_bounds = array<i64: 32, 16>}, {pipeline_mode = #tpu.pipeline_mode<synchronous>, transform_indices = @transform_18, window_bounds = array<i64: 32, 1>}, {pipeline_mode = #tpu.pipeline_mode<synchronous>, transform_indices = @transform_19, window_bounds = array<i64: 64, 144>}, {pipeline_mode = #tpu.pipeline_mode<synchronous>, transform_indices = @transform_20, window_bounds = array<i64: 9, 32, 1>}, {pipeline_mode = #tpu.pipeline_mode<synchronous>, transform_indices = @transform_21, window_bounds = array<i64: 32, 1>}, {pipeline_mode = #tpu.pipeline_mode<synchronous>, transform_indices = @transform_22, window_bounds = array<i64: 32, 32>}, {pipeline_mode = #tpu.pipeline_mode<synchronous>, transform_indices = @transform_23, window_bounds = array<i64: 32, 1>}, {pipeline_mode = #tpu.pipeline_mode<synchronous>, transform_indices = @transform_24, window_bounds = array<i64: 8, 32>}, {pipeline_mode = #tpu.pipeline_mode<synchronous>, transform_indices = @transform_25, window_bounds = array<i64: 4, 1>}, {pipeline_mode = #tpu.pipeline_mode<synchronous>, transform_indices = @transform_26, window_bounds = array<i64: 4, 1>}, {pipeline_mode = #tpu.pipeline_mode<synchronous>, transform_indices = @transform_27, window_bounds = array<i64: 4, 4>}, {pipeline_mode = #tpu.pipeline_mode<synchronous>, transform_indices = @transform_28, window_bounds = array<i64: 4, 4>}, {pipeline_mode = #tpu.pipeline_mode<synchronous>, transform_indices = @transform_29, window_bounds = array<i64: 4, 1>}, {pipeline_mode = #tpu.pipeline_mode<synchronous>, transform_indices = @transform_30, window_bounds = array<i64: 1, 4>}, {pipeline_mode = #tpu.pipeline_mode<synchronous>, transform_indices = @transform_31, window_bounds = array<i64: 1, 1>}, {pipeline_mode = #tpu.pipeline_mode<synchronous>, transform_indices = @transform_32, window_bounds = array<i64: 16, 1024>}, {transform_indices = @transform_33, window_bounds = array<i64: 1, 1, 1024>}]} {
    %c0 = arith.constant 0 : index
    %c0_0 = arith.constant 0 : index
    %0 = vector.load %arg2[%c0, %c0_0] : memref<8x27xbf16, #tpu.memory_space<vmem>>, vector<8x27xbf16>
    %c0_1 = arith.constant 0 : index
    %c0_2 = arith.constant 0 : index
    %c0_3 = arith.constant 0 : index
    %1 = vector.load %arg1[%c0_1, %c0_2, %c0_3] : memref<1x27x256xbf16, #tpu.memory_space<vmem>>, vector<1x27x256xbf16>
    %2 = vector.shape_cast %1 : vector<1x27x256xbf16> to vector<27x256xbf16>
    %cst = arith.constant dense<0.000000e+00> : vector<8x256xf32>
    %3 = tpu.matmul %0, %2, %cst {dimension_numbers = #tpu.dot_dimension_numbers<[1], [0], [0], [1], [0, 0, 1, 1], [], []>} : vector<8x27xbf16>, vector<27x256xbf16>, vector<8x256xf32> -> vector<8x256xf32>
    %c0_4 = arith.constant 0 : index
    %c0_5 = arith.constant 0 : index
    %4 = vector.load %arg3[%c0_4, %c0_5] : memref<8x1xf32, #tpu.memory_space<vmem>>, vector<8x1xf32>
    %5 = vector.broadcast %4 : vector<8x1xf32> to vector<8x256xf32>
    %6 = arith.addf %3, %5 : vector<8x256xf32>
    %cst_6 = arith.constant 0.000000e+00 : f32
    %7 = vector.broadcast %cst_6 : f32 to vector<8x256xf32>
    %8 = arith.maximumf %6, %7 : vector<8x256xf32>
    %cst_7 = arith.constant 6.000000e+00 : f32
    %9 = vector.broadcast %cst_7 : f32 to vector<8x256xf32>
    %10 = arith.minimumf %8, %9 : vector<8x256xf32>
    %c0_8 = arith.constant 0 : index
    %c0_9 = arith.constant 0 : index
    %11 = vector.load %arg4[%c0_8, %c0_9] : memref<16x8xbf16, #tpu.memory_space<vmem>>, vector<16x8xbf16>
    %12 = arith.truncf %10 : vector<8x256xf32> to vector<8x256xbf16>
    %cst_10 = arith.constant dense<0.000000e+00> : vector<16x256xf32>
    %13 = tpu.matmul %11, %12, %cst_10 {dimension_numbers = #tpu.dot_dimension_numbers<[1], [0], [0], [1], [0, 0, 1, 1], [], []>} : vector<16x8xbf16>, vector<8x256xbf16>, vector<16x256xf32> -> vector<16x256xf32>
    %c0_11 = arith.constant 0 : index
    %c0_12 = arith.constant 0 : index
    %14 = vector.load %arg5[%c0_11, %c0_12] : memref<16x1xf32, #tpu.memory_space<vmem>>, vector<16x1xf32>
    %15 = vector.broadcast %14 : vector<16x1xf32> to vector<16x256xf32>
    %16 = arith.addf %13, %15 : vector<16x256xf32>
    %cst_13 = arith.constant 0.000000e+00 : f32
    %17 = vector.broadcast %cst_13 : f32 to vector<16x256xf32>
    %18 = arith.maximumf %16, %17 : vector<16x256xf32>
    %cst_14 = arith.constant 6.000000e+00 : f32
    %19 = vector.broadcast %cst_14 : f32 to vector<16x256xf32>
    %20 = arith.minimumf %18, %19 : vector<16x256xf32>
    %21 = arith.truncf %20 : vector<16x256xf32> to vector<16x256xbf16>
    %c0_15 = arith.constant 0 : index
    %c0_16 = arith.constant 0 : index
    %22 = vector.load %arg6[%c0_15, %c0_16] : memref<256x2304xbf16, #tpu.memory_space<vmem>>, vector<256x2304xbf16>
    %cst_17 = arith.constant dense<0.000000e+00> : vector<16x2304xf32>
    %23 = tpu.matmul %21, %22, %cst_17 {dimension_numbers = #tpu.dot_dimension_numbers<[1], [0], [0], [1], [0, 0, 1, 1], [], []>} : vector<16x256xbf16>, vector<256x2304xbf16>, vector<16x2304xf32> -> vector<16x2304xf32>
    %24 = vector.extract_strided_slice %23 {offsets = [0, 0], sizes = [16, 256], strides = [1, 1]} : vector<16x2304xf32> to vector<16x256xf32>
    %c0_18 = arith.constant 0 : index
    %c0_19 = arith.constant 0 : index
    %c0_20 = arith.constant 0 : index
    %25 = vector.load %arg7[%c0_18, %c0_19, %c0_20] : memref<9x16x1xf32, #tpu.memory_space<vmem>>, vector<1x16x1xf32>
    %26 = vector.shape_cast %25 : vector<1x16x1xf32> to vector<16x1xf32>
    %27 = vector.broadcast %26 : vector<16x1xf32> to vector<16x256xf32>
    %28 = arith.mulf %24, %27 : vector<16x256xf32>
    %29 = vector.extract_strided_slice %23 {offsets = [0, 256], sizes = [16, 256], strides = [1, 1]} : vector<16x2304xf32> to vector<16x256xf32>
    %c1 = arith.constant 1 : index
    %c0_21 = arith.constant 0 : index
    %c0_22 = arith.constant 0 : index
    %30 = vector.load %arg7[%c1, %c0_21, %c0_22] : memref<9x16x1xf32, #tpu.memory_space<vmem>>, vector<1x16x1xf32>
    %31 = vector.shape_cast %30 : vector<1x16x1xf32> to vector<16x1xf32>
    %32 = vector.broadcast %31 : vector<16x1xf32> to vector<16x256xf32>
    %33 = arith.mulf %29, %32 : vector<16x256xf32>
    %34 = arith.addf %28, %33 : vector<16x256xf32>
    %35 = vector.extract_strided_slice %23 {offsets = [0, 512], sizes = [16, 256], strides = [1, 1]} : vector<16x2304xf32> to vector<16x256xf32>
    %c2 = arith.constant 2 : index
    %c0_23 = arith.constant 0 : index
    %c0_24 = arith.constant 0 : index
    %36 = vector.load %arg7[%c2, %c0_23, %c0_24] : memref<9x16x1xf32, #tpu.memory_space<vmem>>, vector<1x16x1xf32>
    %37 = vector.shape_cast %36 : vector<1x16x1xf32> to vector<16x1xf32>
    %38 = vector.broadcast %37 : vector<16x1xf32> to vector<16x256xf32>
    %39 = arith.mulf %35, %38 : vector<16x256xf32>
    %40 = arith.addf %34, %39 : vector<16x256xf32>
    %41 = vector.extract_strided_slice %23 {offsets = [0, 768], sizes = [16, 256], strides = [1, 1]} : vector<16x2304xf32> to vector<16x256xf32>
    %c3 = arith.constant 3 : index
    %c0_25 = arith.constant 0 : index
    %c0_26 = arith.constant 0 : index
    %42 = vector.load %arg7[%c3, %c0_25, %c0_26] : memref<9x16x1xf32, #tpu.memory_space<vmem>>, vector<1x16x1xf32>
    %43 = vector.shape_cast %42 : vector<1x16x1xf32> to vector<16x1xf32>
    %44 = vector.broadcast %43 : vector<16x1xf32> to vector<16x256xf32>
    %45 = arith.mulf %41, %44 : vector<16x256xf32>
    %46 = arith.addf %40, %45 : vector<16x256xf32>
    %47 = vector.extract_strided_slice %23 {offsets = [0, 1024], sizes = [16, 256], strides = [1, 1]} : vector<16x2304xf32> to vector<16x256xf32>
    %c4 = arith.constant 4 : index
    %c0_27 = arith.constant 0 : index
    %c0_28 = arith.constant 0 : index
    %48 = vector.load %arg7[%c4, %c0_27, %c0_28] : memref<9x16x1xf32, #tpu.memory_space<vmem>>, vector<1x16x1xf32>
    %49 = vector.shape_cast %48 : vector<1x16x1xf32> to vector<16x1xf32>
    %50 = vector.broadcast %49 : vector<16x1xf32> to vector<16x256xf32>
    %51 = arith.mulf %47, %50 : vector<16x256xf32>
    %52 = arith.addf %46, %51 : vector<16x256xf32>
    %53 = vector.extract_strided_slice %23 {offsets = [0, 1280], sizes = [16, 256], strides = [1, 1]} : vector<16x2304xf32> to vector<16x256xf32>
    %c5 = arith.constant 5 : index
    %c0_29 = arith.constant 0 : index
    %c0_30 = arith.constant 0 : index
    %54 = vector.load %arg7[%c5, %c0_29, %c0_30] : memref<9x16x1xf32, #tpu.memory_space<vmem>>, vector<1x16x1xf32>
    %55 = vector.shape_cast %54 : vector<1x16x1xf32> to vector<16x1xf32>
    %56 = vector.broadcast %55 : vector<16x1xf32> to vector<16x256xf32>
    %57 = arith.mulf %53, %56 : vector<16x256xf32>
    %58 = arith.addf %52, %57 : vector<16x256xf32>
    %59 = vector.extract_strided_slice %23 {offsets = [0, 1536], sizes = [16, 256], strides = [1, 1]} : vector<16x2304xf32> to vector<16x256xf32>
    %c6 = arith.constant 6 : index
    %c0_31 = arith.constant 0 : index
    %c0_32 = arith.constant 0 : index
    %60 = vector.load %arg7[%c6, %c0_31, %c0_32] : memref<9x16x1xf32, #tpu.memory_space<vmem>>, vector<1x16x1xf32>
    %61 = vector.shape_cast %60 : vector<1x16x1xf32> to vector<16x1xf32>
    %62 = vector.broadcast %61 : vector<16x1xf32> to vector<16x256xf32>
    %63 = arith.mulf %59, %62 : vector<16x256xf32>
    %64 = arith.addf %58, %63 : vector<16x256xf32>
    %65 = vector.extract_strided_slice %23 {offsets = [0, 1792], sizes = [16, 256], strides = [1, 1]} : vector<16x2304xf32> to vector<16x256xf32>
    %c7 = arith.constant 7 : index
    %c0_33 = arith.constant 0 : index
    %c0_34 = arith.constant 0 : index
    %66 = vector.load %arg7[%c7, %c0_33, %c0_34] : memref<9x16x1xf32, #tpu.memory_space<vmem>>, vector<1x16x1xf32>
    %67 = vector.shape_cast %66 : vector<1x16x1xf32> to vector<16x1xf32>
    %68 = vector.broadcast %67 : vector<16x1xf32> to vector<16x256xf32>
    %69 = arith.mulf %65, %68 : vector<16x256xf32>
    %70 = arith.addf %64, %69 : vector<16x256xf32>
    %71 = vector.extract_strided_slice %23 {offsets = [0, 2048], sizes = [16, 256], strides = [1, 1]} : vector<16x2304xf32> to vector<16x256xf32>
    %c8 = arith.constant 8 : index
    %c0_35 = arith.constant 0 : index
    %c0_36 = arith.constant 0 : index
    %72 = vector.load %arg7[%c8, %c0_35, %c0_36] : memref<9x16x1xf32, #tpu.memory_space<vmem>>, vector<1x16x1xf32>
    %73 = vector.shape_cast %72 : vector<1x16x1xf32> to vector<16x1xf32>
    %74 = vector.broadcast %73 : vector<16x1xf32> to vector<16x256xf32>
    %75 = arith.mulf %71, %74 : vector<16x256xf32>
    %76 = arith.addf %70, %75 : vector<16x256xf32>
    %c0_37 = arith.constant 0 : index
    %c0_38 = arith.constant 0 : index
    %77 = vector.load %arg8[%c0_37, %c0_38] : memref<16x1xf32, #tpu.memory_space<vmem>>, vector<16x1xf32>
    %78 = vector.broadcast %77 : vector<16x1xf32> to vector<16x256xf32>
    %79 = arith.addf %76, %78 : vector<16x256xf32>
    %cst_39 = arith.constant 0.000000e+00 : f32
    %80 = vector.broadcast %cst_39 : f32 to vector<16x256xf32>
    %81 = arith.maximumf %79, %80 : vector<16x256xf32>
    %cst_40 = arith.constant 6.000000e+00 : f32
    %82 = vector.broadcast %cst_40 : f32 to vector<16x256xf32>
    %83 = arith.minimumf %81, %82 : vector<16x256xf32>
    %c0_41 = arith.constant 0 : index
    %c0_42 = arith.constant 0 : index
    %84 = vector.load %arg9[%c0_41, %c0_42] : memref<8x16xbf16, #tpu.memory_space<vmem>>, vector<8x16xbf16>
    %85 = arith.truncf %83 : vector<16x256xf32> to vector<16x256xbf16>
    %cst_43 = arith.constant dense<0.000000e+00> : vector<8x256xf32>
    %86 = tpu.matmul %84, %85, %cst_43 {dimension_numbers = #tpu.dot_dimension_numbers<[1], [0], [0], [1], [0, 0, 1, 1], [], []>} : vector<8x16xbf16>, vector<16x256xbf16>, vector<8x256xf32> -> vector<8x256xf32>
    %c0_44 = arith.constant 0 : index
    %c0_45 = arith.constant 0 : index
    %87 = vector.load %arg10[%c0_44, %c0_45] : memref<8x1xf32, #tpu.memory_space<vmem>>, vector<8x1xf32>
    %88 = vector.broadcast %87 : vector<8x1xf32> to vector<8x256xf32>
    %89 = arith.addf %86, %88 : vector<8x256xf32>
    %90 = arith.addf %89, %10 : vector<8x256xf32>
    %c0_46 = arith.constant 0 : index
    %c0_47 = arith.constant 0 : index
    %91 = vector.load %arg11[%c0_46, %c0_47] : memref<16x8xbf16, #tpu.memory_space<vmem>>, vector<16x8xbf16>
    %92 = arith.truncf %90 : vector<8x256xf32> to vector<8x256xbf16>
    %cst_48 = arith.constant dense<0.000000e+00> : vector<16x256xf32>
    %93 = tpu.matmul %91, %92, %cst_48 {dimension_numbers = #tpu.dot_dimension_numbers<[1], [0], [0], [1], [0, 0, 1, 1], [], []>} : vector<16x8xbf16>, vector<8x256xbf16>, vector<16x256xf32> -> vector<16x256xf32>
    %c0_49 = arith.constant 0 : index
    %c0_50 = arith.constant 0 : index
    %94 = vector.load %arg12[%c0_49, %c0_50] : memref<16x1xf32, #tpu.memory_space<vmem>>, vector<16x1xf32>
    %95 = vector.broadcast %94 : vector<16x1xf32> to vector<16x256xf32>
    %96 = arith.addf %93, %95 : vector<16x256xf32>
    %cst_51 = arith.constant 0.000000e+00 : f32
    %97 = vector.broadcast %cst_51 : f32 to vector<16x256xf32>
    %98 = arith.maximumf %96, %97 : vector<16x256xf32>
    %cst_52 = arith.constant 6.000000e+00 : f32
    %99 = vector.broadcast %cst_52 : f32 to vector<16x256xf32>
    %100 = arith.minimumf %98, %99 : vector<16x256xf32>
    %101 = arith.truncf %100 : vector<16x256xf32> to vector<16x256xbf16>
    %c0_53 = arith.constant 0 : index
    %c0_54 = arith.constant 0 : index
    %102 = vector.load %arg13[%c0_53, %c0_54] : memref<256x576xbf16, #tpu.memory_space<vmem>>, vector<256x576xbf16>
    %cst_55 = arith.constant dense<0.000000e+00> : vector<16x576xf32>
    %103 = tpu.matmul %101, %102, %cst_55 {dimension_numbers = #tpu.dot_dimension_numbers<[1], [0], [0], [1], [0, 0, 1, 1], [], []>} : vector<16x256xbf16>, vector<256x576xbf16>, vector<16x576xf32> -> vector<16x576xf32>
    %104 = vector.extract_strided_slice %103 {offsets = [0, 0], sizes = [16, 64], strides = [1, 1]} : vector<16x576xf32> to vector<16x64xf32>
    %c0_56 = arith.constant 0 : index
    %c0_57 = arith.constant 0 : index
    %c0_58 = arith.constant 0 : index
    %105 = vector.load %arg14[%c0_56, %c0_57, %c0_58] : memref<9x16x1xf32, #tpu.memory_space<vmem>>, vector<1x16x1xf32>
    %106 = vector.shape_cast %105 : vector<1x16x1xf32> to vector<16x1xf32>
    %107 = vector.broadcast %106 : vector<16x1xf32> to vector<16x64xf32>
    %108 = arith.mulf %104, %107 : vector<16x64xf32>
    %109 = vector.extract_strided_slice %103 {offsets = [0, 64], sizes = [16, 64], strides = [1, 1]} : vector<16x576xf32> to vector<16x64xf32>
    %c1_59 = arith.constant 1 : index
    %c0_60 = arith.constant 0 : index
    %c0_61 = arith.constant 0 : index
    %110 = vector.load %arg14[%c1_59, %c0_60, %c0_61] : memref<9x16x1xf32, #tpu.memory_space<vmem>>, vector<1x16x1xf32>
    %111 = vector.shape_cast %110 : vector<1x16x1xf32> to vector<16x1xf32>
    %112 = vector.broadcast %111 : vector<16x1xf32> to vector<16x64xf32>
    %113 = arith.mulf %109, %112 : vector<16x64xf32>
    %114 = arith.addf %108, %113 : vector<16x64xf32>
    %115 = vector.extract_strided_slice %103 {offsets = [0, 128], sizes = [16, 64], strides = [1, 1]} : vector<16x576xf32> to vector<16x64xf32>
    %c2_62 = arith.constant 2 : index
    %c0_63 = arith.constant 0 : index
    %c0_64 = arith.constant 0 : index
    %116 = vector.load %arg14[%c2_62, %c0_63, %c0_64] : memref<9x16x1xf32, #tpu.memory_space<vmem>>, vector<1x16x1xf32>
    %117 = vector.shape_cast %116 : vector<1x16x1xf32> to vector<16x1xf32>
    %118 = vector.broadcast %117 : vector<16x1xf32> to vector<16x64xf32>
    %119 = arith.mulf %115, %118 : vector<16x64xf32>
    %120 = arith.addf %114, %119 : vector<16x64xf32>
    %121 = vector.extract_strided_slice %103 {offsets = [0, 192], sizes = [16, 64], strides = [1, 1]} : vector<16x576xf32> to vector<16x64xf32>
    %c3_65 = arith.constant 3 : index
    %c0_66 = arith.constant 0 : index
    %c0_67 = arith.constant 0 : index
    %122 = vector.load %arg14[%c3_65, %c0_66, %c0_67] : memref<9x16x1xf32, #tpu.memory_space<vmem>>, vector<1x16x1xf32>
    %123 = vector.shape_cast %122 : vector<1x16x1xf32> to vector<16x1xf32>
    %124 = vector.broadcast %123 : vector<16x1xf32> to vector<16x64xf32>
    %125 = arith.mulf %121, %124 : vector<16x64xf32>
    %126 = arith.addf %120, %125 : vector<16x64xf32>
    %127 = vector.extract_strided_slice %103 {offsets = [0, 256], sizes = [16, 64], strides = [1, 1]} : vector<16x576xf32> to vector<16x64xf32>
    %c4_68 = arith.constant 4 : index
    %c0_69 = arith.constant 0 : index
    %c0_70 = arith.constant 0 : index
    %128 = vector.load %arg14[%c4_68, %c0_69, %c0_70] : memref<9x16x1xf32, #tpu.memory_space<vmem>>, vector<1x16x1xf32>
    %129 = vector.shape_cast %128 : vector<1x16x1xf32> to vector<16x1xf32>
    %130 = vector.broadcast %129 : vector<16x1xf32> to vector<16x64xf32>
    %131 = arith.mulf %127, %130 : vector<16x64xf32>
    %132 = arith.addf %126, %131 : vector<16x64xf32>
    %133 = vector.extract_strided_slice %103 {offsets = [0, 320], sizes = [16, 64], strides = [1, 1]} : vector<16x576xf32> to vector<16x64xf32>
    %c5_71 = arith.constant 5 : index
    %c0_72 = arith.constant 0 : index
    %c0_73 = arith.constant 0 : index
    %134 = vector.load %arg14[%c5_71, %c0_72, %c0_73] : memref<9x16x1xf32, #tpu.memory_space<vmem>>, vector<1x16x1xf32>
    %135 = vector.shape_cast %134 : vector<1x16x1xf32> to vector<16x1xf32>
    %136 = vector.broadcast %135 : vector<16x1xf32> to vector<16x64xf32>
    %137 = arith.mulf %133, %136 : vector<16x64xf32>
    %138 = arith.addf %132, %137 : vector<16x64xf32>
    %139 = vector.extract_strided_slice %103 {offsets = [0, 384], sizes = [16, 64], strides = [1, 1]} : vector<16x576xf32> to vector<16x64xf32>
    %c6_74 = arith.constant 6 : index
    %c0_75 = arith.constant 0 : index
    %c0_76 = arith.constant 0 : index
    %140 = vector.load %arg14[%c6_74, %c0_75, %c0_76] : memref<9x16x1xf32, #tpu.memory_space<vmem>>, vector<1x16x1xf32>
    %141 = vector.shape_cast %140 : vector<1x16x1xf32> to vector<16x1xf32>
    %142 = vector.broadcast %141 : vector<16x1xf32> to vector<16x64xf32>
    %143 = arith.mulf %139, %142 : vector<16x64xf32>
    %144 = arith.addf %138, %143 : vector<16x64xf32>
    %145 = vector.extract_strided_slice %103 {offsets = [0, 448], sizes = [16, 64], strides = [1, 1]} : vector<16x576xf32> to vector<16x64xf32>
    %c7_77 = arith.constant 7 : index
    %c0_78 = arith.constant 0 : index
    %c0_79 = arith.constant 0 : index
    %146 = vector.load %arg14[%c7_77, %c0_78, %c0_79] : memref<9x16x1xf32, #tpu.memory_space<vmem>>, vector<1x16x1xf32>
    %147 = vector.shape_cast %146 : vector<1x16x1xf32> to vector<16x1xf32>
    %148 = vector.broadcast %147 : vector<16x1xf32> to vector<16x64xf32>
    %149 = arith.mulf %145, %148 : vector<16x64xf32>
    %150 = arith.addf %144, %149 : vector<16x64xf32>
    %151 = vector.extract_strided_slice %103 {offsets = [0, 512], sizes = [16, 64], strides = [1, 1]} : vector<16x576xf32> to vector<16x64xf32>
    %c8_80 = arith.constant 8 : index
    %c0_81 = arith.constant 0 : index
    %c0_82 = arith.constant 0 : index
    %152 = vector.load %arg14[%c8_80, %c0_81, %c0_82] : memref<9x16x1xf32, #tpu.memory_space<vmem>>, vector<1x16x1xf32>
    %153 = vector.shape_cast %152 : vector<1x16x1xf32> to vector<16x1xf32>
    %154 = vector.broadcast %153 : vector<16x1xf32> to vector<16x64xf32>
    %155 = arith.mulf %151, %154 : vector<16x64xf32>
    %156 = arith.addf %150, %155 : vector<16x64xf32>
    %c0_83 = arith.constant 0 : index
    %c0_84 = arith.constant 0 : index
    %157 = vector.load %arg15[%c0_83, %c0_84] : memref<16x1xf32, #tpu.memory_space<vmem>>, vector<16x1xf32>
    %158 = vector.broadcast %157 : vector<16x1xf32> to vector<16x64xf32>
    %159 = arith.addf %156, %158 : vector<16x64xf32>
    %cst_85 = arith.constant 0.000000e+00 : f32
    %160 = vector.broadcast %cst_85 : f32 to vector<16x64xf32>
    %161 = arith.maximumf %159, %160 : vector<16x64xf32>
    %cst_86 = arith.constant 6.000000e+00 : f32
    %162 = vector.broadcast %cst_86 : f32 to vector<16x64xf32>
    %163 = arith.minimumf %161, %162 : vector<16x64xf32>
    %c0_87 = arith.constant 0 : index
    %c0_88 = arith.constant 0 : index
    %164 = vector.load %arg16[%c0_87, %c0_88] : memref<16x16xbf16, #tpu.memory_space<vmem>>, vector<16x16xbf16>
    %165 = arith.truncf %163 : vector<16x64xf32> to vector<16x64xbf16>
    %cst_89 = arith.constant dense<0.000000e+00> : vector<16x64xf32>
    %166 = tpu.matmul %164, %165, %cst_89 {dimension_numbers = #tpu.dot_dimension_numbers<[1], [0], [0], [1], [0, 0, 1, 1], [], []>} : vector<16x16xbf16>, vector<16x64xbf16>, vector<16x64xf32> -> vector<16x64xf32>
    %c0_90 = arith.constant 0 : index
    %c0_91 = arith.constant 0 : index
    %167 = vector.load %arg17[%c0_90, %c0_91] : memref<16x1xf32, #tpu.memory_space<vmem>>, vector<16x1xf32>
    %168 = vector.broadcast %167 : vector<16x1xf32> to vector<16x64xf32>
    %169 = arith.addf %166, %168 : vector<16x64xf32>
    %c0_92 = arith.constant 0 : index
    %c0_93 = arith.constant 0 : index
    %170 = vector.load %arg18[%c0_92, %c0_93] : memref<32x16xbf16, #tpu.memory_space<vmem>>, vector<32x16xbf16>
    %171 = arith.truncf %169 : vector<16x64xf32> to vector<16x64xbf16>
    %cst_94 = arith.constant dense<0.000000e+00> : vector<32x64xf32>
    %172 = tpu.matmul %170, %171, %cst_94 {dimension_numbers = #tpu.dot_dimension_numbers<[1], [0], [0], [1], [0, 0, 1, 1], [], []>} : vector<32x16xbf16>, vector<16x64xbf16>, vector<32x64xf32> -> vector<32x64xf32>
    %c0_95 = arith.constant 0 : index
    %c0_96 = arith.constant 0 : index
    %173 = vector.load %arg19[%c0_95, %c0_96] : memref<32x1xf32, #tpu.memory_space<vmem>>, vector<32x1xf32>
    %174 = vector.broadcast %173 : vector<32x1xf32> to vector<32x64xf32>
    %175 = arith.addf %172, %174 : vector<32x64xf32>
    %cst_97 = arith.constant 0.000000e+00 : f32
    %176 = vector.broadcast %cst_97 : f32 to vector<32x64xf32>
    %177 = arith.maximumf %175, %176 : vector<32x64xf32>
    %cst_98 = arith.constant 6.000000e+00 : f32
    %178 = vector.broadcast %cst_98 : f32 to vector<32x64xf32>
    %179 = arith.minimumf %177, %178 : vector<32x64xf32>
    %180 = arith.truncf %179 : vector<32x64xf32> to vector<32x64xbf16>
    %c0_99 = arith.constant 0 : index
    %c0_100 = arith.constant 0 : index
    %181 = vector.load %arg20[%c0_99, %c0_100] : memref<64x144xbf16, #tpu.memory_space<vmem>>, vector<64x144xbf16>
    %cst_101 = arith.constant dense<0.000000e+00> : vector<32x144xf32>
    %182 = tpu.matmul %180, %181, %cst_101 {dimension_numbers = #tpu.dot_dimension_numbers<[1], [0], [0], [1], [0, 0, 1, 1], [], []>} : vector<32x64xbf16>, vector<64x144xbf16>, vector<32x144xf32> -> vector<32x144xf32>
    %183 = vector.extract_strided_slice %182 {offsets = [0, 0], sizes = [32, 16], strides = [1, 1]} : vector<32x144xf32> to vector<32x16xf32>
    %c0_102 = arith.constant 0 : index
    %c0_103 = arith.constant 0 : index
    %c0_104 = arith.constant 0 : index
    %184 = vector.load %arg21[%c0_102, %c0_103, %c0_104] : memref<9x32x1xf32, #tpu.memory_space<vmem>>, vector<1x32x1xf32>
    %185 = vector.shape_cast %184 : vector<1x32x1xf32> to vector<32x1xf32>
    %186 = vector.broadcast %185 : vector<32x1xf32> to vector<32x16xf32>
    %187 = arith.mulf %183, %186 : vector<32x16xf32>
    %188 = vector.extract_strided_slice %182 {offsets = [0, 16], sizes = [32, 16], strides = [1, 1]} : vector<32x144xf32> to vector<32x16xf32>
    %c1_105 = arith.constant 1 : index
    %c0_106 = arith.constant 0 : index
    %c0_107 = arith.constant 0 : index
    %189 = vector.load %arg21[%c1_105, %c0_106, %c0_107] : memref<9x32x1xf32, #tpu.memory_space<vmem>>, vector<1x32x1xf32>
    %190 = vector.shape_cast %189 : vector<1x32x1xf32> to vector<32x1xf32>
    %191 = vector.broadcast %190 : vector<32x1xf32> to vector<32x16xf32>
    %192 = arith.mulf %188, %191 : vector<32x16xf32>
    %193 = arith.addf %187, %192 : vector<32x16xf32>
    %194 = vector.extract_strided_slice %182 {offsets = [0, 32], sizes = [32, 16], strides = [1, 1]} : vector<32x144xf32> to vector<32x16xf32>
    %c2_108 = arith.constant 2 : index
    %c0_109 = arith.constant 0 : index
    %c0_110 = arith.constant 0 : index
    %195 = vector.load %arg21[%c2_108, %c0_109, %c0_110] : memref<9x32x1xf32, #tpu.memory_space<vmem>>, vector<1x32x1xf32>
    %196 = vector.shape_cast %195 : vector<1x32x1xf32> to vector<32x1xf32>
    %197 = vector.broadcast %196 : vector<32x1xf32> to vector<32x16xf32>
    %198 = arith.mulf %194, %197 : vector<32x16xf32>
    %199 = arith.addf %193, %198 : vector<32x16xf32>
    %200 = vector.extract_strided_slice %182 {offsets = [0, 48], sizes = [32, 16], strides = [1, 1]} : vector<32x144xf32> to vector<32x16xf32>
    %c3_111 = arith.constant 3 : index
    %c0_112 = arith.constant 0 : index
    %c0_113 = arith.constant 0 : index
    %201 = vector.load %arg21[%c3_111, %c0_112, %c0_113] : memref<9x32x1xf32, #tpu.memory_space<vmem>>, vector<1x32x1xf32>
    %202 = vector.shape_cast %201 : vector<1x32x1xf32> to vector<32x1xf32>
    %203 = vector.broadcast %202 : vector<32x1xf32> to vector<32x16xf32>
    %204 = arith.mulf %200, %203 : vector<32x16xf32>
    %205 = arith.addf %199, %204 : vector<32x16xf32>
    %206 = vector.extract_strided_slice %182 {offsets = [0, 64], sizes = [32, 16], strides = [1, 1]} : vector<32x144xf32> to vector<32x16xf32>
    %c4_114 = arith.constant 4 : index
    %c0_115 = arith.constant 0 : index
    %c0_116 = arith.constant 0 : index
    %207 = vector.load %arg21[%c4_114, %c0_115, %c0_116] : memref<9x32x1xf32, #tpu.memory_space<vmem>>, vector<1x32x1xf32>
    %208 = vector.shape_cast %207 : vector<1x32x1xf32> to vector<32x1xf32>
    %209 = vector.broadcast %208 : vector<32x1xf32> to vector<32x16xf32>
    %210 = arith.mulf %206, %209 : vector<32x16xf32>
    %211 = arith.addf %205, %210 : vector<32x16xf32>
    %212 = vector.extract_strided_slice %182 {offsets = [0, 80], sizes = [32, 16], strides = [1, 1]} : vector<32x144xf32> to vector<32x16xf32>
    %c5_117 = arith.constant 5 : index
    %c0_118 = arith.constant 0 : index
    %c0_119 = arith.constant 0 : index
    %213 = vector.load %arg21[%c5_117, %c0_118, %c0_119] : memref<9x32x1xf32, #tpu.memory_space<vmem>>, vector<1x32x1xf32>
    %214 = vector.shape_cast %213 : vector<1x32x1xf32> to vector<32x1xf32>
    %215 = vector.broadcast %214 : vector<32x1xf32> to vector<32x16xf32>
    %216 = arith.mulf %212, %215 : vector<32x16xf32>
    %217 = arith.addf %211, %216 : vector<32x16xf32>
    %218 = vector.extract_strided_slice %182 {offsets = [0, 96], sizes = [32, 16], strides = [1, 1]} : vector<32x144xf32> to vector<32x16xf32>
    %c6_120 = arith.constant 6 : index
    %c0_121 = arith.constant 0 : index
    %c0_122 = arith.constant 0 : index
    %219 = vector.load %arg21[%c6_120, %c0_121, %c0_122] : memref<9x32x1xf32, #tpu.memory_space<vmem>>, vector<1x32x1xf32>
    %220 = vector.shape_cast %219 : vector<1x32x1xf32> to vector<32x1xf32>
    %221 = vector.broadcast %220 : vector<32x1xf32> to vector<32x16xf32>
    %222 = arith.mulf %218, %221 : vector<32x16xf32>
    %223 = arith.addf %217, %222 : vector<32x16xf32>
    %224 = vector.extract_strided_slice %182 {offsets = [0, 112], sizes = [32, 16], strides = [1, 1]} : vector<32x144xf32> to vector<32x16xf32>
    %c7_123 = arith.constant 7 : index
    %c0_124 = arith.constant 0 : index
    %c0_125 = arith.constant 0 : index
    %225 = vector.load %arg21[%c7_123, %c0_124, %c0_125] : memref<9x32x1xf32, #tpu.memory_space<vmem>>, vector<1x32x1xf32>
    %226 = vector.shape_cast %225 : vector<1x32x1xf32> to vector<32x1xf32>
    %227 = vector.broadcast %226 : vector<32x1xf32> to vector<32x16xf32>
    %228 = arith.mulf %224, %227 : vector<32x16xf32>
    %229 = arith.addf %223, %228 : vector<32x16xf32>
    %230 = vector.extract_strided_slice %182 {offsets = [0, 128], sizes = [32, 16], strides = [1, 1]} : vector<32x144xf32> to vector<32x16xf32>
    %c8_126 = arith.constant 8 : index
    %c0_127 = arith.constant 0 : index
    %c0_128 = arith.constant 0 : index
    %231 = vector.load %arg21[%c8_126, %c0_127, %c0_128] : memref<9x32x1xf32, #tpu.memory_space<vmem>>, vector<1x32x1xf32>
    %232 = vector.shape_cast %231 : vector<1x32x1xf32> to vector<32x1xf32>
    %233 = vector.broadcast %232 : vector<32x1xf32> to vector<32x16xf32>
    %234 = arith.mulf %230, %233 : vector<32x16xf32>
    %235 = arith.addf %229, %234 : vector<32x16xf32>
    %c0_129 = arith.constant 0 : index
    %c0_130 = arith.constant 0 : index
    %236 = vector.load %arg22[%c0_129, %c0_130] : memref<32x1xf32, #tpu.memory_space<vmem>>, vector<32x1xf32>
    %237 = vector.broadcast %236 : vector<32x1xf32> to vector<32x16xf32>
    %238 = arith.addf %235, %237 : vector<32x16xf32>
    %cst_131 = arith.constant 0.000000e+00 : f32
    %239 = vector.broadcast %cst_131 : f32 to vector<32x16xf32>
    %240 = arith.maximumf %238, %239 : vector<32x16xf32>
    %cst_132 = arith.constant 6.000000e+00 : f32
    %241 = vector.broadcast %cst_132 : f32 to vector<32x16xf32>
    %242 = arith.minimumf %240, %241 : vector<32x16xf32>
    %c0_133 = arith.constant 0 : index
    %c0_134 = arith.constant 0 : index
    %243 = vector.load %arg23[%c0_133, %c0_134] : memref<32x32xbf16, #tpu.memory_space<vmem>>, vector<32x32xbf16>
    %244 = arith.truncf %242 : vector<32x16xf32> to vector<32x16xbf16>
    %cst_135 = arith.constant dense<0.000000e+00> : vector<32x16xf32>
    %245 = tpu.matmul %243, %244, %cst_135 {dimension_numbers = #tpu.dot_dimension_numbers<[1], [0], [0], [1], [0, 0, 1, 1], [], []>} : vector<32x32xbf16>, vector<32x16xbf16>, vector<32x16xf32> -> vector<32x16xf32>
    %c0_136 = arith.constant 0 : index
    %c0_137 = arith.constant 0 : index
    %246 = vector.load %arg24[%c0_136, %c0_137] : memref<32x1xf32, #tpu.memory_space<vmem>>, vector<32x1xf32>
    %247 = vector.broadcast %246 : vector<32x1xf32> to vector<32x16xf32>
    %248 = arith.addf %245, %247 : vector<32x16xf32>
    %c0_138 = arith.constant 0 : index
    %c0_139 = arith.constant 0 : index
    %249 = vector.load %arg25[%c0_138, %c0_139] : memref<8x32xbf16, #tpu.memory_space<vmem>>, vector<8x32xbf16>
    %250 = arith.truncf %248 : vector<32x16xf32> to vector<32x16xbf16>
    %cst_140 = arith.constant dense<0.000000e+00> : vector<8x16xf32>
    %251 = tpu.matmul %249, %250, %cst_140 {dimension_numbers = #tpu.dot_dimension_numbers<[1], [0], [0], [1], [0, 0, 1, 1], [], []>} : vector<8x32xbf16>, vector<32x16xbf16>, vector<8x16xf32> -> vector<8x16xf32>
    %252 = vector.extract_strided_slice %251 {offsets = [0, 0], sizes = [4, 16], strides = [1, 1]} : vector<8x16xf32> to vector<4x16xf32>
    %c0_141 = arith.constant 0 : index
    %c0_142 = arith.constant 0 : index
    %253 = vector.load %arg26[%c0_141, %c0_142] : memref<4x1xf32, #tpu.memory_space<vmem>>, vector<4x1xf32>
    %254 = vector.broadcast %253 : vector<4x1xf32> to vector<4x16xf32>
    %255 = arith.addf %252, %254 : vector<4x16xf32>
    %cst_143 = arith.constant 0.000000e+00 : f32
    %256 = vector.broadcast %cst_143 : f32 to vector<4x16xf32>
    %257 = arith.maximumf %255, %256 : vector<4x16xf32>
    %258 = vector.extract_strided_slice %251 {offsets = [4, 0], sizes = [4, 16], strides = [1, 1]} : vector<8x16xf32> to vector<4x16xf32>
    %cst_144 = arith.constant dense<0.000000e+00> : vector<4xf32>
    %259 = vector.multi_reduction <add>, %258, %cst_144 [1] : vector<4x16xf32> to vector<4xf32>
    %260 = vector.shape_cast %259 : vector<4xf32> to vector<4x1xf32>
    %cst_145 = arith.constant 1.600000e+01 : f32
    %261 = vector.broadcast %cst_145 : f32 to vector<4x1xf32>
    %262 = arith.divf %260, %261 : vector<4x1xf32>
    %c0_146 = arith.constant 0 : index
    %c0_147 = arith.constant 0 : index
    %263 = vector.load %arg27[%c0_146, %c0_147] : memref<4x1xf32, #tpu.memory_space<vmem>>, vector<4x1xf32>
    %264 = arith.addf %262, %263 : vector<4x1xf32>
    %cst_148 = arith.constant 0.000000e+00 : f32
    %265 = vector.broadcast %cst_148 : f32 to vector<4x1xf32>
    %266 = arith.maximumf %264, %265 : vector<4x1xf32>
    %c0_149 = arith.constant 0 : index
    %c0_150 = arith.constant 0 : index
    %267 = vector.load %arg29[%c0_149, %c0_150] : memref<4x4xbf16, #tpu.memory_space<vmem>>, vector<4x4xbf16>
    %268 = arith.truncf %266 : vector<4x1xf32> to vector<4x1xbf16>
    %cst_151 = arith.constant dense<0.000000e+00> : vector<4x1xf32>
    %269 = tpu.matmul %267, %268, %cst_151 {dimension_numbers = #tpu.dot_dimension_numbers<[1], [0], [0], [1], [0, 0, 1, 1], [], []>} : vector<4x4xbf16>, vector<4x1xbf16>, vector<4x1xf32> -> vector<4x1xf32>
    %c0_152 = arith.constant 0 : index
    %c0_153 = arith.constant 0 : index
    %270 = vector.load %arg30[%c0_152, %c0_153] : memref<4x1xf32, #tpu.memory_space<vmem>>, vector<4x1xf32>
    %271 = arith.addf %269, %270 : vector<4x1xf32>
    %c0_154 = arith.constant 0 : index
    %c0_155 = arith.constant 0 : index
    %272 = vector.load %arg28[%c0_154, %c0_155] : memref<4x4xbf16, #tpu.memory_space<vmem>>, vector<4x4xbf16>
    %273 = arith.truncf %257 : vector<4x16xf32> to vector<4x16xbf16>
    %cst_156 = arith.constant dense<0.000000e+00> : vector<4x16xf32>
    %274 = tpu.matmul %272, %273, %cst_156 {dimension_numbers = #tpu.dot_dimension_numbers<[1], [0], [0], [1], [0, 0, 1, 1], [], []>} : vector<4x4xbf16>, vector<4x16xbf16>, vector<4x16xf32> -> vector<4x16xf32>
    %275 = vector.broadcast %271 : vector<4x1xf32> to vector<4x16xf32>
    %276 = arith.addf %274, %275 : vector<4x16xf32>
    %cst_157 = arith.constant 0.000000e+00 : f32
    %277 = vector.broadcast %cst_157 : f32 to vector<4x16xf32>
    %278 = arith.maximumf %276, %277 : vector<4x16xf32>
    %c0_158 = arith.constant 0 : index
    %c0_159 = arith.constant 0 : index
    %279 = vector.load %arg31[%c0_158, %c0_159] : memref<1x4xf32, #tpu.memory_space<vmem>>, vector<1x4xf32>
    %cst_160 = arith.constant dense<0.000000e+00> : vector<1x16xf32>
    %280 = tpu.matmul %279, %278, %cst_160 {dimension_numbers = #tpu.dot_dimension_numbers<[1], [0], [0], [1], [0, 0, 1, 1], [], []>} : vector<1x4xf32>, vector<4x16xf32>, vector<1x16xf32> -> vector<1x16xf32>
    %c0_161 = arith.constant 0 : index
    %c0_162 = arith.constant 0 : index
    %281 = vector.load %arg32[%c0_161, %c0_162] : memref<1x1xf32, #tpu.memory_space<vmem>>, vector<1x1xf32>
    %282 = vector.broadcast %281 : vector<1x1xf32> to vector<1x16xf32>
    %283 = arith.addf %280, %282 : vector<1x16xf32>
    %c0_163 = arith.constant 0 : index
    %c0_164 = arith.constant 0 : index
    %284 = vector.load %arg33[%c0_163, %c0_164] : memref<16x1024xf32, #tpu.memory_space<vmem>>, vector<16x1024xf32>
    %cst_165 = arith.constant dense<0.000000e+00> : vector<1x1024xf32>
    %285 = tpu.matmul %283, %284, %cst_165 {dimension_numbers = #tpu.dot_dimension_numbers<[1], [0], [0], [1], [0, 0, 1, 1], [], []>} : vector<1x16xf32>, vector<16x1024xf32>, vector<1x1024xf32> -> vector<1x1024xf32>
    %c0_166 = arith.constant 0 : index
    %c0_167 = arith.constant 0 : index
    %c0_168 = arith.constant 0 : index
    %286 = vector.load %arg34[%c0_166, %c0_167, %c0_168] : memref<1x1x1024xf32, #tpu.memory_space<vmem>>, vector<1x1x1024xf32>
    %287 = vector.shape_cast %286 : vector<1x1x1024xf32> to vector<1x1024xf32>
    %288 = vector.shape_cast %285 : vector<1x1024xf32> to vector<1x1x1024xf32>
    tpu.vector_store %arg34[%c0_166, %c0_167, %c0_168], %288 {strides = array<i32>} : memref<1x1x1024xf32, #tpu.memory_space<vmem>>, vector<1x1x1024xf32>,
    return
  }
  func.func @transform_0(%arg0: i32) -> (i32, i32, i32) {
    %c0_i32 = arith.constant 0 : i32
    %c0_i32_0 = arith.constant 0 : i32
    %c0_i32_1 = arith.constant 0 : i32
    return %arg0, %c0_i32, %c0_i32_0 : i32, i32, i32
  }
  func.func @transform_1(%arg0: i32) -> (i32, i32) {
    %c0_i32 = arith.constant 0 : i32
    %c0_i32_0 = arith.constant 0 : i32
    %c0_i32_1 = arith.constant 0 : i32
    return %c0_i32, %c0_i32_0 : i32, i32
  }
  func.func @transform_2(%arg0: i32) -> (i32, i32) {
    %c0_i32 = arith.constant 0 : i32
    %c0_i32_0 = arith.constant 0 : i32
    %c0_i32_1 = arith.constant 0 : i32
    return %c0_i32, %c0_i32_0 : i32, i32
  }
  func.func @transform_3(%arg0: i32) -> (i32, i32) {
    %c0_i32 = arith.constant 0 : i32
    %c0_i32_0 = arith.constant 0 : i32
    %c0_i32_1 = arith.constant 0 : i32
    return %c0_i32, %c0_i32_0 : i32, i32
  }
  func.func @transform_4(%arg0: i32) -> (i32, i32) {
    %c0_i32 = arith.constant 0 : i32
    %c0_i32_0 = arith.constant 0 : i32
    %c0_i32_1 = arith.constant 0 : i32
    return %c0_i32, %c0_i32_0 : i32, i32
  }
  func.func @transform_5(%arg0: i32) -> (i32, i32) {
    %c0_i32 = arith.constant 0 : i32
    %c0_i32_0 = arith.constant 0 : i32
    %c0_i32_1 = arith.constant 0 : i32
    return %c0_i32, %c0_i32_0 : i32, i32
  }
  func.func @transform_6(%arg0: i32) -> (i32, i32, i32) {
    %c0_i32 = arith.constant 0 : i32
    %c0_i32_0 = arith.constant 0 : i32
    %c0_i32_1 = arith.constant 0 : i32
    %c0_i32_2 = arith.constant 0 : i32
    return %c0_i32, %c0_i32_0, %c0_i32_1 : i32, i32, i32
  }
  func.func @transform_7(%arg0: i32) -> (i32, i32) {
    %c0_i32 = arith.constant 0 : i32
    %c0_i32_0 = arith.constant 0 : i32
    %c0_i32_1 = arith.constant 0 : i32
    return %c0_i32, %c0_i32_0 : i32, i32
  }
  func.func @transform_8(%arg0: i32) -> (i32, i32) {
    %c0_i32 = arith.constant 0 : i32
    %c0_i32_0 = arith.constant 0 : i32
    %c0_i32_1 = arith.constant 0 : i32
    return %c0_i32, %c0_i32_0 : i32, i32
  }
  func.func @transform_9(%arg0: i32) -> (i32, i32) {
    %c0_i32 = arith.constant 0 : i32
    %c0_i32_0 = arith.constant 0 : i32
    %c0_i32_1 = arith.constant 0 : i32
    return %c0_i32, %c0_i32_0 : i32, i32
  }
  func.func @transform_10(%arg0: i32) -> (i32, i32) {
    %c0_i32 = arith.constant 0 : i32
    %c0_i32_0 = arith.constant 0 : i32
    %c0_i32_1 = arith.constant 0 : i32
    return %c0_i32, %c0_i32_0 : i32, i32
  }
  func.func @transform_11(%arg0: i32) -> (i32, i32) {
    %c0_i32 = arith.constant 0 : i32
    %c0_i32_0 = arith.constant 0 : i32
    %c0_i32_1 = arith.constant 0 : i32
    return %c0_i32, %c0_i32_0 : i32, i32
  }
  func.func @transform_12(%arg0: i32) -> (i32, i32) {
    %c0_i32 = arith.constant 0 : i32
    %c0_i32_0 = arith.constant 0 : i32
    %c0_i32_1 = arith.constant 0 : i32
    return %c0_i32, %c0_i32_0 : i32, i32
  }
  func.func @transform_13(%arg0: i32) -> (i32, i32, i32) {
    %c0_i32 = arith.constant 0 : i32
    %c0_i32_0 = arith.constant 0 : i32
    %c0_i32_1 = arith.constant 0 : i32
    %c0_i32_2 = arith.constant 0 : i32
    return %c0_i32, %c0_i32_0, %c0_i32_1 : i32, i32, i32
  }
  func.func @transform_14(%arg0: i32) -> (i32, i32) {
    %c0_i32 = arith.constant 0 : i32
    %c0_i32_0 = arith.constant 0 : i32
    %c0_i32_1 = arith.constant 0 : i32
    return %c0_i32, %c0_i32_0 : i32, i32
  }
  func.func @transform_15(%arg0: i32) -> (i32, i32) {
    %c0_i32 = arith.constant 0 : i32
    %c0_i32_0 = arith.constant 0 : i32
    %c0_i32_1 = arith.constant 0 : i32
    return %c0_i32, %c0_i32_0 : i32, i32
  }
  func.func @transform_16(%arg0: i32) -> (i32, i32) {
    %c0_i32 = arith.constant 0 : i32
    %c0_i32_0 = arith.constant 0 : i32
    %c0_i32_1 = arith.constant 0 : i32
    return %c0_i32, %c0_i32_0 : i32, i32
  }
  func.func @transform_17(%arg0: i32) -> (i32, i32) {
    %c0_i32 = arith.constant 0 : i32
    %c0_i32_0 = arith.constant 0 : i32
    %c0_i32_1 = arith.constant 0 : i32
    return %c0_i32, %c0_i32_0 : i32, i32
  }
  func.func @transform_18(%arg0: i32) -> (i32, i32) {
    %c0_i32 = arith.constant 0 : i32
    %c0_i32_0 = arith.constant 0 : i32
    %c0_i32_1 = arith.constant 0 : i32
    return %c0_i32, %c0_i32_0 : i32, i32
  }
  func.func @transform_19(%arg0: i32) -> (i32, i32) {
    %c0_i32 = arith.constant 0 : i32
    %c0_i32_0 = arith.constant 0 : i32
    %c0_i32_1 = arith.constant 0 : i32
    return %c0_i32, %c0_i32_0 : i32, i32
  }
  func.func @transform_20(%arg0: i32) -> (i32, i32, i32) {
    %c0_i32 = arith.constant 0 : i32
    %c0_i32_0 = arith.constant 0 : i32
    %c0_i32_1 = arith.constant 0 : i32
    %c0_i32_2 = arith.constant 0 : i32
    return %c0_i32, %c0_i32_0, %c0_i32_1 : i32, i32, i32
  }
  func.func @transform_21(%arg0: i32) -> (i32, i32) {
    %c0_i32 = arith.constant 0 : i32
    %c0_i32_0 = arith.constant 0 : i32
    %c0_i32_1 = arith.constant 0 : i32
    return %c0_i32, %c0_i32_0 : i32, i32
  }
  func.func @transform_22(%arg0: i32) -> (i32, i32) {
    %c0_i32 = arith.constant 0 : i32
    %c0_i32_0 = arith.constant 0 : i32
    %c0_i32_1 = arith.constant 0 : i32
    return %c0_i32, %c0_i32_0 : i32, i32
  }
  func.func @transform_23(%arg0: i32) -> (i32, i32) {
    %c0_i32 = arith.constant 0 : i32
    %c0_i32_0 = arith.constant 0 : i32
    %c0_i32_1 = arith.constant 0 : i32
    return %c0_i32, %c0_i32_0 : i32, i32
  }
  func.func @transform_24(%arg0: i32) -> (i32, i32) {
    %c0_i32 = arith.constant 0 : i32
    %c0_i32_0 = arith.constant 0 : i32
    %c0_i32_1 = arith.constant 0 : i32
    return %c0_i32, %c0_i32_0 : i32, i32
  }
  func.func @transform_25(%arg0: i32) -> (i32, i32) {
    %c0_i32 = arith.constant 0 : i32
    %c0_i32_0 = arith.constant 0 : i32
    %c0_i32_1 = arith.constant 0 : i32
    return %c0_i32, %c0_i32_0 : i32, i32
  }
  func.func @transform_26(%arg0: i32) -> (i32, i32) {
    %c0_i32 = arith.constant 0 : i32
    %c0_i32_0 = arith.constant 0 : i32
    %c0_i32_1 = arith.constant 0 : i32
    return %c0_i32, %c0_i32_0 : i32, i32
  }
  func.func @transform_27(%arg0: i32) -> (i32, i32) {
    %c0_i32 = arith.constant 0 : i32
    %c0_i32_0 = arith.constant 0 : i32
    %c0_i32_1 = arith.constant 0 : i32
    return %c0_i32, %c0_i32_0 : i32, i32
  }
  func.func @transform_28(%arg0: i32) -> (i32, i32) {
    %c0_i32 = arith.constant 0 : i32
    %c0_i32_0 = arith.constant 0 : i32
    %c0_i32_1 = arith.constant 0 : i32
    return %c0_i32, %c0_i32_0 : i32, i32
  }
  func.func @transform_29(%arg0: i32) -> (i32, i32) {
    %c0_i32 = arith.constant 0 : i32
    %c0_i32_0 = arith.constant 0 : i32
    %c0_i32_1 = arith.constant 0 : i32
    return %c0_i32, %c0_i32_0 : i32, i32
  }
  func.func @transform_30(%arg0: i32) -> (i32, i32) {
    %c0_i32 = arith.constant 0 : i32
    %c0_i32_0 = arith.constant 0 : i32
    %c0_i32_1 = arith.constant 0 : i32
    return %c0_i32, %c0_i32_0 : i32, i32
  }
  func.func @transform_31(%arg0: i32) -> (i32, i32) {
    %c0_i32 = arith.constant 0 : i32
    %c0_i32_0 = arith.constant 0 : i32
    %c0_i32_1 = arith.constant 0 : i32
    return %c0_i32, %c0_i32_0 : i32, i32
  }
  func.func @transform_32(%arg0: i32) -> (i32, i32) {
    %c0_i32 = arith.constant 0 : i32
    %c0_i32_0 = arith.constant 0 : i32
    %c0_i32_1 = arith.constant 0 : i32
    return %c0_i32, %c0_i32_0 : i32, i32
  }
  func.func @transform_33(%arg0: i32) -> (i32, i32, i32) {
    %c0_i32 = arith.constant 0 : i32
    %c0_i32_0 = arith.constant 0 : i32
    %c0_i32_1 = arith.constant 0 : i32
    return %arg0, %c0_i32, %c0_i32_0 : i32, i32, i32
  }
}

</mosaic_0001>

<bundles_post_ra>
// kernel: mobilenet_v2_seg.1
= control target key start
LH: loop header
LB: loop body
LE: loop exit
PB: predicated region body
PF: predicated region fallthrough
CT: control target
= control target key end

     0   :  { %s7227_s6 = smov 1   ;;  %s7228_s10 = smov 2   ;;  %s8241_s0 = inlined_call_operand.smem [shape: u32[34], index: -1, kind: input, shape index: {}] }
   0x1   :  { %s7280_s5 = sld [smem:[%s8241_s0]]   ;;  %s7229_s14 = smov 3  }
   0x2   :  { %s7285_s9 = sld [smem:[%s8241_s0 + %s7227_s6]]   ;;  %s7230_s18 = smov 4  }
   0x3   :  { %s7290_s13 = sld [smem:[%s8241_s0 + %s7228_s10]]   ;;  %s7231_s22 = smov 5  }
   0x4   :  { %s7295_s17 = sld [smem:[%s8241_s0 + %s7229_s14]]   ;;  %s7232_s26 = smov 6  }
   0x5   :  { %s7300_s21 = sld [smem:[%s8241_s0 + %s7230_s18]]   ;;  %s7233_s30 = smov 7  }
   0x6   :  { %s7305_s25 = sld [smem:[%s8241_s0 + %s7231_s22]]   ;;  %s7234_s4 = smov 8  }
   0x7   :  { %s7310_s29 = sld [smem:[%s8241_s0 + %s7232_s26]]   ;;  %s7235_s10 = smov 9  }
   0x8   :  { %s7315_s3 = sld [smem:[%s8241_s0 + %s7233_s30]]   ;;  %s7236_s15 = smov 10  }
   0x9   :  { %s7320_s8 = sld [smem:[%s8241_s0 + %s7234_s4]]   ;;  %s7237_s20 = smov 11  }
   0xa   :  { %s7325_s14 = sld [smem:[%s8241_s0 + %s7235_s10]]   ;;  %s7238_s26 = smov 12  }
   0xb   :  { %s7330_s19 = sld [smem:[%s8241_s0 + %s7236_s15]]   ;;  %s7239_s1 = smov 13  }
   0xc   :  { %s7335_s24 = sld [smem:[%s8241_s0 + %s7237_s20]]   ;;  %s7240_s7 = smov 14  }
   0xd   :  { %s7340_s30 = sld [smem:[%s8241_s0 + %s7238_s26]]   ;;  %s7241_s15 = smov 15  }
   0xe   :  { %s7345_s6 = sld [smem:[%s8241_s0 + %s7239_s1]]   ;;  %s7242_s22 = smov 16  }
   0xf   :  { %s7350_s12 = sld [smem:[%s8241_s0 + %s7240_s7]]   ;;  %s7243_s28 = smov 17  }
  0x10   :  { %s7355_s20 = sld [smem:[%s8241_s0 + %s7241_s15]]   ;;  %s7244_s7 = smov 18  }
  0x11   :  { %s7360_s27 = sld [smem:[%s8241_s0 + %s7242_s22]]   ;;  %s7245_s15 = smov 19  }
  0x12   :  { %s7365_s4 = sld [smem:[%s8241_s0 + %s7243_s28]]   ;;  %s7246_s22 = smov 20  }
  0x13   :  { %s7247_s28 = smov 21   ;;  %s7258_s23 = smov 32  }
  0x14   :  { %s7259_s1 = smov 33  }
  0x15   :  { %8260 = sst [smem:[#allocation3_spill]] %s7350_s12 }
  0x16   :  { %8261 = sst [smem:[#allocation4_spill]] %s7355_s20 }
  0x17   :  { %8262 = sst [smem:[#allocation5_spill]] %s7360_s27 }
  0x18   :  { %8263 = sst [smem:[#allocation6_spill]] %s7365_s4 }
  0x19   :  { %s7370_s12 = sld [smem:[%s8241_s0 + %s7244_s7]]   ;;  %s7248_s7 = smov 22  }
  0x1a   :  { %s7375_s20 = sld [smem:[%s8241_s0 + %s7245_s15]]   ;;  %s7249_s15 = smov 23  }
  0x1b   :  { %s7380_s27 = sld [smem:[%s8241_s0 + %s7246_s22]]   ;;  %s7250_s22 = smov 24  }
  0x1c   :  { %s7385_s4 = sld [smem:[%s8241_s0 + %s7247_s28]]   ;;  %s7251_s28 = smov 25  }
  0x1f   :  { %8264 = sst [smem:[#allocation7_spill]] %s7370_s12 }
  0x20   :  { %8265 = sst [smem:[#allocation8_spill]] %s7375_s20 }
  0x21   :  { %8266 = sst [smem:[#allocation9_spill]] %s7380_s27 }
  0x22   :  { %8267 = sst [smem:[#allocation10_spill]] %s7385_s4 }
  0x23   :  { %s7390_s12 = sld [smem:[%s8241_s0 + %s7248_s7]]   ;;  %s7252_s7 = smov 26  }
  0x24   :  { %s7395_s20 = sld [smem:[%s8241_s0 + %s7249_s15]]   ;;  %s7253_s15 = smov 27  }
  0x25   :  { %s7400_s27 = sld [smem:[%s8241_s0 + %s7250_s22]]   ;;  %s7254_s22 = smov 28  }
  0x26   :  { %s7405_s4 = sld [smem:[%s8241_s0 + %s7251_s28]]   ;;  %s7255_s28 = smov 29  }
  0x29   :  { %8268 = sst [smem:[#allocation11_spill]] %s7390_s12 }
  0x2a   :  { %8269 = sst [smem:[#allocation12_spill]] %s7395_s20 }
  0x2b   :  { %8270 = sst [smem:[#allocation13_spill]] %s7400_s27 }
  0x2c   :  { %8271 = sst [smem:[#allocation14_spill]] %s7405_s4 }
  0x2d   :  { %s7410_s12 = sld [smem:[%s8241_s0 + %s7252_s7]]   ;;  %s7256_s7 = smov 30  }
  0x2e   :  { %s7415_s20 = sld [smem:[%s8241_s0 + %s7253_s15]]   ;;  %s7257_s15 = smov 31  }
  0x2f   :  { %s7420_s27 = sld [smem:[%s8241_s0 + %s7254_s22]]  }
  0x30   :  { %s7425_s4 = sld [smem:[%s8241_s0 + %s7255_s28]]  }
  0x33   :  { %8272 = sst [smem:[#allocation15_spill]] %s7410_s12 }
  0x34   :  { %8273 = sst [smem:[#allocation16_spill]] %s7415_s20 }
  0x35   :  { %8274 = sst [smem:[#allocation17_spill]] %s7420_s27 }
  0x36   :  { %8275 = sst [smem:[#allocation18_spill]] %s7425_s4 }
  0x37   :  { %s7430_s12 = sld [smem:[%s8241_s0 + %s7256_s7]]   ;;  %s7445_s7 = smov 0  }
  0x38   :  { %s6007_s20 = sld [smem:[%s8241_s0 + %s7257_s15]]  }
  0x39   :  { %s7438_s27 = sld [smem:[%s8241_s0 + %s7258_s23]]  }
  0x3a   :  { %s7443_s4 = sld [smem:[%s8241_s0 + %s7259_s1]]  }
  0x3e   :  { %v72_v0 = vstv %s6007_s20 }
  0x3f   :  { %73 = vst [vmem:[#allocation2] sm:$0x1] %v72_v0 }
  0x40 LB: > { %s6010_s10 = sadd.s32 4294967295, %s7225_s7   ;;  %p6014_p0 = scmp.ge.s32.totalorder %s7225_s7, 1  ;;  %s7225_s7 = sphi %s7445_s7, %s79_s7  }
  0x41   : > { %p923_p1 = scmp.lt.s32.totalorder %s7225_s7, 3 }
  0x43   : > { %p924_p2 = pnand %p6014_p0, %p923_p1 }
  0x44   : > { %p1006_p3 = scmp.lt.s32.totalorder (!%p924_p2), %s6010_s10, 1  ;;  %v1021_v1 = vld [vmem:[%s7290_s13] sm:$0xff] (!%p924_p2)  ;;  %vm1049_vm0 = vcmask (!%p924_p2), 1044480   ;;  %v7260_v2 = vmov (!%p924_p2), 0   ;;  %vm1050_vm1 = vcmask (!%p924_p2), 1045504   ;;  %v7261_v4 = vmov (!%p924_p2), 65535  }
  0x45   : > { %927 = sbr.rel (%p924_p2) target bundleno = 4074 (0xfea), region = 152  ;;  %1091 = vmatprep.mubr.bf16.mxu0 (!%p924_p2), %v7260_v2  ;;  %6648 = vset.pattern.permute.xlu0 (!%p924_p2), %v7260_v2  ;;  %v1108_v3 = vld [vmem:[%s7300_s21] sm:$0xff] (!%p924_p2)  ;;  %v1051_v5 = vsel (!%p924_p2), %vm1049_vm0, 4294967295, %v7261_v4  ;;  %v3305_v6 = vld [vmem:[%s7310_s29 + $0x8] sm:$0xff] (!%p924_p2)  ;;  %v6315_v15 = vld [vmem:[%s7310_s29 + $0x18] sm:$0xff] (!%p924_p2)  ;;  %vm1045_vm2 = vcmask (!%p924_p2), 220160  }
  0x46   : > { %1024 = vperm.xlu0 (!%p924_p2), %6648, %v1021_v1   ;;  %1168 = vmatprep.mubr.bf16.mxu1 (!%p924_p2), %v7260_v2  ;;  %v1052_v9 = vsel (!%p924_p2), %vm1050_vm1, %v1051_v5, 0  ;;  %v1016_v14 = vld [vmem:[%s7285_s9] sm:$0xf] (!%p924_p2)  ;;  %v6317_v16 = vld [vmem:[%s7310_s29 + $0x28] sm:$0xff] (!%p924_p2)  ;;  %v6319_v17 = vld [vmem:[%s7310_s29 + $0x38] sm:$0xff] (!%p924_p2)  ;;  %vm1129_vm3 = vcmask (!%p924_p2), 1043456  }
  0x47   : > { %6649 = vset.pattern.permute.xlu1 (!%p924_p2), %v7260_v2  ;;  %v6321_v18 = vld [vmem:[%s7310_s29 + $0x48] sm:$0xff] (!%p924_p2)  ;;  %v6323_v19 = vld [vmem:[%s7310_s29 + $0x58] sm:$0xff] (!%p924_p2)  ;;  %v3572_v24 = vld [vmem:[%s7335_s24] sm:$0xff] (!%p924_p2)  ;;  %vm1125_vm4 = vcmask (!%p924_p2), 64512   ;;  %vm3521_vm5 = vcmask (!%p924_p2), 130048   ;;  %s8276_s11 = sld [smem:[#allocation3_spill]] (!%p924_p2) }
  0x48   : > { %v6325_v20 = vld [vmem:[%s7310_s29 + $0x68] sm:$0xff] (!%p924_p2)  ;;  %v6327_v21 = vld [vmem:[%s7310_s29 + $0x78] sm:$0xff] (!%p924_p2)  ;;  %v6414_v25 = vld [vmem:[%s7345_s6 + $0x10] sm:$0xff] (!%p924_p2)  ;;  %s8253_s15 = smov (!%p924_p2), 64   ;;  %s8277_s16 = sld [smem:[#allocation5_spill]] (!%p924_p2)  ;;  %vm7264_vm6 = vmmov (!%p924_p2), 0  }
  0x49   : > { %v6329_v22 = vld [vmem:[%s7310_s29 + $0x88] sm:$0xff] (!%p924_p2)  ;;  %v6418_v26 = vld [vmem:[%s7345_s6 + $0x30] sm:$0xff] (!%p924_p2)  ;;  %v4290_v29 = vld [vmem:[%s7345_s6] sm:$0xff] (!%p924_p2)  ;;  %s8278_s18 = sld [smem:[#allocation7_spill]] (!%p924_p2)  ;;  %s8279_s23 = sld [smem:[#allocation9_spill]] (!%p924_p2)  ;;  %vm4706_vm7 = vcmask (!%p924_p2), 523264  }
  0x4a   : > { %1112 = vperm.xlu0 (!%p924_p2), %6648, %v1108_v3   ;;  %v3489_v23 = vld [vmem:[%s7315_s3 + $0x8] sm:$0xff] (!%p924_p2)  ;;  %v6422_v27 = vld [vmem:[%s7345_s6 + $0x50] sm:$0xff] (!%p924_p2)  ;;  %v6416_v30 = vld [vmem:[%s7345_s6 + $0x20] sm:$0xff] (!%p924_p2)  ;;  %s8280_s22 = sld [smem:[#allocation10_spill]] (!%p924_p2)  ;;  %s8281_s26 = sld [smem:[#allocation4_spill]] (!%p924_p2)  ;;  %vm5246_vm8 = vcmask (!%p924_p2), 261120  }
  0x4b   : > { %v6426_v28 = vld [vmem:[%s7345_s6 + $0x70] sm:$0xff] (!%p924_p2)  ;;  %v6420_v31 = vld [vmem:[%s7345_s6 + $0x40] sm:$0xff] (!%p924_p2)  ;;  %v1109_v34 = vld [vmem:[%s7300_s21 + $0x8] sm:$0xff] (!%p924_p2)  ;;  %s8282_s1 = sld [smem:[#allocation6_spill]] (!%p924_p2)  ;;  %s8283_s28 = sld [smem:[#allocation8_spill]] (!%p924_p2)  ;;  %vm5356_vm9 = vcmask (!%p924_p2), 130052  }
  0x4c   : > { %s8297_s10 = smov (!%p1006_p3, %s6010_s10), 1  ;;  %v6424_v32 = vld [vmem:[%s7345_s6 + $0x60] sm:$0xff]  ;;  %1117 = vperm.xlu1 %6649, %v1109_v34   ;;  %v6314_v36 = vld [vmem:[%s7310_s29 + $0x10] sm:$0xff]  ;;  %v3573_v54 = vld [vmem:[%s7335_s24 + $0x8] sm:$0xff]  ;;  %s7265_s2 = smov 112   ;;  %vm5377_vm10 = vcmask 1041408  }
  0x4d   : > { %s6493_s0 = sshll.u32 %s8297_s10, 5  ;;  %v6428_v33 = vld [vmem:[%s7345_s6 + $0x80] sm:$0xff]  ;;  %v6318_v38 = vld [vmem:[%s7310_s29 + $0x30] sm:$0xff]  ;;  %v6415_v59 = vld [vmem:[%s7345_s6 + $0x18] sm:$0xff]  ;;  %vm5373_vm11 = vcmask 31744  }
  0x4e   : > { %s1010_s20 = scalar_lea.vmem %s7280_s5, %s6493_s0  ;;  %3313 = vperm.xlu0 %6648, %v3305_v6   ;;  %v3304_v35 = vld [vmem:[%s7310_s29] sm:$0xff]  ;;  %v6322_v40 = vld [vmem:[%s7310_s29 + $0x50] sm:$0xff]  ;;  %v6419_v62 = vld [vmem:[%s7345_s6 + $0x38] sm:$0xff]  ;;  %s7266_s0 = smov 96  }
  0x4f   : > { %v6650_v7 = vld [vmem:[%s1010_s20 + $0x4] ss:$8 sps:$4 sm:$0xff]   ;;  %v6652_v8 = vld [vmem:[%s1010_s20] ss:$8 sps:$4 sm:$0xff]   ;;  %v6326_v42 = vld [vmem:[%s7310_s29 + $0x70] sm:$0xff] }
  0x50   : > { %1059 = vmatprep.subr.bf16.mxu0 %v6650_v7  ;;  %v6653_v10 = vld [vmem:[%s1010_s20 + $0x14] ss:$8 sps:$4 sm:$0x3f]   ;;  %v6655_v11 = vld [vmem:[%s1010_s20 + $0x10] ss:$8 sps:$4 sm:$0x3f]   ;;  %3308 = vperm.xlu1 %6649, %v3304_v35  }
  0x51   : > { %1060 = vmatpush1.bf16.msra.mxu0 %v6652_v8  ;;  %v1057_v12 = vand.u32 %v6653_v10, %v1052_v9  ;;  %v1054_v13 = vand.u32 %v6655_v11, %v1052_v9  ;;  %v6316_v37 = vld [vmem:[%s7310_s29 + $0x20] sm:$0xff]  ;;  %v6660_v43 = vld [vmem:[%s7305_s25 + $0x8] ss:$72 sps:$4 sm:$0xff]   ;;  %v6662_v44 = vld [vmem:[%s7305_s25 + $0xc] ss:$72 sps:$4 sm:$0xff]   ;;  %s8251_s20 = smov 80  }
  0x52   : > { %3330 = vperm.xlu0 %6648, %v6315_v15   ;;  %v6320_v39 = vld [vmem:[%s7310_s29 + $0x40] sm:$0xff]  ;;  %v6672_v49 = vld [vmem:[%s7305_s25 + $0x128] ss:$72 sps:$4 sm:$0xff]   ;;  %v6674_v50 = vld [vmem:[%s7305_s25 + $0x12c] ss:$72 sps:$4 sm:$0xff]  }
  0x53   : > { %1061 = vmatprep.subr.bf16.mxu0 %v1057_v12  ;;  %v6324_v41 = vld [vmem:[%s7310_s29 + $0x60] sm:$0xff]  ;;  %v6684_v55 = vld [vmem:[%s7305_s25 + $0x248] ss:$72 sps:$4 sm:$0xff]   ;;  %v6686_v56 = vld [vmem:[%s7305_s25 + $0x24c] ss:$72 sps:$4 sm:$0xff]  }
  0x54   : > { %3325 = vperm.xlu1 %6649, %v6314_v36   ;;  %v6328_v45 = vld [vmem:[%s7310_s29 + $0x80] sm:$0xff]  ;;  %v6696_v60 = vld [vmem:[%s7305_s25 + $0x368] ss:$72 sps:$4 sm:$0xff]   ;;  %v6698_v61 = vld [vmem:[%s7305_s25 + $0x36c] ss:$72 sps:$4 sm:$0xff]  }
  0x55   : > { %1062 = vmatpush1.bf16.msra.mxu0 %v1054_v13  ;;  %v6666_v46 = vld [vmem:[%s7305_s25 + $0x98] ss:$72 sps:$4 sm:$0xff]   ;;  %v6668_v47 = vld [vmem:[%s7305_s25 + $0x9c] ss:$72 sps:$4 sm:$0xff]   ;;  %v6708_v3 = vld [vmem:[%s7305_s25 + $0x488] ss:$72 sps:$4 sm:$0xff]  }
  0x56   : > { %3351 = vperm.xlu0 %6648, %v6317_v16   ;;  %2960 = vmatprep.subr.bf16.mxu0 %v6662_v44  ;;  %v3488_v48 = vld [vmem:[%s7315_s3] sm:$0xff]  ;;  %v6423_v1 = vld [vmem:[%s7345_s6 + $0x58] sm:$0xff]  ;;  %v6710_v4 = vld [vmem:[%s7305_s25 + $0x48c] ss:$72 sps:$4 sm:$0xff]  }
  0x57   : > { %v3515_v51 = vld [vmem:[%s7325_s14] sm:$0xff]  ;;  %v6427_v5 = vld [vmem:[%s7345_s6 + $0x78] sm:$0xff]  ;;  %v4291_v8 = vld [vmem:[%s7345_s6 + $0x8] sm:$0xff] }
  0x58   : > { %6022 = vmatmul.mubr.msk.bf16.vlgmr.msra.gmra.mrb[0].mxu0 %vm1045_vm2, %v1016_v14  ;;  %3346 = vperm.xlu1 %6649, %v6316_v37   ;;  %v6678_v52 = vld [vmem:[%s7305_s25 + $0x1b8] ss:$72 sps:$4 sm:$0xff]   ;;  %v6680_v53 = vld [vmem:[%s7305_s25 + $0x1bc] ss:$72 sps:$4 sm:$0xff]   ;;  %v6720_v9 = vld [vmem:[%s7305_s25 + $0x5a8] ss:$72 sps:$4 sm:$0xff]  }
  0x59   : > { %2961 = vmatpush1.bf16.msra.mxu0 %v6660_v43  ;;  %v6690_v57 = vld [vmem:[%s7305_s25 + $0x2d8] ss:$72 sps:$4 sm:$0xff]   ;;  %v6692_v58 = vld [vmem:[%s7305_s25 + $0x2dc] ss:$72 sps:$4 sm:$0xff]   ;;  %v6722_v10 = vld [vmem:[%s7305_s25 + $0x5ac] ss:$72 sps:$4 sm:$0xff]  }
  0x5a   : > { %3372 = vperm.xlu0 %6648, %v6319_v17   ;;  %2962 = vmatprep.subr.bf16.mxu0 %v6668_v47  ;;  %v6702_v63 = vld [vmem:[%s7305_s25 + $0x3f8] ss:$72 sps:$4 sm:$0xff]   ;;  %v6704_v0 = vld [vmem:[%s7305_s25 + $0x3fc] ss:$72 sps:$4 sm:$0xff]   ;;  %v6417_v11 = vld [vmem:[%s7345_s6 + $0x28] sm:$0xff] }
  0x5b   : > { %v6714_v6 = vld [vmem:[%s7305_s25 + $0x518] ss:$72 sps:$4 sm:$0xff]   ;;  %v6716_v7 = vld [vmem:[%s7305_s25 + $0x51c] ss:$72 sps:$4 sm:$0xff]   ;;  %v6421_v14 = vld [vmem:[%s7345_s6 + $0x48] sm:$0xff] }
  0x5c   : > { %3367 = vperm.xlu1 %6649, %v6318_v38   ;;  %v6726_v12 = vld [vmem:[%s7305_s25 + $0x638] ss:$72 sps:$4 sm:$0xff]   ;;  %v6728_v13 = vld [vmem:[%s7305_s25 + $0x63c] ss:$72 sps:$4 sm:$0xff]   ;;  %v6732_v15 = vld [vmem:[%s7305_s25 + $0x6c8] ss:$72 sps:$4 sm:$0xff]  }
  0x5d   : > { %2963 = vmatpush1.bf16.msra.mxu0 %v6666_v46  ;;  %v6734_v16 = vld [vmem:[%s7305_s25 + $0x6cc] ss:$72 sps:$4 sm:$0xff]   ;;  %v6656_v34 = vld [vmem:[%s7295_s17] sm:$0xff]   ;;  %v6663_v37 = vld [vmem:[%s7305_s25 + $0x90] ss:$72 sps:$4 sm:$0xff]  }
  0x5e   : > { %3393 = vperm.xlu0 %6648, %v6321_v18   ;;  %2964 = vmatprep.subr.bf16.mxu0 %v6674_v50  ;;  %v6425_v17 = vld [vmem:[%s7345_s6 + $0x68] sm:$0xff]  ;;  %v6665_v36 = vld [vmem:[%s7305_s25 + $0x94] ss:$72 sps:$4 sm:$0xff]  }
  0x5f   : > { %v6429_v18 = vld [vmem:[%s7345_s6 + $0x88] sm:$0xff]  ;;  %v6689_v44 = vld [vmem:[%s7305_s25 + $0x2d4] ss:$72 sps:$4 sm:$0xff]  }
  0x60   : > { %3388 = vperm.xlu1 %6649, %v6320_v39   ;;  %v6657_v35 = vld [vmem:[%s7305_s25] ss:$72 sps:$4 sm:$0xff]   ;;  %v6671_v38 = vld [vmem:[%s7305_s25 + $0x124] ss:$72 sps:$4 sm:$0xff]  }
  0x61   : > { %2965 = vmatpush1.bf16.msra.mxu0 %v6672_v49  ;;  %v6669_v39 = vld [vmem:[%s7305_s25 + $0x120] ss:$72 sps:$4 sm:$0xff]   ;;  %v6695_v46 = vld [vmem:[%s7305_s25 + $0x364] ss:$72 sps:$4 sm:$0xff]   ;;  %v6699_v49 = vld [vmem:[%s7305_s25 + $0x3f0] ss:$72 sps:$4 sm:$0xff]  }
  0x62   : > { %3414 = vperm.xlu0 %6648, %v6323_v19   ;;  %2966 = vmatprep.subr.bf16.mxu0 %v6680_v53  ;;  %v6681_v43 = vld [vmem:[%s7305_s25 + $0x240] ss:$72 sps:$4 sm:$0xff]   ;;  %v6707_v50 = vld [vmem:[%s7305_s25 + $0x484] ss:$72 sps:$4 sm:$0xff]   ;;  %v6711_v53 = vld [vmem:[%s7305_s25 + $0x510] ss:$72 sps:$4 sm:$0xff]  }
  0x63   : > { %v6693_v47 = vld [vmem:[%s7305_s25 + $0x360] ss:$72 sps:$4 sm:$0xff]  }
  0x64   : > { %3409 = vperm.xlu1 %6649, %v6322_v40   ;;  %v6677_v40 = vld [vmem:[%s7305_s25 + $0x1b4] ss:$72 sps:$4 sm:$0xff]  }
  0x65   : > { %2967 = vmatpush1.bf16.msra.mxu0 %v6678_v52  ;;  %v6713_v52 = vld [vmem:[%s7305_s25 + $0x514] ss:$72 sps:$4 sm:$0xff]  }
  0x66   : > { %3435 = vperm.xlu0 %6648, %v6325_v20   ;;  %2968 = vmatprep.subr.bf16.mxu0 %v6686_v56  ;;  %v6725_v56 = vld [vmem:[%s7305_s25 + $0x634] ss:$72 sps:$4 sm:$0xff]  }
  0x68   : > { %3430 = vperm.xlu1 %6649, %v6324_v41   ;;  %v6675_v41 = vld [vmem:[%s7305_s25 + $0x1b0] ss:$72 sps:$4 sm:$0xff]  }
  0x69   : > { %2969 = vmatpush1.bf16.msra.mxu0 %v6684_v55  ;;  %v6717_v55 = vld [vmem:[%s7305_s25 + $0x5a0] ss:$72 sps:$4 sm:$0xff]  }
  0x6a   : > { %3456 = vperm.xlu0 %6648, %v6327_v21   ;;  %2970 = vmatprep.subr.bf16.mxu0 %v6692_v58  ;;  %v6731_v58 = vld [vmem:[%s7305_s25 + $0x6c4] ss:$72 sps:$4 sm:$0xff]  }
  0x6c   : > { %3451 = vperm.xlu1 %6649, %v6326_v42   ;;  %v6683_v42 = vld [vmem:[%s7305_s25 + $0x244] ss:$72 sps:$4 sm:$0xff]  }
  0x6d   : > { %2971 = vmatpush1.bf16.msra.mxu0 %v6690_v57  ;;  %v6723_v57 = vld [vmem:[%s7305_s25 + $0x630] ss:$72 sps:$4 sm:$0xff]  }
  0x6e   : > { %3477 = vperm.xlu0 %6648, %v6329_v22   ;;  %2972 = vmatprep.subr.bf16.mxu0 %v6698_v61  ;;  %v6740_v61 = vld [vmem:[%s7305_s25 + $0x75c] ss:$72 sps:$4 sm:$0xff]  }
  0x70   : > { %3472 = vperm.xlu1 %6649, %v6328_v45   ;;  %v6687_v45 = vld [vmem:[%s7305_s25 + $0x2d0] ss:$72 sps:$4 sm:$0xff]  }
  0x71   : > { %2973 = vmatpush1.bf16.msra.mxu0 %v6696_v60  ;;  %v6737_v60 = vld [vmem:[%s7305_s25 + $0x754] ss:$72 sps:$4 sm:$0xff]  }
  0x72   : > { %3497 = vperm.xlu0 %6648, %v3489_v23   ;;  %2974 = vmatprep.subr.bf16.mxu0 %v6704_v0  ;;  %v6743_v0 = vld [vmem:[%s7305_s25 + $0x7e4] ss:$72 sps:$4 sm:$0xff]  }
  0x74   : > { %3492 = vperm.xlu1 %6649, %v3488_v48   ;;  %v6701_v48 = vld [vmem:[%s7305_s25 + $0x3f4] ss:$72 sps:$4 sm:$0xff]  }
  0x75   : > { %2975 = vmatpush1.bf16.msra.mxu0 %v6702_v63  ;;  %v6738_v63 = vld [vmem:[%s7305_s25 + $0x758] ss:$72 sps:$4 sm:$0xff]  }
  0x76   : > { %3576 = vperm.xlu0 %6648, %v3572_v24   ;;  %2976 = vmatprep.subr.bf16.mxu0 %v6710_v4  ;;  %v6744_v4 = vld [vmem:[%s7305_s25 + $0x7e8] ss:$72 sps:$4 sm:$0xff]  }
  0x78   : > { %3518 = vperm.xlu1 %6649, %v3515_v51   ;;  %v6705_v51 = vld [vmem:[%s7305_s25 + $0x480] ss:$72 sps:$4 sm:$0xff]  }
  0x79   : > { %2977 = vmatpush1.bf16.msra.mxu0 %v6708_v3  ;;  %v6741_v3 = vld [vmem:[%s7305_s25 + $0x7e0] ss:$72 sps:$4 sm:$0xff]  }
  0x7a   : > { %4309 = vperm.xlu0 %6648, %v6414_v25   ;;  %2978 = vmatprep.subr.bf16.mxu0 %v6716_v7  ;;  %v6747_v7 = vld [vmem:[%s7305_s25 + $0x870] ss:$72 sps:$4 sm:$0xff]  }
  0x7c   : > { %3581 = vperm.xlu1 %6649, %v3573_v54   ;;  %v6719_v54 = vld [vmem:[%s7305_s25 + $0x5a4] ss:$72 sps:$4 sm:$0xff]  }
  0x7d   : > { %2979 = vmatpush1.bf16.msra.mxu0 %v6714_v6  ;;  %v6752_v6 = vld [vmem:[%s7305_s25 + $0x87c] ss:$72 sps:$4 sm:$0xff]  }
  0x7e   : > { %4351 = vperm.xlu0 %6648, %v6418_v26   ;;  %2980 = vmatprep.subr.bf16.mxu0 %v6722_v10  ;;  %v6758_v10 = vld [vmem:[%s7305_s25 + $0x1c] ss:$72 sps:$4 sm:$0xff]  }
  0x80   : > { %4314 = vperm.xlu1 %6649, %v6415_v59   ;;  %v6729_v59 = vld [vmem:[%s7305_s25 + $0x6c0] ss:$72 sps:$4 sm:$0xff]  }
  0x81   : > { %2981 = vmatpush1.bf16.msra.mxu0 %v6720_v9  ;;  %v6755_v9 = vld [vmem:[%s7305_s25 + $0x14] ss:$72 sps:$4 sm:$0xff]  }
  0x82   : > { %4393 = vperm.xlu0 %6648, %v6422_v27   ;;  %2982 = vmatprep.subr.bf16.mxu0 %v6728_v13 }
  0x84   : > { %4356 = vperm.xlu1 %6649, %v6419_v62   ;;  %v6735_v62 = vld [vmem:[%s7305_s25 + $0x750] ss:$72 sps:$4 sm:$0xff]  }
  0x85   : > { %2983 = vmatpush1.bf16.msra.mxu0 %v6726_v12 }
  0x86   : > { %4435 = vperm.xlu0 %6648, %v6426_v28   ;;  %2984 = vmatprep.subr.bf16.mxu0 %v6734_v16 }
  0x88   : > { %4398 = vperm.xlu1 %6649, %v6423_v1   ;;  %v6746_v1 = vld [vmem:[%s7305_s25 + $0x7ec] ss:$72 sps:$4 sm:$0xff]  }
  0x89   : > { %2985 = vmatpush1.bf16.msra.mxu0 %v6732_v15 }
  0x8a   : > { %4294 = vperm.xlu0 %6648, %v4290_v29   ;;  %2986 = vmatprep.subr.bf16.mxu0 %v6740_v61  ;;  %v6795_v61 = vld [vmem:[%s7305_s25 + $0x400] ss:$72 sps:$4 sm:$0xff]  }
  0x8c   : > { %4440 = vperm.xlu1 %6649, %v6427_v5   ;;  %v6749_v5 = vld [vmem:[%s7305_s25 + $0x874] ss:$72 sps:$4 sm:$0xff]  }
  0x8d   : > { %2987 = vmatpush1.bf16.msra.mxu0 %v6738_v63  ;;  %v6803_v63 = vld [vmem:[%s7305_s25 + $0x494] ss:$72 sps:$4 sm:$0xff]  }
  0x8e   : > { %4334 = vperm.xlu0 %6648, %v6416_v30   ;;  %2988 = vmatprep.subr.bf16.mxu0 %v6746_v1  ;;  %v6801_v1 = vld [vmem:[%s7305_s25 + $0x490] ss:$72 sps:$4 sm:$0xff]  }
  0x90   : > { %4299 = vperm.xlu1 %6649, %v4291_v8   ;;  %v6750_v8 = vld [vmem:[%s7305_s25 + $0x878] ss:$72 sps:$4 sm:$0xff]  }
  0x91   : > { %2989 = vmatpush1.bf16.msra.mxu0 %v6744_v4  ;;  %v6809_v4 = vld [vmem:[%s7305_s25 + $0x524] ss:$72 sps:$4 sm:$0xff]  }
  0x92   : > { %4376 = vperm.xlu0 %6648, %v6420_v31   ;;  %2990 = vmatprep.subr.bf16.mxu0 %v6752_v6  ;;  %v6807_v6 = vld [vmem:[%s7305_s25 + $0x520] ss:$72 sps:$4 sm:$0xff]  }
  0x94   : > { %4339 = vperm.xlu1 %6649, %v6417_v11  }
  0x95   : > { %2991 = vmatpush1.bf16.msra.mxu0 %v6750_v8  ;;  %v6815_v8 = vld [vmem:[%s7305_s25 + $0x5b4] ss:$72 sps:$4 sm:$0xff]  }
  0x96   : > { %4418 = vperm.xlu0 %6648, %v6424_v32   ;;  %v6659_v32 = vld [vmem:[%s7305_s25 + $0x4] ss:$72 sps:$4 sm:$0xff]   ;;  %3046 = vmatprep.subr.bf16.mxu0 %v6758_v10  ;;  %v6813_v10 = vld [vmem:[%s7305_s25 + $0x5b0] ss:$72 sps:$4 sm:$0xff]  }
  0x98   : > { %4381 = vperm.xlu1 %6649, %v6421_v14  }
  0x9a   : > { %4460 = vperm.xlu0 %6648, %v6428_v33  }
  0x9c   : > { %4423 = vperm.xlu1 %6649, %v6425_v17  }
  0xa0   : > { %4465 = vperm.xlu1 %6649, %v6429_v18  }
  0xc5   : > { %v1025_v19 = vpop.permute.xlu0 %1024 }
  0xc9   : > { %v1113_v11 = vpop.permute.xlu0 %1112 }
  0xcb   : > { %v1118_v15 = vpop.permute.xlu1 %1117 }
 0x12b   : > { %v1093_v20 = vpop.f32.mrb[0].mxu0 }
 0x12c   : > { %v1094_v21 = vadd.f32 %v1093_v20, %v1025_v19  ;;  %v1095_v22 = vpop.f32.mrb[1].mxu0 }
 0x12d   : > { %v1096_v23 = vadd.f32 %v1095_v22, %v1025_v19  ;;  %v1097_v24 = vpop.f32.mrb[2].mxu0 }
 0x12e   : > { %v1100_v25 = vmax.f32 %v1094_v21, 0.0  ;;  %v1098_v26 = vpop.f32.mrb[3].mxu0 }
 0x12f   : > { %v1101_v27 = vmax.f32 %v1096_v23, 0.0 }
 0x130   : > { %v7532_v28 = vmin.f32 %v1100_v25, 6.0 }
 0x131   : > { %v7534_v29 = vmin.f32 %v1101_v27, 6.0 }
 0x132   : > { %v1106_v30 = vpack.c.bf16 %v7532_v28, %v7532_v28 }
 0x133   : > { %v1107_v31 = vpack.c.bf16 %v7534_v29, %v7534_v29 }
 0x134   : > { %v1131_v33 = vsel %vm1129_vm3, %v1106_v30, 0 }
 0x135   : > { %6024 = vmatprep.subr.msk.bf16.mxu1 %vm1129_vm3, %v1107_v31 }
 0x136   : > { %1137 = vmatpush1.bf16.msra.mxu1 %v1131_v33  ;;  %v6753_v33 = vld [vmem:[%s7305_s25 + $0x10] ss:$72 sps:$4 sm:$0xff]  }
 0x137   : > { %2917 = vmatprep.subr.bf16.mxu1 %v6659_v32 }
 0x139   : > { %6025 = vmatmul.mubr.msk.bf16.vlgmr.msra.gmra.mrb[0].mxu1 %vm1125_vm4, %v6656_v34  ;;  %v6756_v34 = vld [vmem:[%s7305_s25 + $0x18] ss:$72 sps:$4 sm:$0xff]  }
 0x13a   : > { %2918 = vmatpush1.bf16.msra.mxu1 %v6657_v35  ;;  %v6761_v35 = vld [vmem:[%s7305_s25 + $0xa4] ss:$72 sps:$4 sm:$0xff]  }
 0x13b   : > { %2919 = vmatprep.subr.bf16.mxu1 %v6665_v36  ;;  %v6764_v36 = vld [vmem:[%s7305_s25 + $0xac] ss:$72 sps:$4 sm:$0xff]  }
 0x13e   : > { %2920 = vmatpush1.bf16.msra.mxu1 %v6663_v37  ;;  %v6759_v37 = vld [vmem:[%s7305_s25 + $0xa0] ss:$72 sps:$4 sm:$0xff]  }
 0x13f   : > { %2921 = vmatprep.subr.bf16.mxu1 %v6671_v38  ;;  %v6762_v38 = vld [vmem:[%s7305_s25 + $0xa8] ss:$72 sps:$4 sm:$0xff]  }
 0x142   : > { %2922 = vmatpush1.bf16.msra.mxu1 %v6669_v39  ;;  %v6767_v39 = vld [vmem:[%s7305_s25 + $0x134] ss:$72 sps:$4 sm:$0xff]  }
 0x143   : > { %2923 = vmatprep.subr.bf16.mxu1 %v6677_v40  ;;  %v6770_v40 = vld [vmem:[%s7305_s25 + $0x13c] ss:$72 sps:$4 sm:$0xff]  }
 0x146   : > { %2924 = vmatpush1.bf16.msra.mxu1 %v6675_v41  ;;  %v6765_v41 = vld [vmem:[%s7305_s25 + $0x130] ss:$72 sps:$4 sm:$0xff]  }
 0x147   : > { %2925 = vmatprep.subr.bf16.mxu1 %v6683_v42  ;;  %v6768_v42 = vld [vmem:[%s7305_s25 + $0x138] ss:$72 sps:$4 sm:$0xff]  }
 0x14a   : > { %2926 = vmatpush1.bf16.msra.mxu1 %v6681_v43  ;;  %v6773_v43 = vld [vmem:[%s7305_s25 + $0x1c4] ss:$72 sps:$4 sm:$0xff]  }
 0x14b   : > { %2927 = vmatprep.subr.bf16.mxu1 %v6689_v44  ;;  %v6776_v44 = vld [vmem:[%s7305_s25 + $0x1cc] ss:$72 sps:$4 sm:$0xff]  }
 0x14e   : > { %2928 = vmatpush1.bf16.msra.mxu1 %v6687_v45  ;;  %v6771_v45 = vld [vmem:[%s7305_s25 + $0x1c0] ss:$72 sps:$4 sm:$0xff]  }
 0x14f   : > { %2929 = vmatprep.subr.bf16.mxu1 %v6695_v46  ;;  %v6774_v46 = vld [vmem:[%s7305_s25 + $0x1c8] ss:$72 sps:$4 sm:$0xff]  }
 0x152   : > { %2930 = vmatpush1.bf16.msra.mxu1 %v6693_v47  ;;  %v6779_v47 = vld [vmem:[%s7305_s25 + $0x254] ss:$72 sps:$4 sm:$0xff]  }
 0x153   : > { %2931 = vmatprep.subr.bf16.mxu1 %v6701_v48  ;;  %v6782_v48 = vld [vmem:[%s7305_s25 + $0x25c] ss:$72 sps:$4 sm:$0xff]  }
 0x156   : > { %2932 = vmatpush1.bf16.msra.mxu1 %v6699_v49  ;;  %v6777_v49 = vld [vmem:[%s7305_s25 + $0x250] ss:$72 sps:$4 sm:$0xff]  }
 0x157   : > { %2933 = vmatprep.subr.bf16.mxu1 %v6707_v50  ;;  %v6780_v50 = vld [vmem:[%s7305_s25 + $0x258] ss:$72 sps:$4 sm:$0xff]  }
 0x15a   : > { %2934 = vmatpush1.bf16.msra.mxu1 %v6705_v51  ;;  %v6785_v51 = vld [vmem:[%s7305_s25 + $0x2e4] ss:$72 sps:$4 sm:$0xff]  }
 0x15b   : > { %2935 = vmatprep.subr.bf16.mxu1 %v6713_v52  ;;  %v6788_v52 = vld [vmem:[%s7305_s25 + $0x2ec] ss:$72 sps:$4 sm:$0xff]  }
 0x15e   : > { %2936 = vmatpush1.bf16.msra.mxu1 %v6711_v53  ;;  %v6783_v53 = vld [vmem:[%s7305_s25 + $0x2e0] ss:$72 sps:$4 sm:$0xff]  }
 0x15f   : > { %2937 = vmatprep.subr.bf16.mxu1 %v6719_v54  ;;  %v6786_v54 = vld [vmem:[%s7305_s25 + $0x2e8] ss:$72 sps:$4 sm:$0xff]  }
 0x162   : > { %2938 = vmatpush1.bf16.msra.mxu1 %v6717_v55  ;;  %v6791_v55 = vld [vmem:[%s7305_s25 + $0x374] ss:$72 sps:$4 sm:$0xff]  }
 0x163   : > { %2939 = vmatprep.subr.bf16.mxu1 %v6725_v56  ;;  %v6794_v56 = vld [vmem:[%s7305_s25 + $0x37c] ss:$72 sps:$4 sm:$0xff]  }
 0x166   : > { %2940 = vmatpush1.bf16.msra.mxu1 %v6723_v57  ;;  %v6789_v57 = vld [vmem:[%s7305_s25 + $0x370] ss:$72 sps:$4 sm:$0xff]  }
 0x167   : > { %2941 = vmatprep.subr.bf16.mxu1 %v6731_v58  ;;  %v6792_v58 = vld [vmem:[%s7305_s25 + $0x378] ss:$72 sps:$4 sm:$0xff]  }
 0x16a   : > { %2942 = vmatpush1.bf16.msra.mxu1 %v6729_v59  ;;  %v6797_v59 = vld [vmem:[%s7305_s25 + $0x404] ss:$72 sps:$4 sm:$0xff]  }
 0x16b   : > { %2943 = vmatprep.subr.bf16.mxu1 %v6737_v60  ;;  %v6800_v60 = vld [vmem:[%s7305_s25 + $0x40c] ss:$72 sps:$4 sm:$0xff]  }
 0x16e   : > { %2944 = vmatpush1.bf16.msra.mxu1 %v6735_v62  ;;  %v6798_v62 = vld [vmem:[%s7305_s25 + $0x408] ss:$72 sps:$4 sm:$0xff]  }
 0x16f   : > { %2945 = vmatprep.subr.bf16.mxu1 %v6743_v0  ;;  %v6806_v0 = vld [vmem:[%s7305_s25 + $0x49c] ss:$72 sps:$4 sm:$0xff]  }
 0x172   : > { %2946 = vmatpush1.bf16.msra.mxu1 %v6741_v3  ;;  %v6804_v3 = vld [vmem:[%s7305_s25 + $0x498] ss:$72 sps:$4 sm:$0xff]  }
 0x173   : > { %2947 = vmatprep.subr.bf16.mxu1 %v6749_v5  ;;  %v6812_v5 = vld [vmem:[%s7305_s25 + $0x52c] ss:$72 sps:$4 sm:$0xff]  }
 0x176   : > { %2948 = vmatpush1.bf16.msra.mxu1 %v6747_v7  ;;  %v6810_v7 = vld [vmem:[%s7305_s25 + $0x528] ss:$72 sps:$4 sm:$0xff]  }
 0x177   : > { %3003 = vmatprep.subr.bf16.mxu1 %v6755_v9  ;;  %v6818_v9 = vld [vmem:[%s7305_s25 + $0x5bc] ss:$72 sps:$4 sm:$0xff]  }
 0x20c   : > { %v1170_v12 = vpop.f32.mrb[0].mxu1 }
 0x20d   : > { %v1171_v13 = vadd.f32 %v1170_v12, %v1113_v11  ;;  %v1172_v14 = vpop.f32.mrb[1].mxu1  ;;  %v6821_v12 = vld [vmem:[%s7305_s25 + $0x644] ss:$72 sps:$4 sm:$0xff]  }
 0x20e   : > { %v1173_v16 = vadd.f32 %v1172_v14, %v1113_v11  ;;  %v1174_v17 = vpop.f32.mrb[2].mxu1  ;;  %v6816_v11 = vld [vmem:[%s7305_s25 + $0x5b8] ss:$72 sps:$4 sm:$0xff]  }
 0x20f   : > { %v1179_v18 = vmax.f32 %v1171_v13, 0.0  ;;  %v1175_v19 = vadd.f32 %v1174_v17, %v1118_v15  ;;  %v1176_v20 = vpop.f32.mrb[3].mxu1  ;;  %v6824_v13 = vld [vmem:[%s7305_s25 + $0x64c] ss:$72 sps:$4 sm:$0xff]   ;;  %v6819_v14 = vld [vmem:[%s7305_s25 + $0x640] ss:$72 sps:$4 sm:$0xff]  }
 0x210   : > { %v1180_v21 = vmax.f32 %v1173_v16, 0.0  ;;  %v1177_v22 = vadd.f32 %v1176_v20, %v1118_v15  ;;  %v6822_v15 = vld [vmem:[%s7305_s25 + $0x648] ss:$72 sps:$4 sm:$0xff]   ;;  %v6827_v16 = vld [vmem:[%s7305_s25 + $0x6d4] ss:$72 sps:$4 sm:$0xff]  }
 0x211   : > { %v1181_v23 = vmax.f32 %v1175_v19, 0.0  ;;  %v1183_v25 = vmin.f32 %v1179_v18, 6.0  ;;  %v6830_v17 = vld [vmem:[%s7305_s25 + $0x6dc] ss:$72 sps:$4 sm:$0xff]   ;;  %v6825_v18 = vld [vmem:[%s7305_s25 + $0x6d0] ss:$72 sps:$4 sm:$0xff]  }
 0x212   : > { %v1182_v24 = vmax.f32 %v1177_v22, 0.0  ;;  %v1184_v27 = vmin.f32 %v1180_v21, 6.0  ;;  %v6828_v19 = vld [vmem:[%s7305_s25 + $0x6d8] ss:$72 sps:$4 sm:$0xff]   ;;  %v6833_v20 = vld [vmem:[%s7305_s25 + $0x764] ss:$72 sps:$4 sm:$0xff]  }
 0x213   : > { %v1185_v26 = vmin.f32 %v1181_v23, 6.0  ;;  %v6836_v21 = vld [vmem:[%s7305_s25 + $0x76c] ss:$72 sps:$4 sm:$0xff]   ;;  %v6831_v22 = vld [vmem:[%s7305_s25 + $0x760] ss:$72 sps:$4 sm:$0xff]  }
 0x214   : > { %v1186_v30 = vmin.f32 %v1182_v24, 6.0  ;;  %v6834_v23 = vld [vmem:[%s7305_s25 + $0x768] ss:$72 sps:$4 sm:$0xff]   ;;  %v6839_v24 = vld [vmem:[%s7305_s25 + $0x7f4] ss:$72 sps:$4 sm:$0xff]  }
 0x215   : > { %v7584_v31 = vpack.c.bf16 %v1185_v26, %v1183_v25  ;;  %v6842_v25 = vld [vmem:[%s7305_s25 + $0x7fc] ss:$72 sps:$4 sm:$0xff]   ;;  %v6837_v26 = vld [vmem:[%s7305_s25 + $0x7f0] ss:$72 sps:$4 sm:$0xff]  }
 0x216   : > { %v7586_v32 = vpack.c.bf16 %v1186_v30, %v1184_v27  ;;  %v6840_v27 = vld [vmem:[%s7305_s25 + $0x7f8] ss:$72 sps:$4 sm:$0xff]   ;;  %v6845_v30 = vld [vmem:[%s7305_s25 + $0x884] ss:$72 sps:$4 sm:$0xff]  }
 0x218   : > { %2949 = vmatprep.mubr.bf16.mxu1 %v7586_v32  ;;  %2992 = vmatprep.mubr.bf16.mxu0 %v7586_v32 }
 0x219   : > { %2950 = vmatmul.mubr.bf16.vlgmr.msra.gmra.mrb[4].mxu1 %v7584_v31  ;;  %2993 = vmatmul.mubr.bf16.vlgmr.msra.gmra.mrb[4].mxu0 %v7584_v31 }
 0x21a   : > { %3004 = vmatpush1.bf16.msra.mxu1 %v6753_v33  ;;  %3047 = vmatpush1.bf16.msra.mxu0 %v6756_v34  ;;  %v6848_v33 = vld [vmem:[%s7305_s25 + $0x88c] ss:$72 sps:$4 sm:$0xff]   ;;  %v6843_v34 = vld [vmem:[%s7305_s25 + $0x880] ss:$72 sps:$4 sm:$0xff]  }
 0x21b   : > { %3035 = vmatprep.mubr.bf16.mxu1 %v7586_v32  ;;  %3078 = vmatprep.mubr.bf16.mxu0 %v7586_v32 }
 0x21c   : > { %3005 = vmatprep.subr.bf16.mxu1 %v6761_v35  ;;  %3048 = vmatprep.subr.bf16.mxu0 %v6764_v36  ;;  %v6846_v35 = vld [vmem:[%s7305_s25 + $0x888] ss:$72 sps:$4 sm:$0xff]   ;;  %v6851_v36 = vld [vmem:[%s7305_s25 + $0x24] ss:$72 sps:$4 sm:$0xff]  }
 0x21e   : > { %3006 = vmatpush1.bf16.msra.mxu1 %v6759_v37  ;;  %3049 = vmatpush1.bf16.msra.mxu0 %v6762_v38  ;;  %v6854_v37 = vld [vmem:[%s7305_s25 + $0x2c] ss:$72 sps:$4 sm:$0xff]   ;;  %v6849_v38 = vld [vmem:[%s7305_s25 + $0x20] ss:$72 sps:$4 sm:$0xff]  }
 0x21f   : > { %3007 = vmatprep.subr.bf16.mxu1 %v6767_v39  ;;  %3050 = vmatprep.subr.bf16.mxu0 %v6770_v40  ;;  %v6852_v39 = vld [vmem:[%s7305_s25 + $0x28] ss:$72 sps:$4 sm:$0xff]   ;;  %v6857_v40 = vld [vmem:[%s7305_s25 + $0xb4] ss:$72 sps:$4 sm:$0xff]  }
 0x222   : > { %3008 = vmatpush1.bf16.msra.mxu1 %v6765_v41  ;;  %3051 = vmatpush1.bf16.msra.mxu0 %v6768_v42  ;;  %v6860_v41 = vld [vmem:[%s7305_s25 + $0xbc] ss:$72 sps:$4 sm:$0xff]   ;;  %v6855_v42 = vld [vmem:[%s7305_s25 + $0xb0] ss:$72 sps:$4 sm:$0xff]  }
 0x223   : > { %3009 = vmatprep.subr.bf16.mxu1 %v6773_v43  ;;  %3052 = vmatprep.subr.bf16.mxu0 %v6776_v44  ;;  %v6858_v43 = vld [vmem:[%s7305_s25 + $0xb8] ss:$72 sps:$4 sm:$0xff]   ;;  %v6863_v44 = vld [vmem:[%s7305_s25 + $0x144] ss:$72 sps:$4 sm:$0xff]  }
 0x226   : > { %3010 = vmatpush1.bf16.msra.mxu1 %v6771_v45  ;;  %3053 = vmatpush1.bf16.msra.mxu0 %v6774_v46  ;;  %v6866_v45 = vld [vmem:[%s7305_s25 + $0x14c] ss:$72 sps:$4 sm:$0xff]   ;;  %v6861_v46 = vld [vmem:[%s7305_s25 + $0x140] ss:$72 sps:$4 sm:$0xff]  }
 0x227   : > { %3011 = vmatprep.subr.bf16.mxu1 %v6779_v47  ;;  %3054 = vmatprep.subr.bf16.mxu0 %v6782_v48  ;;  %v6864_v47 = vld [vmem:[%s7305_s25 + $0x148] ss:$72 sps:$4 sm:$0xff]   ;;  %v6869_v48 = vld [vmem:[%s7305_s25 + $0x1d4] ss:$72 sps:$4 sm:$0xff]  }
 0x22a   : > { %3012 = vmatpush1.bf16.msra.mxu1 %v6777_v49  ;;  %3055 = vmatpush1.bf16.msra.mxu0 %v6780_v50  ;;  %v6872_v49 = vld [vmem:[%s7305_s25 + $0x1dc] ss:$72 sps:$4 sm:$0xff]   ;;  %v6867_v50 = vld [vmem:[%s7305_s25 + $0x1d0] ss:$72 sps:$4 sm:$0xff]  }
 0x22b   : > { %3013 = vmatprep.subr.bf16.mxu1 %v6785_v51  ;;  %3056 = vmatprep.subr.bf16.mxu0 %v6788_v52  ;;  %v6870_v51 = vld [vmem:[%s7305_s25 + $0x1d8] ss:$72 sps:$4 sm:$0xff]   ;;  %v6875_v52 = vld [vmem:[%s7305_s25 + $0x264] ss:$72 sps:$4 sm:$0xff]  }
 0x22e   : > { %3014 = vmatpush1.bf16.msra.mxu1 %v6783_v53  ;;  %3057 = vmatpush1.bf16.msra.mxu0 %v6786_v54  ;;  %v6878_v53 = vld [vmem:[%s7305_s25 + $0x26c] ss:$72 sps:$4 sm:$0xff]   ;;  %v6873_v54 = vld [vmem:[%s7305_s25 + $0x260] ss:$72 sps:$4 sm:$0xff]  }
 0x22f   : > { %3015 = vmatprep.subr.bf16.mxu1 %v6791_v55  ;;  %3058 = vmatprep.subr.bf16.mxu0 %v6794_v56  ;;  %v6876_v55 = vld [vmem:[%s7305_s25 + $0x268] ss:$72 sps:$4 sm:$0xff]   ;;  %v6881_v56 = vld [vmem:[%s7305_s25 + $0x2f4] ss:$72 sps:$4 sm:$0xff]  }
 0x232   : > { %3016 = vmatpush1.bf16.msra.mxu1 %v6789_v57  ;;  %3059 = vmatpush1.bf16.msra.mxu0 %v6792_v58  ;;  %v6884_v57 = vld [vmem:[%s7305_s25 + $0x2fc] ss:$72 sps:$4 sm:$0xff]   ;;  %v6879_v58 = vld [vmem:[%s7305_s25 + $0x2f0] ss:$72 sps:$4 sm:$0xff]  }
 0x233   : > { %3017 = vmatprep.subr.bf16.mxu1 %v6797_v59  ;;  %3060 = vmatprep.subr.bf16.mxu0 %v6800_v60  ;;  %v6882_v59 = vld [vmem:[%s7305_s25 + $0x2f8] ss:$72 sps:$4 sm:$0xff]   ;;  %v6887_v60 = vld [vmem:[%s7305_s25 + $0x384] ss:$72 sps:$4 sm:$0xff]  }
 0x236   : > { %3018 = vmatpush1.bf16.msra.mxu1 %v6795_v61  ;;  %3061 = vmatpush1.bf16.msra.mxu0 %v6798_v62  ;;  %v6890_v61 = vld [vmem:[%s7305_s25 + $0x38c] ss:$72 sps:$4 sm:$0xff]   ;;  %v6885_v62 = vld [vmem:[%s7305_s25 + $0x380] ss:$72 sps:$4 sm:$0xff]  }
 0x237   : > { %3019 = vmatprep.subr.bf16.mxu1 %v6803_v63  ;;  %3062 = vmatprep.subr.bf16.mxu0 %v6806_v0  ;;  %v6888_v63 = vld [vmem:[%s7305_s25 + $0x388] ss:$72 sps:$4 sm:$0xff]   ;;  %v6893_v0 = vld [vmem:[%s7305_s25 + $0x414] ss:$72 sps:$4 sm:$0xff]  }
 0x23a   : > { %3020 = vmatpush1.bf16.msra.mxu1 %v6801_v1  ;;  %3063 = vmatpush1.bf16.msra.mxu0 %v6804_v3  ;;  %v6896_v1 = vld [vmem:[%s7305_s25 + $0x41c] ss:$72 sps:$4 sm:$0xff]   ;;  %v6891_v3 = vld [vmem:[%s7305_s25 + $0x410] ss:$72 sps:$4 sm:$0xff]  }
 0x23b   : > { %3021 = vmatprep.subr.bf16.mxu1 %v6809_v4  ;;  %3064 = vmatprep.subr.bf16.mxu0 %v6812_v5  ;;  %v6894_v4 = vld [vmem:[%s7305_s25 + $0x418] ss:$72 sps:$4 sm:$0xff]   ;;  %v6899_v5 = vld [vmem:[%s7305_s25 + $0x4a4] ss:$72 sps:$4 sm:$0xff]  }
 0x23e   : > { %3022 = vmatpush1.bf16.msra.mxu1 %v6807_v6  ;;  %3065 = vmatpush1.bf16.msra.mxu0 %v6810_v7  ;;  %v6902_v6 = vld [vmem:[%s7305_s25 + $0x4ac] ss:$72 sps:$4 sm:$0xff]   ;;  %v6897_v7 = vld [vmem:[%s7305_s25 + $0x4a0] ss:$72 sps:$4 sm:$0xff]  }
 0x23f   : > { %3023 = vmatprep.subr.bf16.mxu1 %v6815_v8  ;;  %3066 = vmatprep.subr.bf16.mxu0 %v6818_v9  ;;  %v6900_v8 = vld [vmem:[%s7305_s25 + $0x4a8] ss:$72 sps:$4 sm:$0xff]   ;;  %v6905_v9 = vld [vmem:[%s7305_s25 + $0x534] ss:$72 sps:$4 sm:$0xff]  }
 0x242   : > { %3024 = vmatpush1.bf16.msra.mxu1 %v6813_v10  ;;  %3067 = vmatpush1.bf16.msra.mxu0 %v6816_v11  ;;  %v6908_v10 = vld [vmem:[%s7305_s25 + $0x53c] ss:$72 sps:$4 sm:$0xff]   ;;  %v6903_v11 = vld [vmem:[%s7305_s25 + $0x530] ss:$72 sps:$4 sm:$0xff]  }
 0x243   : > { %3025 = vmatprep.subr.bf16.mxu1 %v6821_v12  ;;  %3068 = vmatprep.subr.bf16.mxu0 %v6824_v13  ;;  %v6906_v12 = vld [vmem:[%s7305_s25 + $0x538] ss:$72 sps:$4 sm:$0xff]   ;;  %v6911_v13 = vld [vmem:[%s7305_s25 + $0x5c4] ss:$72 sps:$4 sm:$0xff]  }
 0x246   : > { %3026 = vmatpush1.bf16.msra.mxu1 %v6819_v14  ;;  %3069 = vmatpush1.bf16.msra.mxu0 %v6822_v15  ;;  %v6914_v14 = vld [vmem:[%s7305_s25 + $0x5cc] ss:$72 sps:$4 sm:$0xff]   ;;  %v6909_v15 = vld [vmem:[%s7305_s25 + $0x5c0] ss:$72 sps:$4 sm:$0xff]  }
 0x247   : > { %3027 = vmatprep.subr.bf16.mxu1 %v6827_v16  ;;  %3070 = vmatprep.subr.bf16.mxu0 %v6830_v17  ;;  %v6912_v16 = vld [vmem:[%s7305_s25 + $0x5c8] ss:$72 sps:$4 sm:$0xff]   ;;  %v6917_v17 = vld [vmem:[%s7305_s25 + $0x654] ss:$72 sps:$4 sm:$0xff]  }
 0x24a   : > { %3028 = vmatpush1.bf16.msra.mxu1 %v6825_v18  ;;  %3071 = vmatpush1.bf16.msra.mxu0 %v6828_v19  ;;  %v6920_v18 = vld [vmem:[%s7305_s25 + $0x65c] ss:$72 sps:$4 sm:$0xff]   ;;  %v6915_v19 = vld [vmem:[%s7305_s25 + $0x650] ss:$72 sps:$4 sm:$0xff]  }
 0x24b   : > { %3029 = vmatprep.subr.bf16.mxu1 %v6833_v20  ;;  %3072 = vmatprep.subr.bf16.mxu0 %v6836_v21  ;;  %v6918_v20 = vld [vmem:[%s7305_s25 + $0x658] ss:$72 sps:$4 sm:$0xff]   ;;  %v6923_v21 = vld [vmem:[%s7305_s25 + $0x6e4] ss:$72 sps:$4 sm:$0xff]  }
 0x24e   : > { %3030 = vmatpush1.bf16.msra.mxu1 %v6831_v22  ;;  %3073 = vmatpush1.bf16.msra.mxu0 %v6834_v23  ;;  %v6926_v22 = vld [vmem:[%s7305_s25 + $0x6ec] ss:$72 sps:$4 sm:$0xff]   ;;  %v6921_v23 = vld [vmem:[%s7305_s25 + $0x6e0] ss:$72 sps:$4 sm:$0xff]  }
 0x24f   : > { %3031 = vmatprep.subr.bf16.mxu1 %v6839_v24  ;;  %3074 = vmatprep.subr.bf16.mxu0 %v6842_v25  ;;  %v6924_v24 = vld [vmem:[%s7305_s25 + $0x6e8] ss:$72 sps:$4 sm:$0xff]   ;;  %v6929_v25 = vld [vmem:[%s7305_s25 + $0x774] ss:$72 sps:$4 sm:$0xff]  }
 0x252   : > { %3032 = vmatpush1.bf16.msra.mxu1 %v6837_v26  ;;  %3075 = vmatpush1.bf16.msra.mxu0 %v6840_v27  ;;  %v6932_v26 = vld [vmem:[%s7305_s25 + $0x77c] ss:$72 sps:$4 sm:$0xff]   ;;  %v6927_v27 = vld [vmem:[%s7305_s25 + $0x770] ss:$72 sps:$4 sm:$0xff]  }
 0x253   : > { %3033 = vmatprep.subr.bf16.mxu1 %v6845_v30  ;;  %3076 = vmatprep.subr.bf16.mxu0 %v6848_v33  ;;  %v6930_v30 = vld [vmem:[%s7305_s25 + $0x778] ss:$72 sps:$4 sm:$0xff]   ;;  %v6935_v33 = vld [vmem:[%s7305_s25 + $0x804] ss:$72 sps:$4 sm:$0xff]  }
 0x256   : > { %3034 = vmatpush1.bf16.msra.mxu1 %v6843_v34  ;;  %3077 = vmatpush1.bf16.msra.mxu0 %v6846_v35  ;;  %v6938_v34 = vld [vmem:[%s7305_s25 + $0x80c] ss:$72 sps:$4 sm:$0xff]   ;;  %v6933_v35 = vld [vmem:[%s7305_s25 + $0x800] ss:$72 sps:$4 sm:$0xff]  }
 0x257   : > { %3089 = vmatprep.subr.bf16.mxu1 %v6851_v36  ;;  %3132 = vmatprep.subr.bf16.mxu0 %v6854_v37  ;;  %v6936_v36 = vld [vmem:[%s7305_s25 + $0x808] ss:$72 sps:$4 sm:$0xff]   ;;  %v6941_v37 = vld [vmem:[%s7305_s25 + $0x894] ss:$72 sps:$4 sm:$0xff]  }
 0x259   : > { %3036 = vmatmul.mubr.bf16.vlgmr.msra.gmra.mrb[8].mxu1 %v7584_v31  ;;  %3079 = vmatmul.mubr.bf16.vlgmr.msra.gmra.mrb[8].mxu0 %v7584_v31 }
 0x25a   : > { %3090 = vmatpush1.bf16.msra.mxu1 %v6849_v38  ;;  %3121 = vmatprep.mubr.bf16.mxu1 %v7586_v32  ;;  %v6944_v38 = vld [vmem:[%s7305_s25 + $0x89c] ss:$72 sps:$4 sm:$0xff]  }
 0x25b   : > { %3133 = vmatpush1.bf16.msra.mxu0 %v6852_v39  ;;  %3164 = vmatprep.mubr.bf16.mxu0 %v7586_v32  ;;  %v6939_v39 = vld [vmem:[%s7305_s25 + $0x890] ss:$72 sps:$4 sm:$0xff]  }
 0x25c   : > { %3091 = vmatprep.subr.bf16.mxu1 %v6857_v40  ;;  %3134 = vmatprep.subr.bf16.mxu0 %v6860_v41  ;;  %v6942_v40 = vld [vmem:[%s7305_s25 + $0x898] ss:$72 sps:$4 sm:$0xff]   ;;  %v6947_v41 = vld [vmem:[%s7305_s25 + $0x34] ss:$72 sps:$4 sm:$0xff]  }
 0x25e   : > { %3092 = vmatpush1.bf16.msra.mxu1 %v6855_v42  ;;  %v6950_v42 = vld [vmem:[%s7305_s25 + $0x3c] ss:$72 sps:$4 sm:$0xff]  }
 0x25f   : > { %3135 = vmatpush1.bf16.msra.mxu0 %v6858_v43  ;;  %3093 = vmatprep.subr.bf16.mxu1 %v6863_v44  ;;  %v6945_v43 = vld [vmem:[%s7305_s25 + $0x30] ss:$72 sps:$4 sm:$0xff]  }
 0x260   : > { %3136 = vmatprep.subr.bf16.mxu0 %v6866_v45  ;;  %v6948_v44 = vld [vmem:[%s7305_s25 + $0x38] ss:$72 sps:$4 sm:$0xff]   ;;  %v6953_v45 = vld [vmem:[%s7305_s25 + $0xc4] ss:$72 sps:$4 sm:$0xff]  }
 0x262   : > { %3094 = vmatpush1.bf16.msra.mxu1 %v6861_v46  ;;  %v6956_v46 = vld [vmem:[%s7305_s25 + $0xcc] ss:$72 sps:$4 sm:$0xff]  }
 0x263   : > { %3137 = vmatpush1.bf16.msra.mxu0 %v6864_v47  ;;  %3095 = vmatprep.subr.bf16.mxu1 %v6869_v48  ;;  %v6951_v47 = vld [vmem:[%s7305_s25 + $0xc0] ss:$72 sps:$4 sm:$0xff]  }
 0x264   : > { %3138 = vmatprep.subr.bf16.mxu0 %v6872_v49  ;;  %v6954_v48 = vld [vmem:[%s7305_s25 + $0xc8] ss:$72 sps:$4 sm:$0xff]   ;;  %v6959_v49 = vld [vmem:[%s7305_s25 + $0x154] ss:$72 sps:$4 sm:$0xff]  }
 0x266   : > { %3096 = vmatpush1.bf16.msra.mxu1 %v6867_v50  ;;  %v6962_v50 = vld [vmem:[%s7305_s25 + $0x15c] ss:$72 sps:$4 sm:$0xff]  }
 0x267   : > { %3139 = vmatpush1.bf16.msra.mxu0 %v6870_v51  ;;  %3097 = vmatprep.subr.bf16.mxu1 %v6875_v52  ;;  %v6957_v51 = vld [vmem:[%s7305_s25 + $0x150] ss:$72 sps:$4 sm:$0xff]  }
 0x268   : > { %3140 = vmatprep.subr.bf16.mxu0 %v6878_v53  ;;  %v6960_v52 = vld [vmem:[%s7305_s25 + $0x158] ss:$72 sps:$4 sm:$0xff]   ;;  %v6965_v53 = vld [vmem:[%s7305_s25 + $0x1e4] ss:$72 sps:$4 sm:$0xff]  }
 0x26a   : > { %3098 = vmatpush1.bf16.msra.mxu1 %v6873_v54  ;;  %v6968_v54 = vld [vmem:[%s7305_s25 + $0x1ec] ss:$72 sps:$4 sm:$0xff]  }
 0x26b   : > { %3141 = vmatpush1.bf16.msra.mxu0 %v6876_v55  ;;  %3099 = vmatprep.subr.bf16.mxu1 %v6881_v56  ;;  %v6963_v55 = vld [vmem:[%s7305_s25 + $0x1e0] ss:$72 sps:$4 sm:$0xff]  }
 0x26c   : > { %3142 = vmatprep.subr.bf16.mxu0 %v6884_v57  ;;  %v6966_v56 = vld [vmem:[%s7305_s25 + $0x1e8] ss:$72 sps:$4 sm:$0xff]   ;;  %v6971_v57 = vld [vmem:[%s7305_s25 + $0x274] ss:$72 sps:$4 sm:$0xff]  }
 0x26e   : > { %3100 = vmatpush1.bf16.msra.mxu1 %v6879_v58  ;;  %v6974_v58 = vld [vmem:[%s7305_s25 + $0x27c] ss:$72 sps:$4 sm:$0xff]  }
 0x26f   : > { %3143 = vmatpush1.bf16.msra.mxu0 %v6882_v59  ;;  %3101 = vmatprep.subr.bf16.mxu1 %v6887_v60  ;;  %v6969_v59 = vld [vmem:[%s7305_s25 + $0x270] ss:$72 sps:$4 sm:$0xff]  }
 0x270   : > { %3144 = vmatprep.subr.bf16.mxu0 %v6890_v61  ;;  %v6972_v60 = vld [vmem:[%s7305_s25 + $0x278] ss:$72 sps:$4 sm:$0xff]   ;;  %v6977_v61 = vld [vmem:[%s7305_s25 + $0x304] ss:$72 sps:$4 sm:$0xff]  }
 0x272   : > { %3102 = vmatpush1.bf16.msra.mxu1 %v6885_v62  ;;  %v6980_v62 = vld [vmem:[%s7305_s25 + $0x30c] ss:$72 sps:$4 sm:$0xff]  }
 0x273   : > { %3145 = vmatpush1.bf16.msra.mxu0 %v6888_v63  ;;  %3103 = vmatprep.subr.bf16.mxu1 %v6893_v0  ;;  %v6975_v63 = vld [vmem:[%s7305_s25 + $0x300] ss:$72 sps:$4 sm:$0xff]  }
 0x274   : > { %3146 = vmatprep.subr.bf16.mxu0 %v6896_v1  ;;  %v6978_v0 = vld [vmem:[%s7305_s25 + $0x308] ss:$72 sps:$4 sm:$0xff]   ;;  %v6983_v1 = vld [vmem:[%s7305_s25 + $0x394] ss:$72 sps:$4 sm:$0xff]  }
 0x276   : > { %3104 = vmatpush1.bf16.msra.mxu1 %v6891_v3  ;;  %v6986_v3 = vld [vmem:[%s7305_s25 + $0x39c] ss:$72 sps:$4 sm:$0xff]  }
 0x277   : > { %3147 = vmatpush1.bf16.msra.mxu0 %v6894_v4  ;;  %3105 = vmatprep.subr.bf16.mxu1 %v6899_v5  ;;  %v6981_v4 = vld [vmem:[%s7305_s25 + $0x390] ss:$72 sps:$4 sm:$0xff]  }
 0x278   : > { %3148 = vmatprep.subr.bf16.mxu0 %v6902_v6  ;;  %v6984_v5 = vld [vmem:[%s7305_s25 + $0x398] ss:$72 sps:$4 sm:$0xff]   ;;  %v6989_v6 = vld [vmem:[%s7305_s25 + $0x424] ss:$72 sps:$4 sm:$0xff]  }
 0x27a   : > { %3106 = vmatpush1.bf16.msra.mxu1 %v6897_v7  ;;  %v6992_v7 = vld [vmem:[%s7305_s25 + $0x42c] ss:$72 sps:$4 sm:$0xff]  }
 0x27b   : > { %3149 = vmatpush1.bf16.msra.mxu0 %v6900_v8  ;;  %3107 = vmatprep.subr.bf16.mxu1 %v6905_v9  ;;  %v6987_v8 = vld [vmem:[%s7305_s25 + $0x420] ss:$72 sps:$4 sm:$0xff]  }
 0x27c   : > { %3150 = vmatprep.subr.bf16.mxu0 %v6908_v10  ;;  %v6990_v9 = vld [vmem:[%s7305_s25 + $0x428] ss:$72 sps:$4 sm:$0xff]   ;;  %v6995_v10 = vld [vmem:[%s7305_s25 + $0x4b4] ss:$72 sps:$4 sm:$0xff]  }
 0x27e   : > { %3108 = vmatpush1.bf16.msra.mxu1 %v6903_v11  ;;  %v6998_v11 = vld [vmem:[%s7305_s25 + $0x4bc] ss:$72 sps:$4 sm:$0xff]  }
 0x27f   : > { %3151 = vmatpush1.bf16.msra.mxu0 %v6906_v12  ;;  %3109 = vmatprep.subr.bf16.mxu1 %v6911_v13  ;;  %v6993_v12 = vld [vmem:[%s7305_s25 + $0x4b0] ss:$72 sps:$4 sm:$0xff]  }
 0x280   : > { %3152 = vmatprep.subr.bf16.mxu0 %v6914_v14  ;;  %v6996_v13 = vld [vmem:[%s7305_s25 + $0x4b8] ss:$72 sps:$4 sm:$0xff]   ;;  %v7001_v14 = vld [vmem:[%s7305_s25 + $0x544] ss:$72 sps:$4 sm:$0xff]  }
 0x282   : > { %3110 = vmatpush1.bf16.msra.mxu1 %v6909_v15  ;;  %v7004_v15 = vld [vmem:[%s7305_s25 + $0x54c] ss:$72 sps:$4 sm:$0xff]  }
 0x283   : > { %3153 = vmatpush1.bf16.msra.mxu0 %v6912_v16  ;;  %3111 = vmatprep.subr.bf16.mxu1 %v6917_v17  ;;  %v6999_v16 = vld [vmem:[%s7305_s25 + $0x540] ss:$72 sps:$4 sm:$0xff]  }
 0x284   : > { %3154 = vmatprep.subr.bf16.mxu0 %v6920_v18  ;;  %v7002_v17 = vld [vmem:[%s7305_s25 + $0x548] ss:$72 sps:$4 sm:$0xff]   ;;  %v7007_v18 = vld [vmem:[%s7305_s25 + $0x5d4] ss:$72 sps:$4 sm:$0xff]  }
 0x286   : > { %3112 = vmatpush1.bf16.msra.mxu1 %v6915_v19  ;;  %v7010_v19 = vld [vmem:[%s7305_s25 + $0x5dc] ss:$72 sps:$4 sm:$0xff]  }
 0x287   : > { %3155 = vmatpush1.bf16.msra.mxu0 %v6918_v20  ;;  %3113 = vmatprep.subr.bf16.mxu1 %v6923_v21  ;;  %v7005_v20 = vld [vmem:[%s7305_s25 + $0x5d0] ss:$72 sps:$4 sm:$0xff]  }
 0x288   : > { %3156 = vmatprep.subr.bf16.mxu0 %v6926_v22  ;;  %v7008_v21 = vld [vmem:[%s7305_s25 + $0x5d8] ss:$72 sps:$4 sm:$0xff]   ;;  %v7013_v22 = vld [vmem:[%s7305_s25 + $0x664] ss:$72 sps:$4 sm:$0xff]  }
 0x28a   : > { %3114 = vmatpush1.bf16.msra.mxu1 %v6921_v23  ;;  %v7016_v23 = vld [vmem:[%s7305_s25 + $0x66c] ss:$72 sps:$4 sm:$0xff]  }
 0x28b   : > { %3157 = vmatpush1.bf16.msra.mxu0 %v6924_v24  ;;  %3115 = vmatprep.subr.bf16.mxu1 %v6929_v25  ;;  %v7011_v24 = vld [vmem:[%s7305_s25 + $0x660] ss:$72 sps:$4 sm:$0xff]  }
 0x28c   : > { %3158 = vmatprep.subr.bf16.mxu0 %v6932_v26  ;;  %v7014_v25 = vld [vmem:[%s7305_s25 + $0x668] ss:$72 sps:$4 sm:$0xff]   ;;  %v7019_v26 = vld [vmem:[%s7305_s25 + $0x6f4] ss:$72 sps:$4 sm:$0xff]  }
 0x28e   : > { %3116 = vmatpush1.bf16.msra.mxu1 %v6927_v27  ;;  %v7022_v27 = vld [vmem:[%s7305_s25 + $0x6fc] ss:$72 sps:$4 sm:$0xff]  }
 0x28f   : > { %3159 = vmatpush1.bf16.msra.mxu0 %v6930_v30  ;;  %3117 = vmatprep.subr.bf16.mxu1 %v6935_v33  ;;  %v7017_v30 = vld [vmem:[%s7305_s25 + $0x6f0] ss:$72 sps:$4 sm:$0xff]  }
 0x290   : > { %3160 = vmatprep.subr.bf16.mxu0 %v6938_v34  ;;  %v7020_v33 = vld [vmem:[%s7305_s25 + $0x6f8] ss:$72 sps:$4 sm:$0xff]   ;;  %v7025_v34 = vld [vmem:[%s7305_s25 + $0x784] ss:$72 sps:$4 sm:$0xff]  }
 0x292   : > { %3118 = vmatpush1.bf16.msra.mxu1 %v6933_v35  ;;  %v7028_v35 = vld [vmem:[%s7305_s25 + $0x78c] ss:$72 sps:$4 sm:$0xff]  }
 0x293   : > { %3161 = vmatpush1.bf16.msra.mxu0 %v6936_v36  ;;  %3119 = vmatprep.subr.bf16.mxu1 %v6941_v37  ;;  %v7023_v36 = vld [vmem:[%s7305_s25 + $0x780] ss:$72 sps:$4 sm:$0xff]  }
 0x294   : > { %3162 = vmatprep.subr.bf16.mxu0 %v6944_v38  ;;  %v7026_v37 = vld [vmem:[%s7305_s25 + $0x788] ss:$72 sps:$4 sm:$0xff]   ;;  %v7031_v38 = vld [vmem:[%s7305_s25 + $0x814] ss:$72 sps:$4 sm:$0xff]  }
 0x296   : > { %3120 = vmatpush1.bf16.msra.mxu1 %v6939_v39  ;;  %v7034_v39 = vld [vmem:[%s7305_s25 + $0x81c] ss:$72 sps:$4 sm:$0xff]  }
 0x297   : > { %3163 = vmatpush1.bf16.msra.mxu0 %v6942_v40  ;;  %3175 = vmatprep.subr.bf16.mxu1 %v6947_v41  ;;  %v7029_v40 = vld [vmem:[%s7305_s25 + $0x810] ss:$72 sps:$4 sm:$0xff]  }
 0x298   : > { %3218 = vmatprep.subr.bf16.mxu0 %v6950_v42  ;;  %v7032_v41 = vld [vmem:[%s7305_s25 + $0x818] ss:$72 sps:$4 sm:$0xff]   ;;  %v7037_v42 = vld [vmem:[%s7305_s25 + $0x8a4] ss:$72 sps:$4 sm:$0xff]  }
 0x299   : > { %3122 = vmatmul.mubr.bf16.vlgmr.msra.gmra.mrb[12].mxu1 %v7584_v31 }
 0x29a   : > { %3165 = vmatmul.mubr.bf16.vlgmr.msra.gmra.mrb[12].mxu0 %v7584_v31  ;;  %3176 = vmatpush1.bf16.msra.mxu1 %v6945_v43  ;;  %v7040_v43 = vld [vmem:[%s7305_s25 + $0x8ac] ss:$72 sps:$4 sm:$0xff]  }
 0x29b   : > { %3207 = vmatprep.mubr.bf16.mxu1 %v7586_v32  ;;  %3219 = vmatpush1.bf16.msra.mxu0 %v6948_v44  ;;  %v7035_v44 = vld [vmem:[%s7305_s25 + $0x8a0] ss:$72 sps:$4 sm:$0xff]  }
 0x29c   : > { %3250 = vmatprep.mubr.bf16.mxu0 %v7586_v32  ;;  %3177 = vmatprep.subr.bf16.mxu1 %v6953_v45  ;;  %v7038_v45 = vld [vmem:[%s7305_s25 + $0x8a8] ss:$72 sps:$4 sm:$0xff]  }
 0x29d   : > { %3220 = vmatprep.subr.bf16.mxu0 %v6956_v46  ;;  %v7043_v46 = vld [vmem:[%s7305_s25 + $0x44] ss:$72 sps:$4 sm:$0xff]  }
 0x29e   : > { %3178 = vmatpush1.bf16.msra.mxu1 %v6951_v47  ;;  %v7041_v47 = vld [vmem:[%s7305_s25 + $0x40] ss:$72 sps:$4 sm:$0xff]  }
 0x29f   : > { %3221 = vmatpush1.bf16.msra.mxu0 %v6954_v48  ;;  %3179 = vmatprep.subr.bf16.mxu1 %v6959_v49  ;;  %v7046_v48 = vld [vmem:[%s7305_s25 + $0xd4] ss:$72 sps:$4 sm:$0xff]   ;;  %v7044_v49 = vld [vmem:[%s7305_s25 + $0xd0] ss:$72 sps:$4 sm:$0xff]  }
 0x2a0   : > { %3222 = vmatprep.subr.bf16.mxu0 %v6962_v50  ;;  %v7049_v50 = vld [vmem:[%s7305_s25 + $0x164] ss:$72 sps:$4 sm:$0xff]  }
 0x2a2   : > { %3180 = vmatpush1.bf16.msra.mxu1 %v6957_v51  ;;  %v7047_v51 = vld [vmem:[%s7305_s25 + $0x160] ss:$72 sps:$4 sm:$0xff]  }
 0x2a3   : > { %3223 = vmatpush1.bf16.msra.mxu0 %v6960_v52  ;;  %3181 = vmatprep.subr.bf16.mxu1 %v6965_v53  ;;  %v7052_v52 = vld [vmem:[%s7305_s25 + $0x1f4] ss:$72 sps:$4 sm:$0xff]   ;;  %v7050_v53 = vld [vmem:[%s7305_s25 + $0x1f0] ss:$72 sps:$4 sm:$0xff]  }
 0x2a4   : > { %3224 = vmatprep.subr.bf16.mxu0 %v6968_v54  ;;  %v7055_v54 = vld [vmem:[%s7305_s25 + $0x284] ss:$72 sps:$4 sm:$0xff]  }
 0x2a6   : > { %3182 = vmatpush1.bf16.msra.mxu1 %v6963_v55  ;;  %v3314_v55 = vpop.permute.xlu0 %3313 }
 0x2a7   : > { %3225 = vmatpush1.bf16.msra.mxu0 %v6966_v56  ;;  %3183 = vmatprep.subr.bf16.mxu1 %v6971_v57  ;;  %v3309_v56 = vpop.permute.xlu1 %3308  ;;  %v7053_v57 = vld [vmem:[%s7305_s25 + $0x280] ss:$72 sps:$4 sm:$0xff]  }
 0x2a8   : > { %3226 = vmatprep.subr.bf16.mxu0 %v6974_v58  ;;  %v7056_v58 = vld [vmem:[%s7305_s25 + $0x310] ss:$72 sps:$4 sm:$0xff]  }
 0x2aa   : > { %3184 = vmatpush1.bf16.msra.mxu1 %v6969_v59  ;;  %v3331_v59 = vpop.permute.xlu0 %3330 }
 0x2ab   : > { %3227 = vmatpush1.bf16.msra.mxu0 %v6972_v60  ;;  %3185 = vmatprep.subr.bf16.mxu1 %v6977_v61  ;;  %v3326_v60 = vpop.permute.xlu1 %3325  ;;  %v7061_v61 = vld [vmem:[%s7305_s25 + $0x3a4] ss:$72 sps:$4 sm:$0xff]  }
 0x2ac   : > { %3228 = vmatprep.subr.bf16.mxu0 %v6980_v62 }
 0x2ae   : > { %3186 = vmatpush1.bf16.msra.mxu1 %v6975_v63 }
 0x2af   : > { %3229 = vmatpush1.bf16.msra.mxu0 %v6978_v0  ;;  %3187 = vmatprep.subr.bf16.mxu1 %v6983_v1 }
 0x2b0   : > { %3230 = vmatprep.subr.bf16.mxu0 %v6986_v3 }
 0x2b2   : > { %3188 = vmatpush1.bf16.msra.mxu1 %v6981_v4 }
 0x2b3   : > { %3231 = vmatpush1.bf16.msra.mxu0 %v6984_v5  ;;  %3189 = vmatprep.subr.bf16.mxu1 %v6989_v6 }
 0x2b4   : > { %3232 = vmatprep.subr.bf16.mxu0 %v6992_v7 }
 0x2b6   : > { %3190 = vmatpush1.bf16.msra.mxu1 %v6987_v8 }
 0x2b7   : > { %3233 = vmatpush1.bf16.msra.mxu0 %v6990_v9  ;;  %3191 = vmatprep.subr.bf16.mxu1 %v6995_v10  ;;  %v7059_v9 = vld [vmem:[%s7305_s25 + $0x3a0] ss:$72 sps:$4 sm:$0xff]  }
 0x2b8   : > { %3234 = vmatprep.subr.bf16.mxu0 %v6998_v11 }
 0x2ba   : > { %3192 = vmatpush1.bf16.msra.mxu1 %v6993_v12 }
 0x2bb   : > { %3235 = vmatpush1.bf16.msra.mxu0 %v6996_v13  ;;  %3193 = vmatprep.subr.bf16.mxu1 %v7001_v14 }
 0x2bc   : > { %3236 = vmatprep.subr.bf16.mxu0 %v7004_v15  ;;  %v7064_v15 = vld [vmem:[%s7305_s25 + $0x434] ss:$72 sps:$4 sm:$0xff]  }
 0x2be   : > { %3194 = vmatpush1.bf16.msra.mxu1 %v6999_v16 }
 0x2bf   : > { %3237 = vmatpush1.bf16.msra.mxu0 %v7002_v17  ;;  %3195 = vmatprep.subr.bf16.mxu1 %v7007_v18 }
 0x2c0   : > { %3238 = vmatprep.subr.bf16.mxu0 %v7010_v19 }
 0x2c2   : > { %3196 = vmatpush1.bf16.msra.mxu1 %v7005_v20 }
 0x2c3   : > { %3239 = vmatpush1.bf16.msra.mxu0 %v7008_v21  ;;  %3197 = vmatprep.subr.bf16.mxu1 %v7013_v22  ;;  %v7062_v21 = vld [vmem:[%s7305_s25 + $0x430] ss:$72 sps:$4 sm:$0xff]   ;;  %v7067_v22 = vld [vmem:[%s7305_s25 + $0x4c4] ss:$72 sps:$4 sm:$0xff]  }
 0x2c4   : > { %3240 = vmatprep.subr.bf16.mxu0 %v7016_v23  ;;  %v7065_v23 = vld [vmem:[%s7305_s25 + $0x4c0] ss:$72 sps:$4 sm:$0xff]  }
 0x2c6   : > { %3198 = vmatpush1.bf16.msra.mxu1 %v7011_v24  ;;  %v7070_v24 = vld [vmem:[%s7305_s25 + $0x554] ss:$72 sps:$4 sm:$0xff]  }
 0x2c7   : > { %3241 = vmatpush1.bf16.msra.mxu0 %v7014_v25  ;;  %3199 = vmatprep.subr.bf16.mxu1 %v7019_v26  ;;  %v7068_v25 = vld [vmem:[%s7305_s25 + $0x550] ss:$72 sps:$4 sm:$0xff]   ;;  %v7073_v26 = vld [vmem:[%s7305_s25 + $0x5e4] ss:$72 sps:$4 sm:$0xff]  }
 0x2c8   : > { %3242 = vmatprep.subr.bf16.mxu0 %v7022_v27  ;;  %v7071_v27 = vld [vmem:[%s7305_s25 + $0x5e0] ss:$72 sps:$4 sm:$0xff]  }
 0x2ca   : > { %3200 = vmatpush1.bf16.msra.mxu1 %v7017_v30  ;;  %v7076_v30 = vld [vmem:[%s7305_s25 + $0x674] ss:$72 sps:$4 sm:$0xff]  }
 0x2cb   : > { %3243 = vmatpush1.bf16.msra.mxu0 %v7020_v33  ;;  %3201 = vmatprep.subr.bf16.mxu1 %v7025_v34  ;;  %v7074_v33 = vld [vmem:[%s7305_s25 + $0x670] ss:$72 sps:$4 sm:$0xff]   ;;  %v7079_v34 = vld [vmem:[%s7305_s25 + $0x704] ss:$72 sps:$4 sm:$0xff]  }
 0x2cc   : > { %3244 = vmatprep.subr.bf16.mxu0 %v7028_v35  ;;  %v7077_v35 = vld [vmem:[%s7305_s25 + $0x700] ss:$72 sps:$4 sm:$0xff]  }
 0x2ce   : > { %3202 = vmatpush1.bf16.msra.mxu1 %v7023_v36  ;;  %v7082_v36 = vld [vmem:[%s7305_s25 + $0x794] ss:$72 sps:$4 sm:$0xff]  }
 0x2cf   : > { %3245 = vmatpush1.bf16.msra.mxu0 %v7026_v37  ;;  %3203 = vmatprep.subr.bf16.mxu1 %v7031_v38  ;;  %v7080_v37 = vld [vmem:[%s7305_s25 + $0x790] ss:$72 sps:$4 sm:$0xff]   ;;  %v7085_v38 = vld [vmem:[%s7305_s25 + $0x824] ss:$72 sps:$4 sm:$0xff]  }
 0x2d0   : > { %3246 = vmatprep.subr.bf16.mxu0 %v7034_v39  ;;  %v7083_v39 = vld [vmem:[%s7305_s25 + $0x820] ss:$72 sps:$4 sm:$0xff]  }
 0x2d2   : > { %3204 = vmatpush1.bf16.msra.mxu1 %v7029_v40  ;;  %v7088_v40 = vld [vmem:[%s7305_s25 + $0x8b4] ss:$72 sps:$4 sm:$0xff]  }
 0x2d3   : > { %3247 = vmatpush1.bf16.msra.mxu0 %v7032_v41  ;;  %3205 = vmatprep.subr.bf16.mxu1 %v7037_v42  ;;  %v7086_v41 = vld [vmem:[%s7305_s25 + $0x8b0] ss:$72 sps:$4 sm:$0xff]   ;;  %v3347_v42 = vpop.permute.xlu1 %3346 }
 0x2d4   : > { %3248 = vmatprep.subr.bf16.mxu0 %v7040_v43  ;;  %v3352_v43 = vpop.permute.xlu0 %3351 }
 0x2d6   : > { %3206 = vmatpush1.bf16.msra.mxu1 %v7035_v44 }
 0x2d7   : > { %3249 = vmatpush1.bf16.msra.mxu0 %v7038_v45  ;;  %3261 = vmatprep.subr.bf16.mxu1 %v7043_v46  ;;  %v3368_v44 = vpop.permute.xlu1 %3367 }
 0x2d9   : > { %3208 = vmatmul.mubr.bf16.vlgmr.msra.gmra.mrb[16].mxu1 %v7584_v31 }
 0x2da   : > { %3251 = vmatmul.mubr.bf16.vlgmr.msra.gmra.mrb[16].mxu0 %v7584_v31  ;;  %3262 = vmatpush1.bf16.msra.mxu1 %v7041_v47 }
 0x2db   : > { %3293 = vmatprep.mubr.bf16.mxu1 %v7586_v32  ;;  %3263 = vmatprep.subr.bf16.mxu1 %v7046_v48  ;;  %v7058_v32 = vld [vmem:[%s7305_s25 + $0x314] ss:$72 sps:$4 sm:$0xff]  }
 0x2dc   : > { %3557 = vmatprep.mubr.bf16.mxu0 %v7260_v2 }
 0x2de   : > { %3264 = vmatpush1.bf16.msra.mxu1 %v7044_v49 }
 0x2df   : > { %3265 = vmatprep.subr.bf16.mxu1 %v7049_v50 }
 0x2e2   : > { %3266 = vmatpush1.bf16.msra.mxu1 %v7047_v51 }
 0x2e3   : > { %3267 = vmatprep.subr.bf16.mxu1 %v7052_v52 }
 0x2e6   : > { %3268 = vmatpush1.bf16.msra.mxu1 %v7050_v53 }
 0x2e7   : > { %3269 = vmatprep.subr.bf16.mxu1 %v7055_v54 }
 0x2ea   : > { %3270 = vmatpush1.bf16.msra.mxu1 %v7053_v57 }
 0x2eb   : > { %3271 = vmatprep.subr.bf16.mxu1 %v7058_v32  ;;  %v3373_v32 = vpop.permute.xlu0 %3372 }
 0x2ec   : > { %v2951_v62 = vpop.f32.mrb[4].mxu1  ;;  %v2994_v63 = vpop.f32.mrb[4].mxu0 }
 0x2ed   : > { %v3316_v0 = vmul.f32 %v3309_v56, %v2951_v62  ;;  %v3333_v1 = vmul.f32 %v3326_v60, %v2994_v63  ;;  %v2953_v3 = vpop.f32.mrb[5].mxu1  ;;  %v2996_v4 = vpop.f32.mrb[5].mxu0 }
 0x2ee   : > { %v3317_v5 = vmul.f32 %v3309_v56, %v2953_v3  ;;  %v3334_v6 = vmul.f32 %v3326_v60, %v2996_v4  ;;  %3272 = vmatpush1.bf16.msra.mxu1 %v7056_v58  ;;  %v2955_v7 = vpop.f32.mrb[6].mxu1  ;;  %v2998_v8 = vpop.f32.mrb[6].mxu0 }
 0x2ef   : > { %v3337_v10 = vadd.f32 %v3333_v1, %v3316_v0  ;;  %v3318_v11 = vmul.f32 %v3314_v55, %v2955_v7  ;;  %v3335_v12 = vmul.f32 %v3331_v59, %v2998_v8  ;;  %v2957_v13 = vpop.f32.mrb[7].mxu1  ;;  %v3000_v14 = vpop.f32.mrb[7].mxu0  ;;  %3273 = vmatprep.subr.bf16.mxu1 %v7061_v61 }
 0x2f0   : > { %v3338_v16 = vadd.f32 %v3334_v6, %v3317_v5  ;;  %v3319_v17 = vmul.f32 %v3314_v55, %v2957_v13  ;;  %v3336_v18 = vmul.f32 %v3331_v59, %v3000_v14  ;;  %v3389_v5 = vpop.permute.xlu1 %3388  ;;  %v3394_v6 = vpop.permute.xlu0 %3393 }
 0x2f1   : > { %v3339_v19 = vadd.f32 %v3335_v12, %v3318_v11 }
 0x2f2   : > { %v3340_v20 = vadd.f32 %v3336_v18, %v3319_v17  ;;  %3274 = vmatpush1.bf16.msra.mxu1 %v7059_v9 }
 0x2f3   : > { %3275 = vmatprep.subr.bf16.mxu1 %v7064_v15 }
 0x2f4   : > { %v3410_v7 = vpop.permute.xlu1 %3409 }
 0x2f6   : > { %3276 = vmatpush1.bf16.msra.mxu1 %v7062_v21  ;;  %v3415_v21 = vpop.permute.xlu0 %3414 }
 0x2f7   : > { %3277 = vmatprep.subr.bf16.mxu1 %v7067_v22 }
 0x2fa   : > { %3278 = vmatpush1.bf16.msra.mxu1 %v7065_v23 }
 0x2fb   : > { %3279 = vmatprep.subr.bf16.mxu1 %v7070_v24 }
 0x2fe   : > { %3280 = vmatpush1.bf16.msra.mxu1 %v7068_v25 }
 0x2ff   : > { %3281 = vmatprep.subr.bf16.mxu1 %v7073_v26 }
 0x302   : > { %3282 = vmatpush1.bf16.msra.mxu1 %v7071_v27 }
 0x303   : > { %3283 = vmatprep.subr.bf16.mxu1 %v7076_v30 }
 0x306   : > { %3284 = vmatpush1.bf16.msra.mxu1 %v7074_v33 }
 0x307   : > { %3285 = vmatprep.subr.bf16.mxu1 %v7079_v34 }
 0x30a   : > { %3286 = vmatpush1.bf16.msra.mxu1 %v7077_v35 }
 0x30b   : > { %3287 = vmatprep.subr.bf16.mxu1 %v7082_v36 }
 0x30e   : > { %3288 = vmatpush1.bf16.msra.mxu1 %v7080_v37  ;;  %v3431_v37 = vpop.permute.xlu1 %3430 }
 0x30f   : > { %3289 = vmatprep.subr.bf16.mxu1 %v7085_v38  ;;  %v3436_v38 = vpop.permute.xlu0 %3435 }
 0x312   : > { %3290 = vmatpush1.bf16.msra.mxu1 %v7083_v39  ;;  %v3452_v39 = vpop.permute.xlu1 %3451 }
 0x313   : > { %3291 = vmatprep.subr.bf16.mxu1 %v7088_v40 }
 0x316   : > { %3292 = vmatpush1.bf16.msra.mxu1 %v7086_v41 }
 0x319   : > { %3294 = vmatmul.mubr.bf16.vlgmr.msra.gmra.mrb[20].mxu1 %v7584_v31 }
 0x32c   : > { %v3037_v45 = vpop.f32.mrb[8].mxu1  ;;  %v3080_v46 = vpop.f32.mrb[8].mxu0 }
 0x32d   : > { %v3354_v47 = vmul.f32 %v3347_v42, %v3037_v45  ;;  %v3039_v48 = vpop.f32.mrb[9].mxu1  ;;  %v3082_v49 = vpop.f32.mrb[9].mxu0  ;;  %v3375_v54 = vmul.f32 %v3368_v44, %v3080_v46 }
 0x32e   : > { %v3355_v50 = vmul.f32 %v3347_v42, %v3039_v48  ;;  %v3041_v51 = vpop.f32.mrb[10].mxu1  ;;  %v3084_v52 = vpop.f32.mrb[10].mxu0  ;;  %v3376_v59 = vmul.f32 %v3368_v44, %v3082_v49 }
 0x32f   : > { %v3358_v53 = vadd.f32 %v3354_v47, %v3337_v10  ;;  %v3356_v55 = vmul.f32 %v3352_v43, %v3041_v51  ;;  %v3043_v56 = vpop.f32.mrb[11].mxu1  ;;  %v3086_v57 = vpop.f32.mrb[11].mxu0  ;;  %v3377_v62 = vmul.f32 %v3373_v32, %v3084_v52 }
 0x330   : > { %v3359_v58 = vadd.f32 %v3355_v50, %v3338_v16  ;;  %v3357_v31 = vmul.f32 %v3352_v43, %v3043_v56  ;;  %v3378_v1 = vmul.f32 %v3373_v32, %v3086_v57  ;;  %v3457_v52 = vpop.permute.xlu0 %3456 }
 0x331   : > { %v3379_v60 = vadd.f32 %v3375_v54, %v3358_v53  ;;  %v3360_v61 = vadd.f32 %v3356_v55, %v3339_v19 }
 0x332   : > { %v3380_v63 = vadd.f32 %v3376_v59, %v3359_v58  ;;  %v3361_v0 = vadd.f32 %v3357_v31, %v3340_v20 }
 0x333   : > { %v3381_v3 = vadd.f32 %v3377_v62, %v3360_v61 }
 0x334   : > { %v3382_v4 = vadd.f32 %v3378_v1, %v3361_v0  ;;  %v3478_v0 = vpop.permute.xlu0 %3477 }
 0x36c   : > { %v3123_v8 = vpop.f32.mrb[12].mxu1 }
 0x36d   : > { %v3396_v9 = vmul.f32 %v3389_v5, %v3123_v8  ;;  %v3166_v10 = vpop.f32.mrb[12].mxu0  ;;  %v3125_v11 = vpop.f32.mrb[13].mxu1 }
 0x36e   : > { %v3397_v12 = vmul.f32 %v3389_v5, %v3125_v11  ;;  %v3168_v13 = vpop.f32.mrb[13].mxu0  ;;  %v3127_v14 = vpop.f32.mrb[14].mxu1  ;;  %v3417_v16 = vmul.f32 %v3410_v7, %v3166_v10 }
 0x36f   : > { %v3400_v15 = vadd.f32 %v3396_v9, %v3379_v60  ;;  %v3398_v17 = vmul.f32 %v3394_v6, %v3127_v14  ;;  %v3170_v18 = vpop.f32.mrb[14].mxu0  ;;  %v3129_v19 = vpop.f32.mrb[15].mxu1  ;;  %v3418_v22 = vmul.f32 %v3410_v7, %v3168_v13 }
 0x370   : > { %v3401_v20 = vadd.f32 %v3397_v12, %v3380_v63  ;;  %v3399_v23 = vmul.f32 %v3394_v6, %v3129_v19  ;;  %v3172_v24 = vpop.f32.mrb[15].mxu0  ;;  %v3419_v27 = vmul.f32 %v3415_v21, %v3170_v18  ;;  %v3473_v63 = vpop.permute.xlu1 %3472 }
 0x371   : > { %v3421_v25 = vadd.f32 %v3417_v16, %v3400_v15  ;;  %v3402_v26 = vadd.f32 %v3398_v17, %v3381_v3  ;;  %v3420_v34 = vmul.f32 %v3415_v21, %v3172_v24  ;;  %v3498_v15 = vpop.permute.xlu0 %3497 }
 0x372   : > { %v3422_v30 = vadd.f32 %v3418_v22, %v3401_v20  ;;  %v3403_v33 = vadd.f32 %v3399_v23, %v3382_v4 }
 0x373   : > { %v3423_v35 = vadd.f32 %v3419_v27, %v3402_v26 }
 0x374   : > { %v3424_v36 = vadd.f32 %v3420_v34, %v3403_v33  ;;  %v3493_v10 = vpop.permute.xlu1 %3492  ;;  %v3512_v34 = vld [vmem:[%s7320_s8] sm:$0xf] }
 0x3ac   : > { %v3209_v40 = vpop.f32.mrb[16].mxu1 }
 0x3ad   : > { %v3438_v41 = vmul.f32 %v3431_v37, %v3209_v40  ;;  %v3252_v42 = vpop.f32.mrb[16].mxu0  ;;  %v3211_v43 = vpop.f32.mrb[17].mxu1  ;;  %v7107_v40 = vld [vmem:[%s7340_s30 + $0x5c] ss:$20 sps:$4 sm:$0xff]  }
 0x3ae   : > { %v3439_v44 = vmul.f32 %v3431_v37, %v3211_v43  ;;  %v3254_v45 = vpop.f32.mrb[17].mxu0  ;;  %v3213_v46 = vpop.f32.mrb[18].mxu1  ;;  %v3459_v48 = vmul.f32 %v3452_v39, %v3252_v42  ;;  %v7099_v37 = vld [vmem:[%s7340_s30 + $0x30] ss:$20 sps:$4 sm:$0xff]   ;;  %v7117_v43 = vld [vmem:[%s7340_s30 + $0xa8] ss:$20 sps:$4 sm:$0xff]  }
 0x3af   : > { %v3442_v47 = vadd.f32 %v3438_v41, %v3421_v25  ;;  %v3440_v49 = vmul.f32 %v3436_v38, %v3213_v46  ;;  %v3256_v50 = vpop.f32.mrb[18].mxu0  ;;  %v3215_v51 = vpop.f32.mrb[19].mxu1  ;;  %v3460_v54 = vmul.f32 %v3452_v39, %v3254_v45  ;;  %v7105_v39 = vld [vmem:[%s7340_s30 + $0x58] ss:$20 sps:$4 sm:$0xff]   ;;  %v7111_v41 = vld [vmem:[%s7340_s30 + $0x80] ss:$20 sps:$4 sm:$0xff]  }
 0x3b0   : > { %v3443_v53 = vadd.f32 %v3439_v44, %v3422_v30  ;;  %v3441_v55 = vmul.f32 %v3436_v38, %v3215_v51  ;;  %v3258_v56 = vpop.f32.mrb[19].mxu0  ;;  %v3461_v58 = vmul.f32 %v3457_v52, %v3256_v50  ;;  %v7101_v38 = vld [vmem:[%s7340_s30 + $0x34] ss:$20 sps:$4 sm:$0xff]   ;;  %v7113_v42 = vld [vmem:[%s7340_s30 + $0x84] ss:$20 sps:$4 sm:$0xff]  }
 0x3b1   : > { %v3463_v57 = vadd.f32 %v3459_v48, %v3442_v47  ;;  %v3444_v32 = vadd.f32 %v3440_v49, %v3423_v35  ;;  %v3462_v60 = vmul.f32 %v3457_v52, %v3258_v56  ;;  %v7093_v35 = vld [vmem:[%s7340_s30 + $0x8] ss:$20 sps:$4 sm:$0xff]   ;;  %v7119_v44 = vld [vmem:[%s7340_s30 + $0xac] ss:$20 sps:$4 sm:$0xff]   ;;  %v7123_v45 = vld [vmem:[%s7340_s30 + $0xd0] ss:$20 sps:$4 sm:$0xff]  }
 0x3b2   : > { %v3464_v59 = vadd.f32 %v3460_v54, %v3443_v53  ;;  %v3445_v31 = vadd.f32 %v3441_v55, %v3424_v36  ;;  %v7095_v36 = vld [vmem:[%s7340_s30 + $0xc] ss:$20 sps:$4 sm:$0xff]   ;;  %v7125_v46 = vld [vmem:[%s7340_s30 + $0xd4] ss:$20 sps:$4 sm:$0xff]   ;;  %v7131_v48 = vld [vmem:[%s7340_s30 + $0xfc] ss:$20 sps:$4 sm:$0xff]  }
 0x3b3   : > { %v3465_v61 = vadd.f32 %v3461_v58, %v3444_v32  ;;  %4206 = vmatprep.subr.bf16.mxu1 %v7095_v36  ;;  %v7129_v47 = vld [vmem:[%s7340_s30 + $0xf8] ss:$20 sps:$4 sm:$0xff]   ;;  %v7135_v49 = vld [vmem:[%s7340_s30 + $0x120] ss:$20 sps:$4 sm:$0xff]   ;;  %v7141_v51 = vld [vmem:[%s7340_s30 + $0x148] ss:$20 sps:$4 sm:$0xff]  }
 0x3b4   : > { %v3466_v62 = vadd.f32 %v3462_v60, %v3445_v31  ;;  %4207 = vmatpush1.bf16.msra.mxu1 %v7093_v35  ;;  %v7137_v50 = vld [vmem:[%s7340_s30 + $0x124] ss:$20 sps:$4 sm:$0xff]   ;;  %v7143_v52 = vld [vmem:[%s7340_s30 + $0x14c] ss:$20 sps:$4 sm:$0xff]   ;;  %v7149_v54 = vld [vmem:[%s7340_s30 + $0x174] ss:$20 sps:$4 sm:$0xff]   ;;  %v3519_v31 = vpop.permute.xlu1 %3518 }
 0x3b5   : > { %4208 = vmatprep.subr.bf16.mxu1 %v7101_v38  ;;  %v7147_v53 = vld [vmem:[%s7340_s30 + $0x170] ss:$20 sps:$4 sm:$0xff]   ;;  %v7153_v55 = vld [vmem:[%s7340_s30 + $0x198] ss:$20 sps:$4 sm:$0xff]   ;;  %v7165_v58 = vld [vmem:[%s7340_s30 + $0x1e8] ss:$20 sps:$4 sm:$0xff]  }
 0x3b6   : > { %v7155_v56 = vld [vmem:[%s7340_s30 + $0x19c] ss:$20 sps:$4 sm:$0xff]   ;;  %v7161_v32 = vld [vmem:[%s7340_s30 + $0x1c4] ss:$20 sps:$4 sm:$0xff]   ;;  %v7162_v36 = vld [vmem:[%s7340_s30 + $0x1e0] ss:$20 sps:$4 sm:$0xff]  }
 0x3b7   : > { %v7164_v35 = vld [vmem:[%s7340_s30 + $0x1e4] ss:$20 sps:$4 sm:$0xff]   ;;  %v7168_v38 = vld [vmem:[%s7340_s30 + $0x208] ss:$20 sps:$4 sm:$0xff]  }
 0x3b8   : > { %4209 = vmatpush1.bf16.msra.mxu1 %v7099_v37  ;;  %v7170_v37 = vld [vmem:[%s7340_s30 + $0x20c] ss:$20 sps:$4 sm:$0xff]  }
 0x3b9   : > { %4210 = vmatprep.subr.bf16.mxu1 %v7107_v40  ;;  %v7171_v40 = vld [vmem:[%s7340_s30 + $0x210] ss:$20 sps:$4 sm:$0xff]  }
 0x3bc   : > { %4211 = vmatpush1.bf16.msra.mxu1 %v7105_v39  ;;  %v7173_v39 = vld [vmem:[%s7340_s30 + $0x214] ss:$20 sps:$4 sm:$0xff]  }
 0x3bd   : > { %4212 = vmatprep.subr.bf16.mxu1 %v7113_v42  ;;  %v7174_v42 = vld [vmem:[%s7340_s30 + $0x230] ss:$20 sps:$4 sm:$0xff]  }
 0x3c0   : > { %4213 = vmatpush1.bf16.msra.mxu1 %v7111_v41  ;;  %v7176_v41 = vld [vmem:[%s7340_s30 + $0x234] ss:$20 sps:$4 sm:$0xff]  }
 0x3c1   : > { %4214 = vmatprep.subr.bf16.mxu1 %v7119_v44  ;;  %v7177_v44 = vld [vmem:[%s7340_s30 + $0x238] ss:$20 sps:$4 sm:$0xff]  }
 0x3c4   : > { %4215 = vmatpush1.bf16.msra.mxu1 %v7117_v43  ;;  %v7179_v43 = vld [vmem:[%s7340_s30 + $0x23c] ss:$20 sps:$4 sm:$0xff]  }
 0x3c5   : > { %4216 = vmatprep.subr.bf16.mxu1 %v7125_v46  ;;  %v7180_v46 = vld [vmem:[%s7340_s30 + $0x258] ss:$20 sps:$4 sm:$0xff]  }
 0x3c8   : > { %4217 = vmatpush1.bf16.msra.mxu1 %v7123_v45  ;;  %v7182_v45 = vld [vmem:[%s7340_s30 + $0x25c] ss:$20 sps:$4 sm:$0xff]  }
 0x3c9   : > { %4218 = vmatprep.subr.bf16.mxu1 %v7131_v48  ;;  %v7183_v48 = vld [vmem:[%s7340_s30 + $0x260] ss:$20 sps:$4 sm:$0xff]  }
 0x3cc   : > { %4219 = vmatpush1.bf16.msra.mxu1 %v7129_v47  ;;  %v7185_v47 = vld [vmem:[%s7340_s30 + $0x264] ss:$20 sps:$4 sm:$0xff]  }
 0x3cd   : > { %4220 = vmatprep.subr.bf16.mxu1 %v7137_v50  ;;  %v3577_v50 = vpop.permute.xlu0 %3576 }
 0x3d0   : > { %4221 = vmatpush1.bf16.msra.mxu1 %v7135_v49  ;;  %v7186_v49 = vld [vmem:[%s7340_s30 + $0x150] ss:$20 sps:$4 sm:$0xff]  }
 0x3d1   : > { %4222 = vmatprep.subr.bf16.mxu1 %v7143_v52 }
 0x3d4   : > { %4223 = vmatpush1.bf16.msra.mxu1 %v7141_v51 }
 0x3d5   : > { %4224 = vmatprep.subr.bf16.mxu1 %v7149_v54  ;;  %v3582_v54 = vpop.permute.xlu1 %3581 }
 0x3d8   : > { %4225 = vmatpush1.bf16.msra.mxu1 %v7147_v53 }
 0x3d9   : > { %4226 = vmatprep.subr.bf16.mxu1 %v7155_v56 }
 0x3dc   : > { %4227 = vmatpush1.bf16.msra.mxu1 %v7153_v55 }
 0x3dd   : > { %4228 = vmatprep.subr.bf16.mxu1 %v7161_v32 }
 0x3ec   : > { %v3295_v1 = vpop.f32.mrb[20].mxu1 }
 0x3ed   : > { %v3480_v3 = vmul.f32 %v3473_v63, %v3295_v1  ;;  %v3297_v4 = vpop.f32.mrb[21].mxu1 }
 0x3ee   : > { %v3481_v5 = vmul.f32 %v3473_v63, %v3297_v4  ;;  %v3299_v6 = vpop.f32.mrb[22].mxu1 }
 0x3ef   : > { %v3484_v7 = vadd.f32 %v3480_v3, %v3463_v57  ;;  %v3482_v8 = vmul.f32 %v3478_v0, %v3299_v6  ;;  %v3301_v9 = vpop.f32.mrb[23].mxu1  ;;  %v7159_v57 = vld [vmem:[%s7340_s30 + $0x1c0] ss:$20 sps:$4 sm:$0xff]  }
 0x3f0   : > { %v3485_v11 = vadd.f32 %v3481_v5, %v3464_v59  ;;  %v3483_v12 = vmul.f32 %v3478_v0, %v3301_v9  ;;  %4229 = vmatpush1.bf16.msra.mxu1 %v7159_v57  ;;  %v7167_v59 = vld [vmem:[%s7340_s30 + $0x1ec] ss:$20 sps:$4 sm:$0xff]  }
 0x3f1   : > { %v3500_v13 = vadd.f32 %v3493_v10, %v3484_v7  ;;  %v3486_v14 = vadd.f32 %v3482_v8, %v3465_v61  ;;  %4230 = vmatprep.subr.bf16.mxu1 %v7167_v59  ;;  %v7092_v7 = vld [vmem:[%s7340_s30 + $0x4] ss:$20 sps:$4 sm:$0xff]  }
 0x3f2   : > { %v3501_v16 = vadd.f32 %v3493_v10, %v3485_v11  ;;  %v3487_v17 = vadd.f32 %v3483_v12, %v3466_v62  ;;  %v7089_v9 = vld [vmem:[%s7330_s19] sm:$0xff]   ;;  %v7104_v11 = vld [vmem:[%s7340_s30 + $0x54] ss:$20 sps:$4 sm:$0xff]  }
 0x3f3   : > { %v3504_v18 = vmax.f32 %v3500_v13, 0.0  ;;  %v3502_v19 = vadd.f32 %v3498_v15, %v3486_v14  ;;  %v7090_v10 = vld [vmem:[%s7340_s30] ss:$20 sps:$4 sm:$0xff]   ;;  %v7102_v12 = vld [vmem:[%s7340_s30 + $0x50] ss:$20 sps:$4 sm:$0xff]  }
 0x3f4   : > { %v3505_v21 = vmax.f32 %v3501_v16, 0.0  ;;  %v3503_v20 = vadd.f32 %v3498_v15, %v3487_v17  ;;  %4231 = vmatpush1.bf16.msra.mxu1 %v7165_v58  ;;  %v7110_v13 = vld [vmem:[%s7340_s30 + $0x7c] ss:$20 sps:$4 sm:$0xff]   ;;  %v7108_v14 = vld [vmem:[%s7340_s30 + $0x78] ss:$20 sps:$4 sm:$0xff]  }
 0x3f5   : > { %v3506_v22 = vmax.f32 %v3502_v19, 0.0  ;;  %v3508_v24 = vmin.f32 %v3504_v18, 6.0  ;;  %v7116_v15 = vld [vmem:[%s7340_s30 + $0xa4] ss:$20 sps:$4 sm:$0xff]   ;;  %v7114_v16 = vld [vmem:[%s7340_s30 + $0xa0] ss:$20 sps:$4 sm:$0xff]   ;;  %4232 = vmatprep.subr.bf16.mxu1 %v7173_v39 }
 0x3f6   : > { %v3507_v23 = vmax.f32 %v3503_v20, 0.0  ;;  %v3509_v26 = vmin.f32 %v3505_v21, 6.0  ;;  %v7122_v17 = vld [vmem:[%s7340_s30 + $0xcc] ss:$20 sps:$4 sm:$0xff]   ;;  %v7120_v18 = vld [vmem:[%s7340_s30 + $0xc8] ss:$20 sps:$4 sm:$0xff]  }
 0x3f7   : > { %v3510_v25 = vmin.f32 %v3506_v22, 6.0  ;;  %v7128_v19 = vld [vmem:[%s7340_s30 + $0xf4] ss:$20 sps:$4 sm:$0xff]   ;;  %v7126_v21 = vld [vmem:[%s7340_s30 + $0xf0] ss:$20 sps:$4 sm:$0xff]  }
 0x3f8   : > { %v3511_v27 = vmin.f32 %v3507_v23, 6.0  ;;  %v7134_v20 = vld [vmem:[%s7340_s30 + $0x11c] ss:$20 sps:$4 sm:$0xff]   ;;  %v7132_v22 = vld [vmem:[%s7340_s30 + $0x118] ss:$20 sps:$4 sm:$0xff]   ;;  %4233 = vmatpush1.bf16.msra.mxu1 %v7171_v40 }
 0x3f9   : > { %v3513_v30 = vpack.c.bf16 %v3510_v25, %v3508_v24  ;;  %v7140_v23 = vld [vmem:[%s7340_s30 + $0x144] ss:$20 sps:$4 sm:$0xff]   ;;  %v7138_v24 = vld [vmem:[%s7340_s30 + $0x140] ss:$20 sps:$4 sm:$0xff]   ;;  %4234 = vmatprep.subr.bf16.mxu1 %v7179_v43  ;;  %v4473_v43 = vld [vmem:[%s8276_s11 + $0x8] sm:$0xff] }
 0x3fa   : > { %v3514_v33 = vpack.c.bf16 %v3511_v27, %v3509_v26  ;;  %v7146_v25 = vld [vmem:[%s7340_s30 + $0x16c] ss:$20 sps:$4 sm:$0xff]   ;;  %v7144_v26 = vld [vmem:[%s7340_s30 + $0x168] ss:$20 sps:$4 sm:$0xff]  }
 0x3fb   : > { %v7152_v27 = vld [vmem:[%s7340_s30 + $0x194] ss:$20 sps:$4 sm:$0xff]  }
 0x3fc   : > { %3525 = vmatprep.subr.bf16.mxu0 %v3514_v33  ;;  %v7158_v33 = vld [vmem:[%s7340_s30 + $0x1bc] ss:$20 sps:$4 sm:$0xff]   ;;  %4235 = vmatpush1.bf16.msra.mxu1 %v7177_v44 }
 0x3fd   : > { %3526 = vmatpush1.bf16.msra.mxu0 %v3513_v30  ;;  %v7150_v30 = vld [vmem:[%s7340_s30 + $0x190] ss:$20 sps:$4 sm:$0xff]   ;;  %4236 = vmatprep.subr.bf16.mxu1 %v7185_v47 }
 0x400   : > { %6330 = vmatmul.mubr.msk.bf16.vlgmr.msra.gmra.mrb[20].mxu0 %vm3521_vm5, %v3512_v34  ;;  %v7156_v34 = vld [vmem:[%s7340_s30 + $0x1b8] ss:$20 sps:$4 sm:$0xff]   ;;  %4237 = vmatpush1.bf16.msra.mxu1 %v7183_v48  ;;  %v4493_v48 = vld [vmem:[%s8277_s16] sm:$0xff] }
 0x401   : > { %3630 = vmatprep.mubr.bf16.mxu0 %v7260_v2 }
 0x4d3   : > { %v3559_v60 = vpop.f32.mrb[20].mxu0 }
 0x4d4   : > { %v3560_v61 = vadd.f32 %v3559_v60, %v3519_v31  ;;  %v3561_v62 = vpop.f32.mrb[21].mxu0 }
 0x4d5   : > { %v3562_v63 = vadd.f32 %v3561_v62, %v3519_v31  ;;  %v3563_v0 = vpop.f32.mrb[22].mxu0 }
 0x4d6   : > { %v3566_v1 = vadd.f32 %v3560_v61, %v7532_v28  ;;  %v3564_v3 = vpop.f32.mrb[23].mxu0  ;;  %v7098_v28 = vld [vmem:[%s7340_s30 + $0x2c] ss:$20 sps:$4 sm:$0xff]  }
 0x4d7   : > { %v3567_v4 = vadd.f32 %v3562_v63, %v7534_v29  ;;  %v7096_v29 = vld [vmem:[%s7340_s30 + $0x28] ss:$20 sps:$4 sm:$0xff]  }
 0x4d8   : > { %v3570_v5 = vpack.c.bf16 %v3566_v1, %v3566_v1 }
 0x4d9   : > { %v3571_v6 = vpack.c.bf16 %v3567_v4, %v3567_v4 }
 0x4da   : > { %v3593_v8 = vsel %vm1129_vm3, %v3570_v5, 0  ;;  %v7187_v5 = vld [vmem:[%s7340_s30 + $0x10] ss:$20 sps:$4 sm:$0xff]  }
 0x4db   : > { %6332 = vmatprep.subr.msk.bf16.mxu0 %vm1129_vm3, %v3571_v6  ;;  %v7188_v6 = vld [vmem:[%s7340_s30 + $0x178] ss:$20 sps:$4 sm:$0xff]  }
 0x4dc   : > { %3599 = vmatpush1.bf16.msra.mxu0 %v3593_v8  ;;  %v7190_v8 = vld [vmem:[%s7340_s30 + $0x1a0] ss:$20 sps:$4 sm:$0xff]  }
 0x4dd   : > { %4163 = vmatprep.subr.bf16.mxu0 %v7092_v7  ;;  %v7189_v7 = vld [vmem:[%s7340_s30 + $0x38] ss:$20 sps:$4 sm:$0xff]  }
 0x4df   : > { %6333 = vmatmul.mubr.msk.bf16.vlgmr.msra.gmra.mrb[24].mxu0 %vm1125_vm4, %v7089_v9  ;;  %v7191_v9 = vld [vmem:[%s7340_s30 + $0x60] ss:$20 sps:$4 sm:$0xff]  }
 0x4e0   : > { %4164 = vmatpush1.bf16.msra.mxu0 %v7090_v10  ;;  %v7192_v10 = vld [vmem:[%s7340_s30 + $0x1c8] ss:$20 sps:$4 sm:$0xff]  }
 0x4e1   : > { %4165 = vmatprep.subr.bf16.mxu0 %v7098_v28  ;;  %v7193_v28 = vld [vmem:[%s7340_s30 + $0x88] ss:$20 sps:$4 sm:$0xff]  }
 0x4e4   : > { %4166 = vmatpush1.bf16.msra.mxu0 %v7096_v29  ;;  %v7194_v29 = vld [vmem:[%s7340_s30 + $0x1f0] ss:$20 sps:$4 sm:$0xff]  }
 0x4e5   : > { %4167 = vmatprep.subr.bf16.mxu0 %v7104_v11  ;;  %v7195_v11 = vld [vmem:[%s7340_s30 + $0xb0] ss:$20 sps:$4 sm:$0xff]  }
 0x4e8   : > { %4168 = vmatpush1.bf16.msra.mxu0 %v7102_v12  ;;  %v7196_v12 = vld [vmem:[%s7340_s30 + $0x218] ss:$20 sps:$4 sm:$0xff]  }
 0x4e9   : > { %4169 = vmatprep.subr.bf16.mxu0 %v7110_v13  ;;  %v7197_v13 = vld [vmem:[%s7340_s30 + $0xd8] ss:$20 sps:$4 sm:$0xff]  }
 0x4ec   : > { %4170 = vmatpush1.bf16.msra.mxu0 %v7108_v14  ;;  %v7198_v14 = vld [vmem:[%s7340_s30 + $0x240] ss:$20 sps:$4 sm:$0xff]  }
 0x4ed   : > { %4171 = vmatprep.subr.bf16.mxu0 %v7116_v15  ;;  %v7199_v15 = vld [vmem:[%s7340_s30 + $0x100] ss:$20 sps:$4 sm:$0xff]  }
 0x4f0   : > { %4172 = vmatpush1.bf16.msra.mxu0 %v7114_v16  ;;  %v7200_v16 = vld [vmem:[%s7340_s30 + $0x268] ss:$20 sps:$4 sm:$0xff]  }
 0x4f1   : > { %4173 = vmatprep.subr.bf16.mxu0 %v7122_v17  ;;  %v7201_v17 = vld [vmem:[%s7340_s30 + $0x128] ss:$20 sps:$4 sm:$0xff]  }
 0x4f4   : > { %4174 = vmatpush1.bf16.msra.mxu0 %v7120_v18  ;;  %v4310_v18 = vpop.permute.xlu0 %4309 }
 0x4f5   : > { %4175 = vmatprep.subr.bf16.mxu0 %v7128_v19  ;;  %v4315_v19 = vpop.permute.xlu1 %4314 }
 0x4f8   : > { %4176 = vmatpush1.bf16.msra.mxu0 %v7126_v21  ;;  %v4352_v21 = vpop.permute.xlu0 %4351 }
 0x4f9   : > { %4177 = vmatprep.subr.bf16.mxu0 %v7134_v20  ;;  %v4357_v20 = vpop.permute.xlu1 %4356 }
 0x4fc   : > { %4178 = vmatpush1.bf16.msra.mxu0 %v7132_v22 }
 0x4fd   : > { %4179 = vmatprep.subr.bf16.mxu0 %v7140_v23 }
 0x500   : > { %4180 = vmatpush1.bf16.msra.mxu0 %v7138_v24 }
 0x501   : > { %4181 = vmatprep.subr.bf16.mxu0 %v7146_v25 }
 0x504   : > { %4182 = vmatpush1.bf16.msra.mxu0 %v7144_v26 }
 0x505   : > { %4183 = vmatprep.subr.bf16.mxu0 %v7152_v27 }
 0x508   : > { %4184 = vmatpush1.bf16.msra.mxu0 %v7150_v30 }
 0x509   : > { %4185 = vmatprep.subr.bf16.mxu0 %v7158_v33 }
 0x50c   : > { %4186 = vmatpush1.bf16.msra.mxu0 %v7156_v34 }
 0x50d   : > { %4187 = vmatprep.subr.bf16.mxu0 %v7164_v35 }
 0x510   : > { %4188 = vmatpush1.bf16.msra.mxu0 %v7162_v36  ;;  %v4394_v36 = vpop.permute.xlu0 %4393 }
 0x511   : > { %4189 = vmatprep.subr.bf16.mxu0 %v7170_v37 }
 0x514   : > { %4190 = vmatpush1.bf16.msra.mxu0 %v7168_v38  ;;  %v4399_v38 = vpop.permute.xlu1 %4398  ;;  %v4436_v44 = vpop.permute.xlu0 %4435 }
 0x515   : > { %4191 = vmatprep.subr.bf16.mxu0 %v7176_v41 }
 0x518   : > { %4192 = vmatpush1.bf16.msra.mxu0 %v7174_v42  ;;  %v4472_v42 = vld [vmem:[%s8276_s11] sm:$0xff] }
 0x519   : > { %4193 = vmatprep.subr.bf16.mxu0 %v7182_v45 }
 0x51c   : > { %4194 = vmatpush1.bf16.msra.mxu0 %v7180_v46  ;;  %v4441_v46 = vpop.permute.xlu1 %4440 }
 0x51d   : > { %6494 = vmatprep.subr.bf16.mxu0 %v7186_v49  ;;  %v4494_v49 = vld [vmem:[%s8277_s16 + $0x8] sm:$0xff] }
 0x5b2   : > { %v3632_v51 = vpop.f32.mrb[24].mxu0 }
 0x5b3   : > { %v3633_v52 = vadd.f32 %v3632_v51, %v3577_v50  ;;  %v3634_v53 = vpop.f32.mrb[25].mxu0  ;;  %v4560_v51 = vld [vmem:[%s8278_s18 + $0x8] sm:$0xff] }
 0x5b4   : > { %v3635_v55 = vadd.f32 %v3634_v53, %v3577_v50  ;;  %v3636_v56 = vpop.f32.mrb[26].mxu0  ;;  %v4559_v50 = vld [vmem:[%s8278_s18] sm:$0xff]  ;;  %v4562_v53 = vld [vmem:[%s8278_s18 + $0x18] sm:$0xff] }
 0x5b5   : > { %v3641_v57 = vmax.f32 %v3633_v52, 0.0  ;;  %v3637_v32 = vadd.f32 %v3636_v56, %v3582_v54  ;;  %v3638_v58 = vpop.f32.mrb[27].mxu0  ;;  %v4561_v52 = vld [vmem:[%s8278_s18 + $0x10] sm:$0xff]  ;;  %v6446_v56 = vld [vmem:[%s8279_s23 + $0x20] sm:$0xff] }
 0x5b6   : > { %v3642_v59 = vmax.f32 %v3635_v55, 0.0  ;;  %v3639_v31 = vadd.f32 %v3638_v58, %v3582_v54  ;;  %v7263_v54 = vmov 0.0  }
 0x5b7   : > { %v3643_v60 = vmax.f32 %v3637_v32, 0.0  ;;  %v3645_v62 = vmin.f32 %v3641_v57, 6.0 }
 0x5b8   : > { %v3644_v61 = vmax.f32 %v3639_v31, 0.0  ;;  %v3646_v0 = vmin.f32 %v3642_v59, 6.0  ;;  %v6447_v59 = vld [vmem:[%s8279_s23 + $0x28] sm:$0xff] }
 0x5b9   : > { %v3647_v63 = vmin.f32 %v3643_v60, 6.0 }
 0x5ba   : > { %v3648_v1 = vmin.f32 %v3644_v61, 6.0  ;;  %v6450_v61 = vld [vmem:[%s8279_s23 + $0x40] sm:$0xff] }
 0x5bb   : > { %v3649_v3 = vpack.c.bf16 %v3647_v63, %v3645_v62  ;;  %v6451_v62 = vld [vmem:[%s8279_s23 + $0x48] sm:$0xff]  ;;  %v6448_v63 = vld [vmem:[%s8279_s23 + $0x30] sm:$0xff] }
 0x5bc   : > { %v3650_v4 = vpack.c.bf16 %v3648_v1, %v3646_v0  ;;  %v6449_v0 = vld [vmem:[%s8279_s23 + $0x38] sm:$0xff]  ;;  %v6454_v1 = vld [vmem:[%s8279_s23 + $0x60] sm:$0xff] }
 0x5be   : > { %4195 = vmatprep.mubr.bf16.mxu0 %v3650_v4  ;;  %4238 = vmatprep.mubr.bf16.mxu1 %v3650_v4 }
 0x5bf   : > { %4196 = vmatmul.mubr.bf16.vlgmr.msra.gmra.mrb[28].mxu0 %v3649_v3  ;;  %4239 = vmatmul.mubr.bf16.vlgmr.msra.gmra.mrb[24].mxu1 %v3649_v3 }
 0x5c0   : > { %6495 = vmatpush3.bf16.msra.mxu0 %v7187_v5  ;;  %4281 = vmatprep.mubr.bf16.mxu0 %v3650_v4  ;;  %v6452_v4 = vld [vmem:[%s8279_s23 + $0x50] sm:$0xff]  ;;  %v6453_v5 = vld [vmem:[%s8279_s23 + $0x58] sm:$0xff] }
 0x5c1   : > { %6496 = vmatprep.subr.bf16.mxu0 %v7188_v6  ;;  %4745 = vmatprep.mubr.bf16.mxu1 %v7260_v2  ;;  %v6458_v6 = vld [vmem:[%s8279_s23 + $0x80] sm:$0xff] }
 0x5c4   : > { %6497 = vmatpush3.bf16.msra.mxu0 %v7189_v7  ;;  %v6459_v7 = vld [vmem:[%s8279_s23 + $0x88] sm:$0xff] }
 0x5c5   : > { %6498 = vmatprep.subr.bf16.mxu0 %v7190_v8  ;;  %v6456_v8 = vld [vmem:[%s8279_s23 + $0x70] sm:$0xff] }
 0x5c8   : > { %6499 = vmatpush3.bf16.msra.mxu0 %v7191_v9  ;;  %v6457_v9 = vld [vmem:[%s8279_s23 + $0x78] sm:$0xff] }
 0x5c9   : > { %6500 = vmatprep.subr.bf16.mxu0 %v7192_v10  ;;  %v6462_v10 = vld [vmem:[%s8279_s23 + $0xa0] sm:$0xff] }
 0x5cc   : > { %6501 = vmatpush3.bf16.msra.mxu0 %v7193_v28  ;;  %v6463_v28 = vld [vmem:[%s8279_s23 + $0xa8] sm:$0xff] }
 0x5cd   : > { %6502 = vmatprep.subr.bf16.mxu0 %v7194_v29  ;;  %v6460_v29 = vld [vmem:[%s8279_s23 + $0x90] sm:$0xff] }
 0x5d0   : > { %6503 = vmatpush3.bf16.msra.mxu0 %v7195_v11  ;;  %v6461_v11 = vld [vmem:[%s8279_s23 + $0x98] sm:$0xff] }
 0x5d1   : > { %6504 = vmatprep.subr.bf16.mxu0 %v7196_v12  ;;  %v6466_v12 = vld [vmem:[%s8279_s23 + $0xc0] sm:$0xff] }
 0x5d4   : > { %6505 = vmatpush3.bf16.msra.mxu0 %v7197_v13  ;;  %v6467_v13 = vld [vmem:[%s8279_s23 + $0xc8] sm:$0xff] }
 0x5d5   : > { %6506 = vmatprep.subr.bf16.mxu0 %v7198_v14  ;;  %v6464_v14 = vld [vmem:[%s8279_s23 + $0xb0] sm:$0xff] }
 0x5d8   : > { %6507 = vmatpush3.bf16.msra.mxu0 %v7199_v15  ;;  %v6465_v15 = vld [vmem:[%s8279_s23 + $0xb8] sm:$0xff] }
 0x5d9   : > { %6508 = vmatprep.subr.bf16.mxu0 %v7200_v16  ;;  %v6470_v16 = vld [vmem:[%s8279_s23 + $0xe0] sm:$0xff] }
 0x5dc   : > { %6509 = vmatpush3.bf16.msra.mxu0 %v7201_v17  ;;  %v6471_v17 = vld [vmem:[%s8279_s23 + $0xe8] sm:$0xff] }
 0x5dd   : > { %6534 = vmatprep.subr.bf16.mxu0 %v7263_v54 }
 0x5df   : > { %4282 = vmatmul.mubr.bf16.vlgmr.msra.gmra.mrb[32].mxu0 %v3649_v3  ;;  %v6455_v3 = vld [vmem:[%s8279_s23 + $0x68] sm:$0xff] }
 0x5e0   : > { %6536 = vmatprep.mubr.msk.bf16.mxu0 %vm7264_vm6, %v7263_v54 }
 0x692   : > { %v7919_v22 = vpop.f32.mrb[28].mxu0  ;;  %v7921_v23 = vpop.f32.mrb[24].mxu1 }
 0x693   : > { %v4317_v24 = vmul.f32 %v4310_v18, %v7919_v22  ;;  %v7924_v25 = vpop.f32.mrb[29].mxu0  ;;  %v7926_v26 = vpop.f32.mrb[25].mxu1  ;;  %v4401_v37 = vmul.f32 %v4394_v36, %v7921_v23  ;;  %v6468_v18 = vld [vmem:[%s8279_s23 + $0xd0] sm:$0xff]  ;;  %v4767_v36 = vld [vmem:[%s8279_s23 + $0x8] sm:$0xff] }
 0x694   : > { %v7928_v27 = vpop.f32.mrb[30].mxu0  ;;  %v7930_v30 = vpop.f32.mrb[26].mxu1  ;;  %v4359_v40 = vmul.f32 %v4352_v21, %v7924_v25  ;;  %v4443_v45 = vmul.f32 %v4436_v44, %v7926_v26  ;;  %v6472_v21 = vld [vmem:[%s8279_s23 + $0xf0] sm:$0xff] }
 0x695   : > { %v4318_v33 = vmul.f32 %v4315_v19, %v7928_v27  ;;  %v7933_v34 = vpop.f32.mrb[27].mxu1  ;;  %4321 = vrot.lane.b32.xlu0 %v4317_v24, %s8253_s15  ;;  %v7936_v35 = vpop.f32.mrb[31].mxu0  ;;  %v4402_v39 = vmul.f32 %v4399_v38, %v7930_v30  ;;  %v6469_v19 = vld [vmem:[%s8279_s23 + $0xd8] sm:$0xff]  ;;  %v4766_v24 = vld [vmem:[%s8279_s23] sm:$0xff]  ;;  %v4768_v38 = vld [vmem:[%s8279_s23 + $0x10] sm:$0xff] }
 0x696   : > { %v4360_v41 = vmul.f32 %v4357_v20, %v7936_v35  ;;  %v4444_v47 = vmul.f32 %v4441_v46, %v7933_v34  ;;  %v6473_v20 = vld [vmem:[%s8279_s23 + $0xf8] sm:$0xff]  ;;  %v6476_v44 = vld [vmem:[%s8279_s23 + $0x110] sm:$0xff] }
 0x697   : > { %4323 = vrot.lane.b32.xlu1 %v4318_v33, %s8253_s15  ;;  %v4295_v33 = vpop.permute.xlu0 %4294  ;;  %v6477_v46 = vld [vmem:[%s8279_s23 + $0x118] sm:$0xff] }
 0x699   : > { %4405 = vrot.lane.b32.xlu0 %v4401_v37, %s8253_s15  ;;  %v4300_v37 = vpop.permute.xlu1 %4299 }
 0x69b   : > { %4407 = vrot.lane.b32.xlu1 %v4402_v39, %s8253_s15  ;;  %v4769_v39 = vld [vmem:[%s8279_s23 + $0x18] sm:$0xff] }
 0x69d   : > { %4363 = vrot.lane.b32.xlu0 %v4359_v40, %s8253_s15  ;;  %v4335_v40 = vpop.permute.xlu0 %4334 }
 0x69f   : > { %4365 = vrot.lane.b32.xlu1 %v4360_v41, %s8253_s15  ;;  %v6474_v41 = vld [vmem:[%s8279_s23 + $0x100] sm:$0xff] }
 0x6a1   : > { %4476 = vperm.xlu0 %6648, %v4472_v42   ;;  %v4340_v42 = vpop.permute.xlu1 %4339 }
 0x6a3   : > { %4481 = vperm.xlu1 %6649, %v4473_v43   ;;  %v6475_v43 = vld [vmem:[%s8279_s23 + $0x108] sm:$0xff] }
 0x6a5   : > { %4447 = vrot.lane.b32.xlu0 %v4443_v45, %s8253_s15  ;;  %v4377_v45 = vpop.permute.xlu0 %4376 }
 0x6a7   : > { %4449 = vrot.lane.b32.xlu1 %v4444_v47, %s8253_s15  ;;  %v4382_v47 = vpop.permute.xlu1 %4381 }
 0x6a9   : > { %4497 = vperm.xlu0 %6648, %v4493_v48   ;;  %v5170_v48 = vld [vmem:[%s8280_s22] sm:$0xff] }
 0x6ab   : > { %4502 = vperm.xlu1 %6649, %v4494_v49   ;;  %v5171_v49 = vld [vmem:[%s8280_s22 + $0x8] sm:$0xff] }
 0x6ad   : > { %4565 = vperm.xlu0 %6648, %v4559_v50   ;;  %v4419_v50 = vpop.permute.xlu0 %4418 }
 0x6af   : > { %4570 = vperm.xlu1 %6649, %v4560_v51   ;;  %v5172_v51 = vld [vmem:[%s8280_s22 + $0x10] sm:$0xff] }
 0x6b1   : > { %4575 = vperm.xlu0 %6648, %v4561_v52   ;;  %v4424_v52 = vpop.permute.xlu1 %4423 }
 0x6b2   : > { %v6510_v55 = vpop.f32.mrb[32].mxu0 }
 0x6b3   : > { %v6511_v57 = vpop.f32.mrb[33].mxu0  ;;  %4580 = vperm.xlu1 %6649, %v4562_v53   ;;  %v5173_v53 = vld [vmem:[%s8280_s22 + $0x18] sm:$0xff] }
 0x6b4   : > { %v7961_v32 = vadd.f32 %v6511_v57, %v6510_v55  ;;  %v6513_v58 = vpop.f32.mrb[34].mxu0  ;;  %v4461_v55 = vpop.permute.xlu0 %4460  ;;  %v4302_v57 = vmul.f32 %v4295_v33, %v7919_v22  ;;  %v4385_v22 = vmul.f32 %v4382_v47, %v7930_v30 }
 0x6b5   : > { %v6514_v31 = vpop.f32.mrb[35].mxu0  ;;  %4801 = vperm.xlu0 %6648, %v6446_v56   ;;  %v4466_v56 = vpop.permute.xlu1 %4465 }
 0x6b6   : > { %v7966_v60 = vadd.f32 %v6514_v31, %v6513_v58  ;;  %v4303_v31 = vmul.f32 %v4300_v37, %v7928_v27  ;;  %v4426_v27 = vmul.f32 %v4419_v50, %v7926_v26  ;;  %v7204_v50 = vld [vmem:[%s8282_s1 + $0x8] sm:$0xff]  }
 0x6b7   : > { %4806 = vperm.xlu1 %6649, %v6447_v59   ;;  %v4342_v59 = vmul.f32 %v4335_v40, %v7924_v25  ;;  %v7207_v40 = vld [vmem:[%s8283_s28 + $0x4] ss:$8 sps:$4 sm:$0xff]  }
 0x6b8   : > { %4713 = vmatprep.subr.bf16.mxu1 %v7207_v40 }
 0x6b9   : > { %4850 = vperm.xlu0 %6648, %v6450_v61  }
 0x6bb   : > { %4855 = vperm.xlu1 %6649, %v6451_v62  }
 0x6bd   : > { %4811 = vperm.xlu0 %6648, %v6448_v63   ;;  %v4343_v63 = vmul.f32 %v4340_v42, %v7936_v35  ;;  %v4427_v35 = vmul.f32 %v4424_v52, %v7933_v34  ;;  %v7208_v52 = vld [vmem:[%s8283_s28 + $0x10] ss:$8 sps:$4 sm:$0xff]  }
 0x6bf   : > { %4816 = vperm.xlu1 %6649, %v6449_v0  }
 0x6c1   : > { %4899 = vperm.xlu0 %6648, %v6454_v1  }
 0x6c3   : > { %4904 = vperm.xlu1 %6649, %v6455_v3  }
 0x6c5   : > { %4860 = vperm.xlu0 %6648, %v6452_v4  }
 0x6c7   : > { %4865 = vperm.xlu1 %6649, %v6453_v5  }
 0x6c9   : > { %4948 = vperm.xlu0 %6648, %v6458_v6  }
 0x6cb   : > { %4953 = vperm.xlu1 %6649, %v6459_v7   ;;  %v4384_v7 = vmul.f32 %v4377_v45, %v7921_v23  ;;  %v4468_v23 = vmul.f32 %v7961_v32, %v4461_v55  ;;  %v7203_v32 = vld [vmem:[%s8282_s1] sm:$0xff]   ;;  %s8290_s1 = smov 16  }
 0x6cc   : > { %v7211_v55 = vld [vmem:[%s8283_s28 + $0x20] ss:$8 sps:$4 sm:$0xff]  }
 0x6cd   : > { %4909 = vperm.xlu0 %6648, %v6456_v8  }
 0x6cf   : > { %4914 = vperm.xlu1 %6649, %v6457_v9  }
 0x6d1   : > { %4997 = vperm.xlu0 %6648, %v6462_v10  }
 0x6d3   : > { %5002 = vperm.xlu1 %6649, %v6463_v28  }
 0x6d5   : > { %4958 = vperm.xlu0 %6648, %v6460_v29  }
 0x6d7   : > { %4963 = vperm.xlu1 %6649, %v6461_v11  }
 0x6d9   : > { %5046 = vperm.xlu0 %6648, %v6466_v12  }
 0x6db   : > { %5051 = vperm.xlu1 %6649, %v6467_v13  }
 0x6dd   : > { %5007 = vperm.xlu0 %6648, %v6464_v14  }
 0x6df   : > { %5012 = vperm.xlu1 %6649, %v6465_v15  }
 0x6e1   : > { %5095 = vperm.xlu0 %6648, %v6470_v16  }
 0x6e3   : > { %5100 = vperm.xlu1 %6649, %v6471_v17  }
 0x6e5   : > { %5056 = vperm.xlu0 %6648, %v6468_v18   ;;  %v4469_v18 = vmul.f32 %v7966_v60, %v4466_v56  ;;  %v7205_v60 = vld [vmem:[%s8283_s28] ss:$8 sps:$4 sm:$0xff]   ;;  %v7216_v56 = vld [vmem:[%s8283_s28 + $0x34] ss:$8 sps:$4 sm:$0xff]  }
 0x6e6   : > { %4714 = vmatpush1.bf16.msra.mxu1 %v7205_v60 }
 0x6e7   : > { %5061 = vperm.xlu1 %6649, %v6469_v19  }
 0x6e9   : > { %5105 = vperm.xlu0 %6648, %v6472_v21  }
 0x6eb   : > { %5110 = vperm.xlu1 %6649, %v6473_v20  }
 0x6ed   : > { %4772 = vperm.xlu0 %6648, %v4766_v24  }
 0x6ef   : > { %4777 = vperm.xlu1 %6649, %v4767_v36  }
 0x6f1   : > { %4782 = vperm.xlu0 %6648, %v4768_v38  }
 0x6f3   : > { %4787 = vperm.xlu1 %6649, %v4769_v39   ;;  %v7202_v39 = vld [vmem:[%s8281_s26] sm:$0xff]   ;;  %s7268_s26 = smov 48  }
 0x6f5   : > { %5144 = vperm.xlu0 %6648, %v6474_v41  }
 0x6f7   : > { %5149 = vperm.xlu1 %6649, %v6475_v43  }
 0x6f9   : > { %5154 = vperm.xlu0 %6648, %v6476_v44  }
 0x6fb   : > { %5159 = vperm.xlu1 %6649, %v6477_v46  }
 0x6fd   : > { %5176 = vperm.xlu0 %6648, %v5170_v48  }
 0x6ff   : > { %5181 = vperm.xlu1 %6649, %v5171_v49  }
 0x701   : > { %5186 = vperm.xlu0 %6648, %v5172_v51   ;;  %v7210_v51 = vld [vmem:[%s8283_s28 + $0x14] ss:$8 sps:$4 sm:$0xff]  }
 0x702   : > { %4715 = vmatprep.subr.bf16.mxu1 %v7210_v51 }
 0x703   : > { %5191 = vperm.xlu1 %6649, %v5173_v53   ;;  %4716 = vmatpush1.bf16.msra.mxu1 %v7208_v52  ;;  %v7213_v53 = vld [vmem:[%s8283_s28 + $0x24] ss:$8 sps:$4 sm:$0xff]  }
 0x704   : > { %4717 = vmatprep.subr.bf16.mxu1 %v7213_v53 }
 0x707   : > { %v4322_v58 = vpop.permute.xlu0 %4321  ;;  %4718 = vmatpush1.bf16.msra.mxu1 %v7211_v55 }
 0x708   : > { %v4327_v61 = vadd.f32 %v4322_v58, %v4302_v57  ;;  %v7214_v57 = vld [vmem:[%s8283_s28 + $0x30] ss:$8 sps:$4 sm:$0xff]   ;;  %4719 = vmatprep.subr.bf16.mxu1 %v7216_v56 }
 0x709   : > { %v4324_v62 = vpop.permute.xlu1 %4323 }
 0x70a   : > { %v4328_v0 = vadd.f32 %v4324_v62, %v4303_v31  ;;  %v4344_v1 = vadd.f32 %v4342_v59, %v4327_v61 }
 0x70b   : > { %v4406_v3 = vpop.permute.xlu0 %4405  ;;  %4720 = vmatpush1.bf16.msra.mxu1 %v7214_v57 }
 0x70c   : > { %v4345_v4 = vadd.f32 %v4343_v63, %v4328_v0  ;;  %6568 = vmatprep.subr.bf16.mxu1 %v7263_v54 }
 0x70d   : > { %v4408_v5 = vpop.permute.xlu1 %4407 }
 0x70f   : > { %v4364_v6 = vpop.permute.xlu0 %4363 }
 0x710   : > { %v4369_v8 = vadd.f32 %v4364_v6, %v4344_v1 }
 0x711   : > { %v4366_v9 = vpop.permute.xlu1 %4365 }
 0x712   : > { %v4386_v10 = vadd.f32 %v4384_v7, %v4369_v8  ;;  %v4370_v25 = vadd.f32 %v4366_v9, %v4345_v4 }
 0x714   : > { %v4387_v28 = vadd.f32 %v4385_v22, %v4370_v25  ;;  %v4411_v29 = vadd.f32 %v4406_v3, %v4386_v10 }
 0x716   : > { %v4428_v11 = vadd.f32 %v4426_v27, %v4411_v29  ;;  %v4412_v12 = vadd.f32 %v4408_v5, %v4387_v28 }
 0x718   : > { %v4429_v13 = vadd.f32 %v4427_v35, %v4412_v12 }
 0x720   : > { %v4477_v14 = vpop.permute.xlu0 %4476 }
 0x722   : > { %v4482_v15 = vpop.permute.xlu1 %4481 }
 0x724   : > { %v4448_v16 = vpop.permute.xlu0 %4447 }
 0x725   : > { %v4453_v17 = vadd.f32 %v4448_v16, %v4428_v11 }
 0x726   : > { %v4450_v30 = vpop.permute.xlu1 %4449 }
 0x727   : > { %v4470_v26 = vadd.f32 %v4468_v23, %v4453_v17  ;;  %v4454_v19 = vadd.f32 %v4450_v30, %v4429_v13 }
 0x728   : > { %v4498_v42 = vpop.permute.xlu0 %4497 }
 0x729   : > { %v4484_v21 = vadd.f32 %v4477_v14, %v4470_v26  ;;  %v4471_v34 = vadd.f32 %v4469_v18, %v4454_v19 }
 0x72a   : > { %v4503_v44 = vpop.permute.xlu1 %4502 }
 0x72b   : > { %v4486_v20 = vmax.f32 %v4484_v21, 0.0  ;;  %v4485_v24 = vadd.f32 %v4482_v15, %v4471_v34 }
 0x72c   : > { %v4566_v58 = vpop.permute.xlu0 %4565 }
 0x72d   : > { %v4487_v33 = vmax.f32 %v4485_v24, 0.0  ;;  %v4488_v36 = vmin.f32 %v4486_v20, 6.0 }
 0x72e   : > { %v4571_v59 = vpop.permute.xlu1 %4570 }
 0x72f   : > { %v4489_v37 = vmin.f32 %v4487_v33, 6.0 }
 0x730   : > { %v4576_v31 = vpop.permute.xlu0 %4575 }
 0x731   : > { %v4492_v38 = vpack.c.bf16 %v4489_v37, %v4488_v36 }
 0x732   : > { %v4581_v0 = vpop.permute.xlu1 %4580 }
 0x733   : > { %6535 = vmatpush3.bf16.msra.mxu0 %v4492_v38 }
 0x734   : > { %v4802_v11 = vpop.permute.xlu0 %4801 }
 0x736   : > { %6537 = vmatmul.mubr.msk.bf16.vlgmr.msra.gmra.mrb[36].mxu0 %vm3521_vm5, %v7202_v39  ;;  %v4807_v12 = vpop.permute.xlu1 %4806 }
 0x737   : > { %6542 = vmatprep.mubr.msk.bf16.mxu0 %vm3521_vm5, %v7203_v32 }
 0x738   : > { %v4851_v13 = vpop.permute.xlu0 %4850 }
 0x73a   : > { %v4856_v14 = vpop.permute.xlu1 %4855 }
 0x73c   : > { %v8034_v15 = vpop.permute.xlu0 %4811 }
 0x73e   : > { %v8036_v16 = vpop.permute.xlu1 %4816 }
 0x740   : > { %v4900_v23 = vpop.permute.xlu0 %4899 }
 0x742   : > { %v4905_v17 = vpop.permute.xlu1 %4904 }
 0x744   : > { %v8038_v30 = vpop.permute.xlu0 %4860 }
 0x746   : > { %v8040_v18 = vpop.permute.xlu1 %4865 }
 0x748   : > { %v4949_v26 = vpop.permute.xlu0 %4948 }
 0x74c   : > { %v8042_v19 = vpop.permute.xlu0 %4909 }
 0x750   : > { %v4998_v34 = vpop.permute.xlu0 %4997 }
 0x754   : > { %v8046_v24 = vpop.permute.xlu0 %4958 }
 0x758   : > { %v5047_v36 = vpop.permute.xlu0 %5046 }
 0x75c   : > { %v8050_v38 = vpop.permute.xlu0 %5007 }
 0x760   : > { %v5096_v32 = vpop.permute.xlu0 %5095 }
 0x764   : > { %v8054_v40 = vpop.permute.xlu0 %5056 }
 0x809   : > { %v4547_v41 = vpop.f32.mrb[36].mxu0 }
 0x80a   : > { %v6538_v43 = vpop.f32.mrb[37].mxu0  ;;  %v4548_v46 = vadd.f32 %v4547_v41, %v4498_v42  ;;  %v8058_v42 = vpop.permute.xlu0 %5105 }
 0x80b   : > { %v4550_v45 = vpop.f32.mrb[38].mxu0 }
 0x80c   : > { %v4551_v47 = vadd.f32 %v4550_v45, %v4503_v44  ;;  %v6539_v48 = vpop.f32.mrb[39].mxu0 }
 0x80e   : > { %v4558_v49 = vpack.c.bf16 %v4551_v47, %v4548_v46  ;;  %v8062_v44 = vpop.permute.xlu0 %4772 }
 0x810   : > { %6540 = vmatprep.subr.bf16.mxu0 %v4558_v49 }
 0x811   : > { %6541 = vmatpush3.bf16.msra.mxu0 %v4558_v49 }
 0x812   : > { %v8066_v46 = vpop.permute.xlu0 %4782 }
 0x814   : > { %6543 = vmatmul.mubr.msk.bf16.vlgmr.msra.gmra.mrb[40].mxu0 %vm3521_vm5, %v7204_v50 }
 0x816   : > { %v8077_v52 = vpop.permute.xlu0 %5144 }
 0x8e7   : > { %v6544_v61 = vpop.f32.mrb[40].mxu0 }
 0x8e8   : > { %v4642_v62 = vadd.f32 %v6544_v61, %v4576_v31  ;;  %v4633_v63 = vpop.f32.mrb[41].mxu0  ;;  %v5155_v31 = vpop.permute.xlu0 %5154 }
 0x8e9   : > { %v4634_v1 = vadd.f32 %v4633_v63, %v4566_v58  ;;  %v6545_v3 = vpop.f32.mrb[42].mxu0 }
 0x8ea   : > { %v4650_v4 = vmax.f32 %v4642_v62, 0.0  ;;  %v4645_v5 = vadd.f32 %v6545_v3, %v4581_v0  ;;  %v4636_v6 = vpop.f32.mrb[43].mxu0 }
 0x8eb   : > { %v4648_v7 = vmax.f32 %v4634_v1, 0.0  ;;  %v4637_v8 = vadd.f32 %v4636_v6, %v4571_v59 }
 0x8ec   : > { %v4651_v9 = vmax.f32 %v4645_v5, 0.0  ;;  %v4654_v10 = vmin.f32 %v4650_v4, 6.0 }
 0x8ed   : > { %v4649_v22 = vmax.f32 %v4637_v8, 0.0  ;;  %v4652_v27 = vmin.f32 %v4648_v7, 6.0 }
 0x8ee   : > { %v4655_v25 = vmin.f32 %v4651_v9, 6.0 }
 0x8ef   : > { %v4653_v28 = vmin.f32 %v4649_v22, 6.0 }
 0x8f0   : > { %v4657_v29 = vpack.c.bf16 %v4655_v25, %v4654_v10 }
 0x8f1   : > { %v4656_v35 = vpack.c.bf16 %v4653_v28, %v4652_v27 }
 0x8f3   : > { %6444 = vmatmul.mubr.msk.bf16.vlgmr.msra.gmra.mrb[28].mxu1 %vm4706_vm7, %v4656_v35 }
 0x8f4   : > { %4755 = vmatprep.mubr.bf16.mxu1 %v7260_v2  ;;  %v4954_v2 = vpop.permute.xlu1 %4953 }
 0x8f8   : > { %v8044_v21 = vpop.permute.xlu1 %4914 }
 0x8fb   : > { %6445 = vmatmul.mubr.msk.bf16.gmra.mrb[32].mxu1 %vm4706_vm7, %v4657_v29 }
 0x8fc   : > { %6570 = vmatprep.mubr.msk.bf16.mxu1 %vm7264_vm6, %v7263_v54  ;;  %v5003_v20 = vpop.permute.xlu1 %5002 }
 0x900   : > { %v8048_v33 = vpop.permute.xlu1 %4963 }
 0x904   : > { %v5052_v37 = vpop.permute.xlu1 %5051 }
 0x908   : > { %v8052_v39 = vpop.permute.xlu1 %5012 }
 0x90c   : > { %v5101_v60 = vpop.permute.xlu1 %5100 }
 0x910   : > { %v8056_v41 = vpop.permute.xlu1 %5061 }
 0x914   : > { %v8060_v43 = vpop.permute.xlu1 %5110 }
 0x918   : > { %v8064_v45 = vpop.permute.xlu1 %4777 }
 0x91c   : > { %v8068_v47 = vpop.permute.xlu1 %4787 }
 0x920   : > { %v8083_v56 = vpop.permute.xlu1 %5149 }
 0x924   : > { %v5160_v1 = vpop.permute.xlu1 %5159 }
 0x9c6   : > { %v8070_v48 = vpop.f32.mrb[28].mxu1 }
 0x9c7   : > { %v8072_v49 = vpop.f32.mrb[29].mxu1  ;;  %v4819_v50 = vmul.f32 %v4802_v11, %v8070_v48  ;;  %v4868_v57 = vmul.f32 %v4851_v13, %v8070_v48  ;;  %v4917_v62 = vmul.f32 %v4900_v23, %v8070_v48  ;;  %v4966_v6 = vmul.f32 %v4949_v26, %v8070_v48 }
 0x9c8   : > { %v8075_v51 = vpop.f32.mrb[30].mxu1  ;;  %v5015_v8 = vmul.f32 %v4998_v34, %v8070_v48  ;;  %v5064_v22 = vmul.f32 %v5047_v36, %v8070_v48  ;;  %v5113_v25 = vmul.f32 %v5096_v32, %v8070_v48  ;;  %v5182_v36 = vpop.permute.xlu1 %5181 }
 0x9c9   : > { %4827 = vrot.lane.b32.xlu0 %v4819_v50, %s7265_s2  ;;  %v8080_v53 = vpop.f32.mrb[31].mxu1  ;;  %v4820_v55 = vmul.f32 %v4807_v12, %v8075_v51  ;;  %v4869_v58 = vmul.f32 %v4856_v14, %v8075_v51  ;;  %v4918_v4 = vmul.f32 %v4905_v17, %v8075_v51  ;;  %v4967_v7 = vmul.f32 %v4954_v2, %v8075_v51 }
 0x9ca   : > { %v5016_v9 = vmul.f32 %v5003_v20, %v8075_v51  ;;  %v5065_v10 = vmul.f32 %v5052_v37, %v8075_v51  ;;  %v5114_v27 = vmul.f32 %v5101_v60, %v8075_v51 }
 0x9cb   : > { %4829 = vrot.lane.b32.xlu1 %v4820_v55, %s7265_s2 }
 0x9cd   : > { %4876 = vrot.lane.b32.xlu0 %v4868_v57, %s7266_s0  ;;  %v4791_v57 = vmul.f32 %v8064_v45, %v8075_v51 }
 0x9ce   : > { %v8089_v59 = vpop.f32.mrb[32].mxu1 }
 0x9cf   : > { %4878 = vrot.lane.b32.xlu1 %v4869_v58, %s7266_s0  ;;  %v4759_v61 = vpop.f32.mrb[33].mxu1  ;;  %v4821_v28 = vmul.f32 %v8034_v15, %v8089_v59  ;;  %v4870_v35 = vmul.f32 %v8038_v30, %v8089_v59  ;;  %v4919_v12 = vmul.f32 %v8042_v19, %v8089_v59  ;;  %v4968_v14 = vmul.f32 %v8046_v24, %v8089_v59 }
 0x9d0   : > { %v8093_v63 = vmul.f32 %v5155_v31, %v4759_v61  ;;  %v8095_v0 = vpop.f32.mrb[34].mxu1  ;;  %v5066_v17 = vmul.f32 %v8054_v40, %v8089_v59 }
 0x9d1   : > { %4925 = vrot.lane.b32.xlu0 %v4917_v62, %s8251_s20  ;;  %v4763_v3 = vpop.f32.mrb[35].mxu1  ;;  %v4822_v29 = vmul.f32 %v8036_v16, %v8095_v0  ;;  %v4871_v11 = vmul.f32 %v8040_v18, %v8095_v0  ;;  %v4920_v13 = vmul.f32 %v8044_v21, %v8095_v0  ;;  %v4969_v15 = vmul.f32 %v8048_v33, %v8095_v0  ;;  %v5177_v33 = vpop.permute.xlu0 %5176 }
 0x9d2   : > { %v8099_v5 = vmul.f32 %v5160_v1, %v4763_v3  ;;  %v5017_v16 = vmul.f32 %v8050_v38, %v8089_v59  ;;  %v5018_v23 = vmul.f32 %v8052_v39, %v8095_v0  ;;  %v5067_v30 = vmul.f32 %v8056_v41, %v8095_v0  ;;  %v8169_v38 = vpop.permute.xlu1 %5191 }
 0x9d3   : > { %4927 = vrot.lane.b32.xlu1 %v4918_v4, %s8251_s20  ;;  %s8257_s20 = smov 32   ;;  %v5115_v18 = vmul.f32 %v8058_v42, %v8089_v59  ;;  %v5116_v26 = vmul.f32 %v8060_v43, %v8095_v0  ;;  %v4790_v43 = vmul.f32 %v8062_v44, %v8070_v48 }
 0x9d5   : > { %4974 = vrot.lane.b32.xlu0 %v4966_v6, %s8253_s15  ;;  %v8167_v37 = vpop.permute.xlu0 %5186 }
 0x9d7   : > { %4976 = vrot.lane.b32.xlu1 %v4967_v7, %s8253_s15  ;;  %s8255_s15 = smov 16  }
 0x9d9   : > { %5023 = vrot.lane.b32.xlu0 %v5015_v8, %s7268_s26 }
 0x9db   : > { %5025 = vrot.lane.b32.xlu1 %v5016_v9, %s7268_s26 }
 0x9dd   : > { %5072 = vrot.lane.b32.xlu0 %v5064_v22, %s8257_s20 }
 0x9df   : > { %5074 = vrot.lane.b32.xlu1 %v5065_v10, %s8257_s20  ;;  %s8286_s20 = smov 64  }
 0x9e1   : > { %5121 = vrot.lane.b32.xlu0 %v5113_v25, %s8255_s15 }
 0x9e3   : > { %5123 = vrot.lane.b32.xlu1 %v5114_v27, %s8255_s15  ;;  %s8284_s15 = smov 80   ;;  %v5162_v27 = vmul.f32 %v8077_v52, %v8072_v49 }
 0x9e5   : > { %4831 = vrot.lane.b32.xlu0 %v4821_v28, %s7265_s2 }
 0x9e7   : > { %4833 = vrot.lane.b32.xlu1 %v4822_v29, %s7265_s2  ;;  %s8285_s2 = sld [smem:[#allocation12_spill]]  ;;  %v5163_v29 = vmul.f32 %v8083_v56, %v8080_v53 }
 0x9e9   : > { %4880 = vrot.lane.b32.xlu0 %v4870_v35, %s7266_s0 }
 0x9eb   : > { %4882 = vrot.lane.b32.xlu1 %v4871_v11, %s7266_s0  ;;  %s8287_s0 = sld [smem:[#allocation11_spill]] }
 0x9ed   : > { %4929 = vrot.lane.b32.xlu0 %v4919_v12, %s8284_s15  ;;  %v5212_v2 = vld [vmem:[%s8285_s2] sm:$0xff]  ;;  %v5213_v19 = vld [vmem:[%s8285_s2 + $0x8] sm:$0xff]  ;;  %v5214_v34 = vld [vmem:[%s8285_s2 + $0x10] sm:$0xff] }
 0x9ee   : > { %v5215_v20 = vld [vmem:[%s8285_s2 + $0x18] sm:$0xff] }
 0x9ef   : > { %4931 = vrot.lane.b32.xlu1 %v4920_v13, %s8284_s15  ;;  %s8288_s15 = smov 32  }
 0x9f1   : > { %4978 = vrot.lane.b32.xlu0 %v4968_v14, %s8286_s20  ;;  %v7217_v21 = vld [vmem:[%s8287_s0] sm:$0xff]  }
 0x9f2   : > { %6550 = vmatprep.mubr.msk.bf16.mxu0 %vm5246_vm8, %v7217_v21  ;;  %v4792_v21 = vmul.f32 %v8066_v46, %v8089_v59 }
 0x9f3   : > { %4980 = vrot.lane.b32.xlu1 %v4969_v15, %s8286_s20  ;;  %s8289_s20 = sld [smem:[#allocation14_spill]] }
 0x9f5   : > { %5027 = vrot.lane.b32.xlu0 %v5017_v16, %s7268_s26 }
 0x9f7   : > { %5029 = vrot.lane.b32.xlu1 %v5018_v23, %s7268_s26  ;;  %s8292_s26 = sld [smem:[#allocation16_spill]] }
 0x9f9   : > { %5076 = vrot.lane.b32.xlu0 %v5066_v17, %s8288_s15  ;;  %v5348_v24 = vld [vmem:[%s8289_s20] sm:$0xf]  ;;  %s8294_s20 = sld [smem:[#allocation17_spill]] }
 0x9fb   : > { %5078 = vrot.lane.b32.xlu1 %v5067_v30, %s8288_s15  ;;  %s8293_s15 = sld [smem:[#allocation15_spill]] }
 0x9fd   : > { %5125 = vrot.lane.b32.xlu0 %v5115_v18, %s8290_s1 }
 0x9ff   : > { %5127 = vrot.lane.b32.xlu1 %v5116_v26, %s8290_s1  ;;  %s8291_s1 = sld [smem:[#allocation13_spill]] }
 0xa01   : > { %5218 = vperm.xlu0 %6648, %v5212_v2  }
 0xa03   : > { %5223 = vperm.xlu1 %6649, %v5213_v19  }
 0xa05   : > { %5228 = vperm.xlu0 %6648, %v5214_v34   ;;  %v4793_v34 = vmul.f32 %v8068_v47, %v8095_v0 }
 0xa07   : > { %5233 = vperm.xlu1 %6649, %v5215_v20  }
 0xa0b   : > { %5351 = vperm.xlu1 %6649, %v5348_v24  }
 0xa3b   : > { %v4828_v39 = vpop.permute.xlu0 %4827 }
 0xa3c   : > { %v4839_v55 = vadd.f32 %v4828_v39, %v4790_v43 }
 0xa3d   : > { %v4830_v32 = vpop.permute.xlu1 %4829 }
 0xa3e   : > { %v4840_v31 = vadd.f32 %v4830_v32, %v4791_v57 }
 0xa3f   : > { %v4877_v60 = vpop.permute.xlu0 %4876 }
 0xa40   : > { %v4888_v61 = vadd.f32 %v4877_v60, %v4839_v55 }
 0xa41   : > { %v4879_v40 = vpop.permute.xlu1 %4878 }
 0xa42   : > { %v4889_v1 = vadd.f32 %v4879_v40, %v4840_v31 }
 0xa43   : > { %v4926_v41 = vpop.permute.xlu0 %4925 }
 0xa44   : > { %v4937_v3 = vadd.f32 %v4926_v41, %v4888_v61 }
 0xa45   : > { %v4928_v42 = vpop.permute.xlu1 %4927 }
 0xa46   : > { %v4938_v6 = vadd.f32 %v4928_v42, %v4889_v1 }
 0xa47   : > { %v4975_v50 = vpop.permute.xlu0 %4974 }
 0xa48   : > { %v4986_v7 = vadd.f32 %v4975_v50, %v4937_v3 }
 0xa49   : > { %v4977_v58 = vpop.permute.xlu1 %4976 }
 0xa4a   : > { %v4987_v9 = vadd.f32 %v4977_v58, %v4938_v6 }
 0xa4b   : > { %v5024_v62 = vpop.permute.xlu0 %5023 }
 0xa4c   : > { %v5035_v22 = vadd.f32 %v5024_v62, %v4986_v7 }
 0xa4d   : > { %v5026_v4 = vpop.permute.xlu1 %5025 }
 0xa4e   : > { %v5036_v25 = vadd.f32 %v5026_v4, %v4987_v9 }
 0xa4f   : > { %v5073_v8 = vpop.permute.xlu0 %5072 }
 0xa50   : > { %v5084_v44 = vadd.f32 %v5073_v8, %v5035_v22  ;;  %v7218_v22 = vld [vmem:[%s8287_s0 + $0x8] sm:$0xff]  }
 0xa51   : > { %v5075_v10 = vpop.permute.xlu1 %5074 }
 0xa52   : > { %v5085_v45 = vadd.f32 %v5075_v10, %v5036_v25 }
 0xa53   : > { %v5122_v48 = vpop.permute.xlu0 %5121 }
 0xa54   : > { %v5133_v51 = vadd.f32 %v5122_v48, %v5084_v44 }
 0xa55   : > { %v5124_v28 = vpop.permute.xlu1 %5123 }
 0xa56   : > { %v5166_v35 = vadd.f32 %v5162_v27, %v5133_v51  ;;  %v5134_v11 = vadd.f32 %v5124_v28, %v5085_v45 }
 0xa57   : > { %v4832_v12 = vpop.permute.xlu0 %4831 }
 0xa58   : > { %v5194_v13 = vadd.f32 %v5177_v33, %v5166_v35  ;;  %v5167_v14 = vadd.f32 %v5163_v29, %v5134_v11  ;;  %v4841_v56 = vadd.f32 %v4832_v12, %v4792_v21  ;;  %v5302_v11 = vld [vmem:[%s8291_s1] sm:$0xf]  ;;  %s8295_s1 = sld [smem:[#allocation18_spill]] }
 0xa59   : > { %v4834_v15 = vpop.permute.xlu1 %4833 }
 0xa5a   : > { %v5198_v16 = vmax.f32 %v5194_v13, 0.0  ;;  %v5195_v23 = vadd.f32 %v5182_v36, %v5167_v14  ;;  %v4842_v24 = vadd.f32 %v4834_v15, %v4793_v34 }
 0xa5b   : > { %v4881_v17 = vpop.permute.xlu0 %4880 }
 0xa5c   : > { %v5199_v30 = vmax.f32 %v5195_v23, 0.0  ;;  %v5202_v26 = vmin.f32 %v5198_v16, 6.0  ;;  %v4890_v33 = vadd.f32 %v4881_v17, %v4841_v56 }
 0xa5d   : > { %v4883_v18 = vpop.permute.xlu1 %4882 }
 0xa5e   : > { %v5203_v2 = vmin.f32 %v5199_v30, 6.0  ;;  %v4891_v39 = vadd.f32 %v4883_v18, %v4842_v24 }
 0xa5f   : > { %v4930_v49 = vpop.permute.xlu0 %4929 }
 0xa60   : > { %v5210_v52 = vpack.c.bf16 %v5203_v2, %v5202_v26  ;;  %v4939_v32 = vadd.f32 %v4930_v49, %v4890_v33  ;;  %v5421_v2 = vld [vmem:[%s8292_s26] sm:$0x3]  ;;  %s6017_s26 = sshll.u32 %s8297_s10, 3 }
 0xa61   : > { %v4932_v19 = vpop.permute.xlu1 %4931  ;;  %v5362_v49 = vld [vmem:[%s8293_s15] sm:$0xf]  ;;  %s1014_s15 = scalar_lea.vmem %s7443_s4, %s6017_s26 }
 0xa62   : > { %6546 = vmatprep.subr.bf16.mxu0 %v5210_v52  ;;  %v4940_v40 = vadd.f32 %v4932_v19, %v4891_v39  ;;  %v5368_v33 = vld [vmem:[%s8294_s20] sm:$0x3] }
 0xa63   : > { %6547 = vmatpush3.bf16.msra.mxu0 %v5210_v52  ;;  %v4979_v53 = vpop.permute.xlu0 %4978  ;;  %v5364_v52 = vrot.slane %v5362_v49, 4 }
 0xa64   : > { %v4988_v41 = vadd.f32 %v4979_v53, %v4939_v32 }
 0xa65   : > { %v4981_v20 = vpop.permute.xlu1 %4980 }
 0xa66   : > { %v4989_v43 = vadd.f32 %v4981_v20, %v4940_v40  ;;  %v5370_v40 = vld [vmem:[%s8295_s1] sm:$0xf] }
 0xa67   : > { %v5028_v36 = vpop.permute.xlu0 %5027 }
 0xa68   : > { %v5037_v50 = vadd.f32 %v5028_v36, %v4988_v41 }
 0xa69   : > { %v5030_v60 = vpop.permute.xlu1 %5029 }
 0xa6a   : > { %v5038_v59 = vadd.f32 %v5030_v60, %v4989_v43 }
 0xa6b   : > { %v5077_v42 = vpop.permute.xlu0 %5076 }
 0xa6c   : > { %v5086_v55 = vadd.f32 %v5077_v42, %v5037_v50 }
 0xa6d   : > { %v5079_v46 = vpop.permute.xlu1 %5078 }
 0xa6e   : > { %v5087_v58 = vadd.f32 %v5079_v46, %v5038_v59  ;;  %v5476_v59 = vld [vmem:[#allocation2] sm:$0x1] }
 0xa6f   : > { %v5126_v57 = vpop.permute.xlu0 %5125 }
 0xa70   : > { %v5135_v31 = vadd.f32 %v5126_v57, %v5086_v55  ;;  %v5565_v55 = vld [vmem:[%s7438_s27 + $0x18] sm:$0xff] }
 0xa71   : > { %v5128_v47 = vpop.permute.xlu1 %5127  ;;  %v5573_v57 = vld [vmem:[%s7438_s27 + $0x58] sm:$0xff] }
 0xa72   : > { %v5168_v0 = vadd.f32 %v8093_v63, %v5135_v31  ;;  %v5136_v61 = vadd.f32 %v5128_v47, %v5087_v58  ;;  %v6583_v58 = vpack.c.bf16 %v5573_v57, %v5565_v55  ;;  %v5563_v31 = vld [vmem:[%s7438_s27 + $0x8] sm:$0xff] }
 0xa73   : > { %v5571_v47 = vld [vmem:[%s7438_s27 + $0x48] sm:$0xff] }
 0xa74   : > { %v5196_v62 = vadd.f32 %v8167_v37, %v5168_v0  ;;  %v5169_v1 = vadd.f32 %v8099_v5, %v5136_v61 }
 0xa76   : > { %v5200_v3 = vmax.f32 %v5196_v62, 0.0  ;;  %v5197_v4 = vadd.f32 %v8169_v38, %v5169_v1  ;;  %v6579_v62 = vpack.c.bf16 %v5571_v47, %v5563_v31 }
 0xa78   : > { %v5201_v6 = vmax.f32 %v5197_v4, 0.0  ;;  %v5204_v7 = vmin.f32 %v5200_v3, 6.0  ;;  %v5475_v3 = vld [vmem:[%s7430_s12] sm:$0x1] }
 0xa79   : > { %v5562_v4 = vld [vmem:[%s7438_s27] sm:$0xff] }
 0xa7a   : > { %v5205_v8 = vmin.f32 %v5201_v6, 6.0  ;;  %v5570_v6 = vld [vmem:[%s7438_s27 + $0x40] sm:$0xff] }
 0xa7c   : > { %v5211_v9 = vpack.c.bf16 %v5205_v8, %v5204_v7  ;;  %v5564_v7 = vld [vmem:[%s7438_s27 + $0x10] sm:$0xff]  ;;  %v6581_v8 = vpack.c.bf16 %v5570_v6, %v5562_v4 }
 0xa7e   : > { %6548 = vmatprep.subr.bf16.mxu0 %v5211_v9 }
 0xa7f   : > { %6549 = vmatpush3.bf16.msra.mxu0 %v5211_v9  ;;  %v5572_v9 = vld [vmem:[%s7438_s27 + $0x50] sm:$0xff] }
 0xa80   : > { %6554 = vmatprep.subr.bf16.mxu0 %v7263_v54  ;;  %v5219_v63 = vpop.permute.xlu0 %5218 }
 0xa82   : > { %6551 = vmatmul.mubr.msk.bf16.vlgmr.msra.gmra.mrb[44].mxu0 %vm5246_vm8, %v7218_v22  ;;  %v5224_v37 = vpop.permute.xlu1 %5223  ;;  %v6585_v22 = vpack.c.bf16 %v5572_v9, %v5564_v7 }
 0xa83   : > { %6558 = vmatprep.mubr.msk.bf16.mxu0 %vm7264_vm6, %v7263_v54 }
 0xa84   : > { %v5229_v10 = vpop.permute.xlu0 %5228 }
 0xa86   : > { %v5234_v25 = vpop.permute.xlu1 %5233 }
 0xa8a   : > { %v5352_v12 = vpop.permute.xlu1 %5351 }
 0xb55   : > { %v6552_v5 = vpop.f32.mrb[44].mxu0 }
 0xb56   : > { %v5287_v38 = vpop.f32.mrb[45].mxu0  ;;  %v5296_v48 = vadd.f32 %v6552_v5, %v5229_v10  ;;  %v5569_v5 = vld [vmem:[%s7438_s27 + $0x38] sm:$0xff] }
 0xb57   : > { %v6553_v44 = vpop.f32.mrb[46].mxu0  ;;  %v5288_v51 = vadd.f32 %v5287_v38, %v5219_v63  ;;  %v5567_v63 = vld [vmem:[%s7438_s27 + $0x28] sm:$0xff]  ;;  %v5577_v38 = vld [vmem:[%s7438_s27 + $0x78] sm:$0xff] }
 0xb58   : > { %v5299_v27 = vadd.f32 %v6553_v44, %v5234_v25  ;;  %v5290_v45 = vpop.f32.mrb[47].mxu0  ;;  %v6591_v25 = vpack.c.bf16 %v5577_v38, %v5569_v5  ;;  %v5482_v44 = vlaneseq }
 0xb59   : > { %v5291_v28 = vadd.f32 %v5290_v45, %v5224_v37  ;;  %v5575_v37 = vld [vmem:[%s7438_s27 + $0x68] sm:$0xff] }
 0xb5a   : > { %v5304_v29 = vpack.c.bf16 %v5299_v27, %v5296_v48  ;;  %v6587_v10 = vpack.c.bf16 %v5575_v37, %v5567_v63  ;;  %v5483_v48 = vshrl.u32 %v5482_v44, 7 }
 0xb5b   : > { %v5303_v35 = vpack.c.bf16 %v5291_v28, %v5288_v51  ;;  %v5566_v51 = vld [vmem:[%s7438_s27 + $0x20] sm:$0xff] }
 0xb5c   : > { %v5484_v27 = vsub.s32 0, %v5483_v48  ;;  %v5574_v28 = vld [vmem:[%s7438_s27 + $0x60] sm:$0xff] }
 0xb5d   : > { %6555 = vmatpush3.bf16.msra.mxu0 %v5303_v35  ;;  %v5576_v35 = vld [vmem:[%s7438_s27 + $0x70] sm:$0xff] }
 0xb5e   : > { %6556 = vmatprep.subr.bf16.mxu0 %v7263_v54 }
 0xb61   : > { %6557 = vmatpush3.bf16.msra.mxu0 %v5304_v29  ;;  %v5568_v29 = vld [vmem:[%s7438_s27 + $0x30] sm:$0xff] }
 0xb62   : > { %6562 = vmatprep.subr.bf16.mxu0 %v7263_v54 }
 0xb64   : > { %6559 = vmatmul.mubr.msk.bf16.vlgmr.msra.gmra.mrb[48].mxu0 %vm5246_vm8, %v5302_v11 }
 0xb65   : > { %6564 = vmatprep.mubr.msk.bf16.mxu0 %vm7264_vm6, %v7263_v54 }
 0xc37   : > { %v5342_v13 = vpop.f32.mrb[48].mxu0 }
 0xc38   : > { %v5354_v14 = vadd.f32 %v5352_v12, %v5342_v13  ;;  %v6560_v15 = vpop.f32.mrb[49].mxu0  ;;  %v5357_v16 = vsel %vm5356_vm9, %v5342_v13, 0.0  ;;  %v6589_v13 = vpack.c.bf16 %v5574_v28, %v5566_v51 }
 0xc39   : > { %5358 = vadd.xlane.f32.xlu0 %v5357_v16  ;;  %v5345_v23 = vpop.f32.mrb[50].mxu0 }
 0xc3a   : > { %v5355_v17 = vmax.f32 %v5354_v14, 0.0  ;;  %v6561_v30 = vpop.f32.mrb[51].mxu0  ;;  %v6593_v14 = vpack.c.bf16 %v5576_v35, %v5568_v29  ;;  %v7271_v23 = vmov 1966171168  }
 0xc3c   : > { %v5422_v18 = vpack.c.bf16 %v5355_v17, %v5355_v17  ;;  %v5878_v17 = vunpack.c.l.s4 %v7271_v23 }
 0xc3e   : > { %v5432_v26 = vsel %vm5377_vm10, %v5422_v18, 0  ;;  %v5879_v30 = vunpack.c.0.s8 %v5878_v17 }
 0xc3f   : > { %6569 = vmatpush3.bf16.msra.mxu1 %v5432_v26 }
 0xc40   : > { %6584 = vmatprep.subr.bf16.mxu1 %v6583_v58  ;;  %v5882_v18 = vsub.s32 %v5879_v30, %v5483_v48 }
 0xc42   : > { %6571 = vmatmul.mubr.msk.bf16.vlgmr.msra.gmra.mrb[36].mxu1 %vm5373_vm11, %v5421_v2 }
 0xc43   : > { %5716 = vmatprep.mubr.f32.mxu1 %v7263_v54  ;;  %6586 = vmatpush1.bf16.msra.mxu1 %v6585_v22 }
 0xc44   : > { %6592 = vmatprep.subr.bf16.mxu1 %v6591_v25 }
 0xcc6   : > { %v5359_v19 = vpop.xlane.xlu0 %5358 }
 0xcc7   : > { %v5361_v21 = vmul.f32 0.0625, %v5359_v19 }
 0xcc9   : > { %v5366_v53 = vadd.f32 %v5364_v52, %v5361_v21 }
 0xccb   : > { %v5367_v56 = vmax.f32 %v5366_v53, 0.0 }
 0xccd   : > { %v5369_v34 = vpack.c.bf16 %v5367_v56, %v5367_v56 }
 0xccf   : > { %v5372_v20 = vrot.slane %v5369_v34, 2 }
 0xcd1   : > { %v5379_v24 = vsel %vm5377_vm10, %v5372_v20, 0 }
 0xcd2   : > { %6563 = vmatpush3.bf16.msra.mxu0 %v5379_v24 }
 0xcd3   : > { %6574 = vmatprep.subr.mxu0 %v7263_v54 }
 0xcd5   : > { %6565 = vmatmul.mubr.msk.bf16.vlgmr.msra.gmra.mrb[52].mxu0 %vm5373_vm11, %v5368_v33 }
 0xcd6   : > { %6576 = vmatprep.mubr.msk.f32.mxu0 %vm7264_vm6, %v7263_v54 }
 0xd15   : > { %v5468_v36 = vpop.f32.mrb[36].mxu1 }
 0xd16   : > { %v6572_v39 = vpop.f32.mrb[37].mxu1 }
 0xd17   : > { %v5471_v32 = vpop.f32.mrb[38].mxu1 }
 0xd18   : > { %v6573_v60 = vpop.f32.mrb[39].mxu1 }
 0xda8   : > { %v5415_v41 = vpop.f32.mrb[52].mxu0 }
 0xda9   : > { %v5416_v42 = vadd.f32 %v5415_v41, %v5370_v40  ;;  %v6566_v43 = vpop.f32.mrb[53].mxu0 }
 0xdaa   : > { %v5418_v50 = vpop.f32.mrb[54].mxu0 }
 0xdab   : > { %5425 = vperm.xlu1 %6649, %v5416_v42   ;;  %v6567_v46 = vpop.f32.mrb[55].mxu0 }
 0xdaf   : > { %5479 = vperm.xlu1 %6649, %v5476_v59  }
 0xe2a   : > { %v5426_v0 = vpop.permute.xlu1 %5425 }
 0xe2b   : > { %v5469_v61 = vadd.f32 %v5468_v36, %v5426_v0 }
 0xe2d   : > { %v5474_v1 = vmax.f32 %v5469_v61, 0.0 }
 0xe2e   : > { %v5480_v45 = vpop.permute.xlu1 %5479 }
 0xe2f   : > { %6575 = vmatpush3.msk.msra.mxu0 %vm1129_vm3, %v5474_v1  ;;  %v5485_v11 = vrot.slane %v5480_v45, %v5484_v27 }
 0xe30   : > { %6577 = vmatmul.mubr.msk.f32.vlgmr.msra.gmra.mrb[56].mxu0 %vm5373_vm11, %v5475_v3  ;;  %6580 = vmatprep.subr.bf16.mxu0 %v6579_v62 }
 0xe31   : > { %5645 = vmatprep.mubr.f32.mxu0 %v7263_v54  ;;  %6582 = vmatpush1.bf16.msra.mxu0 %v6581_v8 }
 0xe32   : > { %6588 = vmatprep.subr.bf16.mxu0 %v6587_v10 }
 0xf03   : > { %v5558_v12 = vpop.f32.mrb[56].mxu0 }
 0xf04   : > { %v5559_v15 = vadd.f32 %v5558_v12, %v5485_v11  ;;  %v6578_v16 = vpop.f32.mrb[57].mxu0 }
 0xf06   : > { %6487 = vmatmul.mubr.msk.f32.vlgmr.msra.gmra.mrb[58].mxu0 %vm3521_vm5, %v5559_v15  ;;  %6488 = vmatmul.mubr.msk.f32.vlgmr.msra.gmra.mrb[40].mxu1 %vm3521_vm5, %v5559_v15 }
 0xf07   : > { %6590 = vmatpush1.bf16.msra.mxu0 %v6589_v13  ;;  %6594 = vmatpush1.bf16.msra.mxu1 %v6593_v14 }
 0xf08   : > { %5787 = vmatprep.mubr.f32.mxu0 %v7263_v54  ;;  %5858 = vmatprep.mubr.f32.mxu1 %v7263_v54 }
 0xf0a   : > { %6489 = vmatmul.mubr.msk.f32.vlgmr.msra.gmra.mrb[60].mxu0 %vm3521_vm5, %v5559_v15  ;;  %6490 = vmatmul.mubr.msk.f32.vlgmr.msra.gmra.mrb[42].mxu1 %vm3521_vm5, %v5559_v15 }
 0xfd9   : > { %v5647_v26 = vpop.f32.mrb[58].mxu0  ;;  %v5718_v2 = vpop.f32.mrb[40].mxu1 }
 0xfda   : > { %v5649_v49 = vpop.f32.mrb[59].mxu0  ;;  %v5720_v52 = vpop.f32.mrb[41].mxu1 }
 0xfdb   : > { %v5873_v19 = vcombine.low %v5647_v26, %v5649_v49  ;;  %v5874_v21 = vcombine.low %v5718_v2, %v5720_v52 }
 0xfdd   : > { %v5883_v53 = vrot.slane %v5873_v19, %v5882_v18  ;;  %v5890_v56 = vrot.slane %v5874_v21, %v5882_v18  ;;  %v5789_v34 = vpop.f32.mrb[60].mxu0  ;;  %v5860_v54 = vpop.f32.mrb[42].mxu1 }
 0xfde   : > { %v5791_v20 = vpop.f32.mrb[61].mxu0  ;;  %v5862_v24 = vpop.f32.mrb[43].mxu1 }
 0xfdf   : > { %v5905_v33 = vcombine.low %v5883_v53, %v5890_v56  ;;  %v5875_v36 = vcombine.low %v5789_v34, %v5791_v20  ;;  %v5876_v39 = vcombine.low %v5860_v54, %v5862_v24 }
 0xfe1   : > { %v5913_v32 = vrot.slane %v5905_v33, %v5882_v18  ;;  %v5897_v60 = vrot.slane %v5875_v36, %v5882_v18  ;;  %v5904_v40 = vrot.slane %v5876_v39, %v5882_v18 }
 0xfe3   : > { %v5906_v41 = vcombine.low %v5897_v60, %v5904_v40 }
 0xfe5   : > { %v5920_v42 = vrot.slane %v5906_v41, %v5882_v18 }
 0xfe7   : > { %v5921_v43 = vcombine.low %v5913_v32, %v5920_v42 }
 0xfe9   : > { %5923 = vst [vmem:[%s1014_s15] sm:$0xff] %v5921_v43 }
 0xfea PF: > { %s79_s7 = sadd.s32 1, %s7225_s7  }
 0xfeb   : > { %p76_p4 = scmp.ge.s32.totalorder %s79_s7, 4  }
 0xfed   :  { %78 = sbr.rel (!%p76_p4) target bundleno = 64 (0x40), region = 239 }

</bundles_post_ra>
